<compile_context>
chip_gen: v7x
topology: tpu7x:2x2x1
jax: 0.10.0
libtpu: 0.0.40
codegen_flags: <defaults>
</compile_context>

<pallas_src>
import functools

import numpy as np

import jax
import jax.numpy as jnp
from jax.experimental import pallas as pl
from jax.experimental.pallas import tpu as pltpu


# --------------------------------------------------------------------------
# Fused kernel
# --------------------------------------------------------------------------

def _fused_unet_kernel(
    xpad_ref, sel_ref, pool_ref, up_ref,
    e1w_ref, e1b_ref, e2w_ref, e2b_ref,
    dwu_ref, dwe_ref, db_ref, ow_ref, ob_ref,
    f1w_ref, f1b_ref, f2w_ref, f2b_ref,
    rep_ref, x1_ref,
    e1pad_ref, p1pad_ref, upad_ref,
    *, H, W):
    Hh, Wh = H // 2, W // 2
    F = e1w_ref.shape[-1]       # feat
    F2 = e2w_ref.shape[-1]      # 2*feat

    def conv3x3(pad_ref, w_ref, h, w):
        """'same' 3x3 conv: 9 accumulating MXU matmuls on shifted taps of a
        zero-padded (h+2, w+2, cin) VMEM buffer (no HBM im2col)."""
        c = pad_ref.shape[-1]
        acc = None
        for t in range(9):
            dy, dx = divmod(t, 3)
            tap = pad_ref[dy:dy + h, dx:dx + w, :].reshape(h * w, c)
            part = jnp.dot(tap.astype(w_ref.dtype), w_ref[t],
                           preferred_element_type=jnp.float32)
            acc = part if acc is None else acc + part
        return acc

    # ---------------- encoder ----------------
    e1 = jnp.maximum(conv3x3(xpad_ref, e1w_ref, H, W) + e1b_ref[...], 0.0)   # (H*W, F)

    # stash padded e1 for the decoder skip branch
    e1pad_ref[...] = jnp.zeros(e1pad_ref.shape, e1pad_ref.dtype)
    e1pad_ref[1:H + 1, 1:W + 1, :] = e1.reshape(H, W, F)

    # 2x2 max-pool = max over 4 corner-selection matmuls (0/1 matrices, exact)
    p1 = None
    for k in range(4):
        cand = jnp.dot(pool_ref[k], e1, preferred_element_type=jnp.float32)
        p1 = cand if p1 is None else jnp.maximum(p1, cand)                   # (Hh*Wh, F)

    p1pad_ref[...] = jnp.zeros(p1pad_ref.shape, p1pad_ref.dtype)
    p1pad_ref[1:Hh + 1, 1:Wh + 1, :] = p1.reshape(Hh, Wh, F)

    e2 = jnp.maximum(conv3x3(p1pad_ref, e2w_ref, Hh, Wh) + e2b_ref[...], 0.0)  # (Hh*Wh, 2F)

    # ---------------- decoder ----------------
    # nearest-neighbour 2x upsample as one replication matmul
    u = jnp.dot(up_ref[...], e2, preferred_element_type=jnp.float32)         # (H*W, 2F)
    upad_ref[...] = jnp.zeros(upad_ref.shape, upad_ref.dtype)
    upad_ref[1:H + 1, 1:W + 1, :] = u.reshape(H, W, F2)

    # dec1 3x3 conv over concat([up, skip]) (split per branch) + ReLU,
    # then the fused 1x1 output conv -> UNet logits x1.
    d1 = jnp.maximum(conv3x3(upad_ref, dwu_ref, H, W)
                     + conv3x3(e1pad_ref, dwe_ref, H, W) + db_ref[...], 0.0)  # (H*W, F)
    x1 = jnp.dot(d1.astype(ow_ref.dtype), ow_ref[...],
                 preferred_element_type=jnp.float32) + ob_ref[...]           # (H*W, C)
    x1_ref[...] = x1

    # ---------------- representation head ----------------
    # channel softmax (exact divide), per-patch spatial mean, fc1 -> ReLU -> fc2
    xm = jnp.max(x1, axis=-1, keepdims=True)
    ex = jnp.exp(x1 - xm)
    sm = ex / jnp.sum(ex, axis=-1, keepdims=True)
    x4 = jnp.dot(sel_ref[...], sm, preferred_element_type=jnp.float32)       # (P, C)
    h1 = jnp.maximum(
        jnp.dot(x4.astype(f1w_ref.dtype), f1w_ref[...],
                preferred_element_type=jnp.float32) + f1b_ref[...], 0.0)
    rep_ref[...] = (jnp.dot(h1.astype(f2w_ref.dtype), f2w_ref[...],
                            preferred_element_type=jnp.float32) + f2b_ref[...])


# --------------------------------------------------------------------------
# Wrapper-side constant builders (trace-time, constant-folded by XLA)
# --------------------------------------------------------------------------

def _pool_corner_selectors(H, W):
    """(4, H/2*W/2, H*W) 0/1 matrices: S[k] @ x picks corner k of each 2x2 window."""
    Hh, Wh = H // 2, W // 2
    S = np.zeros((4, Hh * Wh, H * W), np.float32)
    for k in range(4):
        ki, kj = divmod(k, 2)
        for r in range(Hh):
            for c in range(Wh):
                S[k, r * Wh + c, (2 * r + ki) * W + (2 * c + kj)] = 1.0
    return jnp.asarray(S)


def _upsample_replicator(H, W):
    """(H*W, H/2*W/2) 0/1 matrix: R @ x is the nearest-neighbour 2x upsample."""
    Hh, Wh = H // 2, W // 2
    R = np.zeros((H * W, Hh * Wh), np.float32)
    for y in range(H):
        for x in range(W):
            R[y * W + x, (y // 2) * Wh + (x // 2)] = 1.0
    return jnp.asarray(R)


def _patch_selection_matrix(coords, H, W, ph, pw):
    """(P, H*W) matrix: row p averages the pixels of patch p (matches torch's
    x2[:, :, i:i+ph, j:j+pw].mean() even for border-clipped patches)."""
    idx = jnp.arange(H * W, dtype=jnp.int32)
    r = (idx // W)[None, :]
    c = (idx % W)[None, :]
    i0 = coords[:, 0:1].astype(jnp.int32)
    j0 = coords[:, 1:2].astype(jnp.int32)
    mask = ((r >= i0) & (r < i0 + ph) & (c >= j0) & (c < j0 + pw)).astype(jnp.float32)
    cnt = jnp.maximum(jnp.sum(mask, axis=1, keepdims=True), 1.0)
    return mask / cnt


# --------------------------------------------------------------------------
# Model: parameters + forward
# --------------------------------------------------------------------------

def init_params(key, cin, feat, out_dim, rep_len):
    ks = jax.random.split(key, 13)
    n = lambda k, shp, s=0.1: s * jax.random.normal(k, shp, jnp.float32)
    bf = jnp.bfloat16
    return {
        # UNet (minimal 1-level encoder/decoder), matmul-ready layouts.
        "enc1_w": n(ks[0], (9, cin, feat)).astype(bf),
        "enc1_b": n(ks[1], (1, feat)),
        "enc2_w": n(ks[2], (9, feat, 2 * feat)).astype(bf),
        "enc2_b": n(ks[3], (1, 2 * feat)),
        "dec1_wu": n(ks[4], (9, 2 * feat, feat)).astype(bf),   # upsampled branch
        "dec1_we": n(ks[5], (9, feat, feat)).astype(bf),        # skip branch
        "dec1_b": n(ks[6], (1, feat)),
        "out_w": n(ks[7], (feat, out_dim)).astype(bf),
        "out_b": n(ks[8], (1, out_dim)),
        # representation head
        "fc1_w": n(ks[9], (out_dim, rep_len // 2)).astype(bf),
        "fc1_b": n(ks[10], (1, rep_len // 2)),
        "fc2_w": n(ks[11], (rep_len // 2, rep_len)).astype(bf),
        "fc2_b": n(ks[12], (1, rep_len)),
    }


def representation_unet_forward(params, x, patches_coords, patch_size):
    """x: (N,H,W,Cin) NHWC; patches_coords: (P,2) int32 (row, col) corners.

    Returns (output, x1) like the PyTorch module:
      output: (N, P, representation_len)
      x1    : (N, H, W, unet_out_dimensions)  (UNet logits, pre-activation)
    """
    N, H, W, Cin = x.shape
    assert H % 2 == 0 and W % 2 == 0, "requires even H, W"
    assert H * W <= 1024, "whole-image-per-grid-step kernel; see TODO for larger images"
    ph, pw = patch_size
    P = patches_coords.shape[0]
    F = params["enc1_w"].shape[2]
    F2 = params["enc2_w"].shape[2]
    Cout = params["out_w"].shape[1]
    R2 = params["fc1_w"].shape[1]
    R = params["fc2_w"].shape[1]
    HW = H * W

    # Wrapper-side prep: +1 halo pad of the input; constant pool/upsample/patch
    # matrices (pure functions of static shapes -> constant-folded).
    xpad = jnp.pad(x, ((0, 0), (1, 1), (1, 1), (0, 0)))
    pool_sel = _pool_corner_selectors(H, W)                  # (4, HW/4, HW) f32
    up_rep = _upsample_replicator(H, W)                      # (HW, HW/4)    f32
    sel = _patch_selection_matrix(patches_coords, H, W, ph, pw)   # (P, HW)  f32

    const2 = lambda n: (0, 0)
    const3 = lambda n: (0, 0, 0)

    rep, x1 = pl.pallas_call(
        functools.partial(_fused_unet_kernel, H=H, W=W),
        out_shape=(jax.ShapeDtypeStruct((N, P, R), jnp.float32),
                   jax.ShapeDtypeStruct((N, HW, Cout), jnp.float32)),
        grid=(N,),
        in_specs=[
            pl.BlockSpec((None, H + 2, W + 2, Cin), lambda n: (n, 0, 0, 0)),
            pl.BlockSpec((P, HW), const2),
            pl.BlockSpec((4, HW // 4, HW), const3),
            pl.BlockSpec((HW, HW // 4), const2),
            pl.BlockSpec((9, Cin, F), const3),
            pl.BlockSpec((1, F), const2),
            pl.BlockSpec((9, F, F2), const3),
            pl.BlockSpec((1, F2), const2),
            pl.BlockSpec((9, F2, F), const3),
            pl.BlockSpec((9, F, F), const3),
            pl.BlockSpec((1, F), const2),
            pl.BlockSpec((F, Cout), const2),
            pl.BlockSpec((1, Cout), const2),
            pl.BlockSpec((Cout, R2), const2),
            pl.BlockSpec((1, R2), const2),
            pl.BlockSpec((R2, R), const2),
            pl.BlockSpec((1, R), const2),
        ],
        out_specs=(
            pl.BlockSpec((None, P, R), lambda n: (n, 0, 0)),
            pl.BlockSpec((None, HW, Cout), lambda n: (n, 0, 0)),
        ),
        scratch_shapes=[
            pltpu.VMEM((H + 2, W + 2, F), jnp.float32),          # padded e1 (skip)
            pltpu.VMEM((H // 2 + 2, W // 2 + 2, F), jnp.float32),  # padded pooled
            pltpu.VMEM((H + 2, W + 2, F2), jnp.float32),         # padded upsampled
        ],
        compiler_params=pltpu.CompilerParams(dimension_semantics=("parallel",)),
    )(xpad, sel, pool_sel, up_rep,
      params["enc1_w"], params["enc1_b"], params["enc2_w"], params["enc2_b"],
      params["dec1_wu"], params["dec1_we"], params["dec1_b"],
      params["out_w"], params["out_b"],
      params["fc1_w"], params["fc1_b"], params["fc2_w"], params["fc2_b"])

    return rep, x1.reshape(N, H, W, Cout)


# --------------------------------------------------------------------------
# Demo
# --------------------------------------------------------------------------

if __name__ == "__main__":
    key = jax.random.PRNGKey(0)
    k_x, k_p = jax.random.split(key)

    N, H, W, Cin = 2, 16, 16, 3
    unet_out_dimensions = 4
    feat = 8
    patch_size = (8, 8)
    representation_len = 64

    x = jax.random.normal(k_x, (N, H, W, Cin), jnp.float32)
    # four non-overlapping 8x8 patch corners (row, col)
    patches_coords = jnp.array([[0, 0], [0, 8], [8, 0], [8, 8]], dtype=jnp.int32)

    params = init_params(k_p, Cin, feat, unet_out_dimensions, representation_len)

    fwd = jax.jit(functools.partial(representation_unet_forward,
                                    patch_size=patch_size))
    output, x1 = fwd(params, x, patches_coords)
    jax.block_until_ready((output, x1))

    assert output.shape == (N, patches_coords.shape[0], representation_len)
    assert x1.shape == (N, H, W, unet_out_dimensions)
    print("KERNEL_OK")
</pallas_src>

<mosaic_0001>
module attributes {stable_mosaic.version = 11 : i64} {
  func.func @_fused_unet_kernel(%arg0: i32, %arg1: memref<1x18x18x3xf32, #tpu.memory_space<vmem>>, %arg2: memref<4x256xf32, #tpu.memory_space<vmem>>, %arg3: memref<4x64x256xf32, #tpu.memory_space<vmem>>, %arg4: memref<256x64xf32, #tpu.memory_space<vmem>>, %arg5: memref<9x3x8xbf16, #tpu.memory_space<vmem>>, %arg6: memref<1x8xf32, #tpu.memory_space<vmem>>, %arg7: memref<9x8x16xbf16, #tpu.memory_space<vmem>>, %arg8: memref<1x16xf32, #tpu.memory_space<vmem>>, %arg9: memref<9x16x8xbf16, #tpu.memory_space<vmem>>, %arg10: memref<9x8x8xbf16, #tpu.memory_space<vmem>>, %arg11: memref<1x8xf32, #tpu.memory_space<vmem>>, %arg12: memref<8x4xbf16, #tpu.memory_space<vmem>>, %arg13: memref<1x4xf32, #tpu.memory_space<vmem>>, %arg14: memref<4x32xbf16, #tpu.memory_space<vmem>>, %arg15: memref<1x32xf32, #tpu.memory_space<vmem>>, %arg16: memref<32x64xbf16, #tpu.memory_space<vmem>>, %arg17: memref<1x64xf32, #tpu.memory_space<vmem>>, %arg18: memref<1x4x64xf32, #tpu.memory_space<vmem>>, %arg19: memref<1x256x4xf32, #tpu.memory_space<vmem>>, %arg20: memref<18x18x8xf32, #tpu.memory_space<vmem>>, %arg21: memref<10x10x8xf32, #tpu.memory_space<vmem>>, %arg22: memref<18x18x16xf32, #tpu.memory_space<vmem>>) attributes {dimension_semantics = [#tpu.dimension_semantics<parallel>], iteration_bounds = array<i64: 2>, scalar_prefetch = 0 : i64, scratch_operands = 3 : i64, tpu.core_type = #tpu.core_type<tc>, window_params = [{transform_indices = @transform_0, window_bounds = array<i64: 1, 18, 18, 3>}, {pipeline_mode = #tpu.pipeline_mode<synchronous>, transform_indices = @transform_1, window_bounds = array<i64: 4, 256>}, {pipeline_mode = #tpu.pipeline_mode<synchronous>, transform_indices = @transform_2, window_bounds = array<i64: 4, 64, 256>}, {pipeline_mode = #tpu.pipeline_mode<synchronous>, transform_indices = @transform_3, window_bounds = array<i64: 256, 64>}, {pipeline_mode = #tpu.pipeline_mode<synchronous>, transform_indices = @transform_4, window_bounds = array<i64: 9, 3, 8>}, {pipeline_mode = #tpu.pipeline_mode<synchronous>, transform_indices = @transform_5, window_bounds = array<i64: 1, 8>}, {pipeline_mode = #tpu.pipeline_mode<synchronous>, transform_indices = @transform_6, window_bounds = array<i64: 9, 8, 16>}, {pipeline_mode = #tpu.pipeline_mode<synchronous>, transform_indices = @transform_7, window_bounds = array<i64: 1, 16>}, {pipeline_mode = #tpu.pipeline_mode<synchronous>, transform_indices = @transform_8, window_bounds = array<i64: 9, 16, 8>}, {pipeline_mode = #tpu.pipeline_mode<synchronous>, transform_indices = @transform_9, window_bounds = array<i64: 9, 8, 8>}, {pipeline_mode = #tpu.pipeline_mode<synchronous>, transform_indices = @transform_10, window_bounds = array<i64: 1, 8>}, {pipeline_mode = #tpu.pipeline_mode<synchronous>, transform_indices = @transform_11, window_bounds = array<i64: 8, 4>}, {pipeline_mode = #tpu.pipeline_mode<synchronous>, transform_indices = @transform_12, window_bounds = array<i64: 1, 4>}, {pipeline_mode = #tpu.pipeline_mode<synchronous>, transform_indices = @transform_13, window_bounds = array<i64: 4, 32>}, {pipeline_mode = #tpu.pipeline_mode<synchronous>, transform_indices = @transform_14, window_bounds = array<i64: 1, 32>}, {pipeline_mode = #tpu.pipeline_mode<synchronous>, transform_indices = @transform_15, window_bounds = array<i64: 32, 64>}, {pipeline_mode = #tpu.pipeline_mode<synchronous>, transform_indices = @transform_16, window_bounds = array<i64: 1, 64>}, {transform_indices = @transform_17, window_bounds = array<i64: 1, 4, 64>}, {transform_indices = @transform_18, window_bounds = array<i64: 1, 256, 4>}]} {
    %c0 = arith.constant 0 : index
    %c0_0 = arith.constant 0 : index
    %c0_1 = arith.constant 0 : index
    %c0_2 = arith.constant 0 : index
    %0 = vector.load %arg1[%c0, %c0_0, %c0_1, %c0_2] : memref<1x18x18x3xf32, #tpu.memory_space<vmem>>, vector<1x16x16x3xf32>
    %1 = vector.shape_cast %0 : vector<1x16x16x3xf32> to vector<16x16x3xf32>
    %2 = vector.shape_cast %1 : vector<16x16x3xf32> to vector<256x3xf32>
    %3 = arith.truncf %2 : vector<256x3xf32> to vector<256x3xbf16>
    %c0_3 = arith.constant 0 : index
    %c0_4 = arith.constant 0 : index
    %c0_5 = arith.constant 0 : index
    %4 = vector.load %arg5[%c0_3, %c0_4, %c0_5] : memref<9x3x8xbf16, #tpu.memory_space<vmem>>, vector<1x3x8xbf16>
    %5 = vector.shape_cast %4 : vector<1x3x8xbf16> to vector<3x8xbf16>
    %cst = arith.constant dense<0.000000e+00> : vector<256x8xf32>
    %6 = tpu.matmul %3, %5, %cst {dimension_numbers = #tpu.dot_dimension_numbers<[1], [0], [0], [1], [0, 0, 1, 1], [], []>} : vector<256x3xbf16>, vector<3x8xbf16>, vector<256x8xf32> -> vector<256x8xf32>
    %c0_6 = arith.constant 0 : index
    %c0_7 = arith.constant 0 : index
    %c1 = arith.constant 1 : index
    %c0_8 = arith.constant 0 : index
    %7 = vector.load %arg1[%c0_6, %c0_7, %c1, %c0_8] : memref<1x18x18x3xf32, #tpu.memory_space<vmem>>, vector<1x16x16x3xf32>
    %8 = vector.shape_cast %7 : vector<1x16x16x3xf32> to vector<16x16x3xf32>
    %9 = vector.shape_cast %8 : vector<16x16x3xf32> to vector<256x3xf32>
    %10 = arith.truncf %9 : vector<256x3xf32> to vector<256x3xbf16>
    %c1_9 = arith.constant 1 : index
    %c0_10 = arith.constant 0 : index
    %c0_11 = arith.constant 0 : index
    %11 = vector.load %arg5[%c1_9, %c0_10, %c0_11] : memref<9x3x8xbf16, #tpu.memory_space<vmem>>, vector<1x3x8xbf16>
    %12 = vector.shape_cast %11 : vector<1x3x8xbf16> to vector<3x8xbf16>
    %cst_12 = arith.constant dense<0.000000e+00> : vector<256x8xf32>
    %13 = tpu.matmul %10, %12, %cst_12 {dimension_numbers = #tpu.dot_dimension_numbers<[1], [0], [0], [1], [0, 0, 1, 1], [], []>} : vector<256x3xbf16>, vector<3x8xbf16>, vector<256x8xf32> -> vector<256x8xf32>
    %14 = arith.addf %6, %13 : vector<256x8xf32>
    %c0_13 = arith.constant 0 : index
    %c0_14 = arith.constant 0 : index
    %c2 = arith.constant 2 : index
    %c0_15 = arith.constant 0 : index
    %15 = vector.load %arg1[%c0_13, %c0_14, %c2, %c0_15] : memref<1x18x18x3xf32, #tpu.memory_space<vmem>>, vector<1x16x16x3xf32>
    %16 = vector.shape_cast %15 : vector<1x16x16x3xf32> to vector<16x16x3xf32>
    %17 = vector.shape_cast %16 : vector<16x16x3xf32> to vector<256x3xf32>
    %18 = arith.truncf %17 : vector<256x3xf32> to vector<256x3xbf16>
    %c2_16 = arith.constant 2 : index
    %c0_17 = arith.constant 0 : index
    %c0_18 = arith.constant 0 : index
    %19 = vector.load %arg5[%c2_16, %c0_17, %c0_18] : memref<9x3x8xbf16, #tpu.memory_space<vmem>>, vector<1x3x8xbf16>
    %20 = vector.shape_cast %19 : vector<1x3x8xbf16> to vector<3x8xbf16>
    %cst_19 = arith.constant dense<0.000000e+00> : vector<256x8xf32>
    %21 = tpu.matmul %18, %20, %cst_19 {dimension_numbers = #tpu.dot_dimension_numbers<[1], [0], [0], [1], [0, 0, 1, 1], [], []>} : vector<256x3xbf16>, vector<3x8xbf16>, vector<256x8xf32> -> vector<256x8xf32>
    %22 = arith.addf %14, %21 : vector<256x8xf32>
    %c0_20 = arith.constant 0 : index
    %c1_21 = arith.constant 1 : index
    %c0_22 = arith.constant 0 : index
    %c0_23 = arith.constant 0 : index
    %23 = vector.load %arg1[%c0_20, %c1_21, %c0_22, %c0_23] : memref<1x18x18x3xf32, #tpu.memory_space<vmem>>, vector<1x16x16x3xf32>
    %24 = vector.shape_cast %23 : vector<1x16x16x3xf32> to vector<16x16x3xf32>
    %25 = vector.shape_cast %24 : vector<16x16x3xf32> to vector<256x3xf32>
    %26 = arith.truncf %25 : vector<256x3xf32> to vector<256x3xbf16>
    %c3 = arith.constant 3 : index
    %c0_24 = arith.constant 0 : index
    %c0_25 = arith.constant 0 : index
    %27 = vector.load %arg5[%c3, %c0_24, %c0_25] : memref<9x3x8xbf16, #tpu.memory_space<vmem>>, vector<1x3x8xbf16>
    %28 = vector.shape_cast %27 : vector<1x3x8xbf16> to vector<3x8xbf16>
    %cst_26 = arith.constant dense<0.000000e+00> : vector<256x8xf32>
    %29 = tpu.matmul %26, %28, %cst_26 {dimension_numbers = #tpu.dot_dimension_numbers<[1], [0], [0], [1], [0, 0, 1, 1], [], []>} : vector<256x3xbf16>, vector<3x8xbf16>, vector<256x8xf32> -> vector<256x8xf32>
    %30 = arith.addf %22, %29 : vector<256x8xf32>
    %c0_27 = arith.constant 0 : index
    %c1_28 = arith.constant 1 : index
    %c1_29 = arith.constant 1 : index
    %c0_30 = arith.constant 0 : index
    %31 = vector.load %arg1[%c0_27, %c1_28, %c1_29, %c0_30] : memref<1x18x18x3xf32, #tpu.memory_space<vmem>>, vector<1x16x16x3xf32>
    %32 = vector.shape_cast %31 : vector<1x16x16x3xf32> to vector<16x16x3xf32>
    %33 = vector.shape_cast %32 : vector<16x16x3xf32> to vector<256x3xf32>
    %34 = arith.truncf %33 : vector<256x3xf32> to vector<256x3xbf16>
    %c4 = arith.constant 4 : index
    %c0_31 = arith.constant 0 : index
    %c0_32 = arith.constant 0 : index
    %35 = vector.load %arg5[%c4, %c0_31, %c0_32] : memref<9x3x8xbf16, #tpu.memory_space<vmem>>, vector<1x3x8xbf16>
    %36 = vector.shape_cast %35 : vector<1x3x8xbf16> to vector<3x8xbf16>
    %cst_33 = arith.constant dense<0.000000e+00> : vector<256x8xf32>
    %37 = tpu.matmul %34, %36, %cst_33 {dimension_numbers = #tpu.dot_dimension_numbers<[1], [0], [0], [1], [0, 0, 1, 1], [], []>} : vector<256x3xbf16>, vector<3x8xbf16>, vector<256x8xf32> -> vector<256x8xf32>
    %38 = arith.addf %30, %37 : vector<256x8xf32>
    %c0_34 = arith.constant 0 : index
    %c1_35 = arith.constant 1 : index
    %c2_36 = arith.constant 2 : index
    %c0_37 = arith.constant 0 : index
    %39 = vector.load %arg1[%c0_34, %c1_35, %c2_36, %c0_37] : memref<1x18x18x3xf32, #tpu.memory_space<vmem>>, vector<1x16x16x3xf32>
    %40 = vector.shape_cast %39 : vector<1x16x16x3xf32> to vector<16x16x3xf32>
    %41 = vector.shape_cast %40 : vector<16x16x3xf32> to vector<256x3xf32>
    %42 = arith.truncf %41 : vector<256x3xf32> to vector<256x3xbf16>
    %c5 = arith.constant 5 : index
    %c0_38 = arith.constant 0 : index
    %c0_39 = arith.constant 0 : index
    %43 = vector.load %arg5[%c5, %c0_38, %c0_39] : memref<9x3x8xbf16, #tpu.memory_space<vmem>>, vector<1x3x8xbf16>
    %44 = vector.shape_cast %43 : vector<1x3x8xbf16> to vector<3x8xbf16>
    %cst_40 = arith.constant dense<0.000000e+00> : vector<256x8xf32>
    %45 = tpu.matmul %42, %44, %cst_40 {dimension_numbers = #tpu.dot_dimension_numbers<[1], [0], [0], [1], [0, 0, 1, 1], [], []>} : vector<256x3xbf16>, vector<3x8xbf16>, vector<256x8xf32> -> vector<256x8xf32>
    %46 = arith.addf %38, %45 : vector<256x8xf32>
    %c0_41 = arith.constant 0 : index
    %c2_42 = arith.constant 2 : index
    %c0_43 = arith.constant 0 : index
    %c0_44 = arith.constant 0 : index
    %47 = vector.load %arg1[%c0_41, %c2_42, %c0_43, %c0_44] : memref<1x18x18x3xf32, #tpu.memory_space<vmem>>, vector<1x16x16x3xf32>
    %48 = vector.shape_cast %47 : vector<1x16x16x3xf32> to vector<16x16x3xf32>
    %49 = vector.shape_cast %48 : vector<16x16x3xf32> to vector<256x3xf32>
    %50 = arith.truncf %49 : vector<256x3xf32> to vector<256x3xbf16>
    %c6 = arith.constant 6 : index
    %c0_45 = arith.constant 0 : index
    %c0_46 = arith.constant 0 : index
    %51 = vector.load %arg5[%c6, %c0_45, %c0_46] : memref<9x3x8xbf16, #tpu.memory_space<vmem>>, vector<1x3x8xbf16>
    %52 = vector.shape_cast %51 : vector<1x3x8xbf16> to vector<3x8xbf16>
    %cst_47 = arith.constant dense<0.000000e+00> : vector<256x8xf32>
    %53 = tpu.matmul %50, %52, %cst_47 {dimension_numbers = #tpu.dot_dimension_numbers<[1], [0], [0], [1], [0, 0, 1, 1], [], []>} : vector<256x3xbf16>, vector<3x8xbf16>, vector<256x8xf32> -> vector<256x8xf32>
    %54 = arith.addf %46, %53 : vector<256x8xf32>
    %c0_48 = arith.constant 0 : index
    %c2_49 = arith.constant 2 : index
    %c1_50 = arith.constant 1 : index
    %c0_51 = arith.constant 0 : index
    %55 = vector.load %arg1[%c0_48, %c2_49, %c1_50, %c0_51] : memref<1x18x18x3xf32, #tpu.memory_space<vmem>>, vector<1x16x16x3xf32>
    %56 = vector.shape_cast %55 : vector<1x16x16x3xf32> to vector<16x16x3xf32>
    %57 = vector.shape_cast %56 : vector<16x16x3xf32> to vector<256x3xf32>
    %58 = arith.truncf %57 : vector<256x3xf32> to vector<256x3xbf16>
    %c7 = arith.constant 7 : index
    %c0_52 = arith.constant 0 : index
    %c0_53 = arith.constant 0 : index
    %59 = vector.load %arg5[%c7, %c0_52, %c0_53] : memref<9x3x8xbf16, #tpu.memory_space<vmem>>, vector<1x3x8xbf16>
    %60 = vector.shape_cast %59 : vector<1x3x8xbf16> to vector<3x8xbf16>
    %cst_54 = arith.constant dense<0.000000e+00> : vector<256x8xf32>
    %61 = tpu.matmul %58, %60, %cst_54 {dimension_numbers = #tpu.dot_dimension_numbers<[1], [0], [0], [1], [0, 0, 1, 1], [], []>} : vector<256x3xbf16>, vector<3x8xbf16>, vector<256x8xf32> -> vector<256x8xf32>
    %62 = arith.addf %54, %61 : vector<256x8xf32>
    %c0_55 = arith.constant 0 : index
    %c2_56 = arith.constant 2 : index
    %c2_57 = arith.constant 2 : index
    %c0_58 = arith.constant 0 : index
    %63 = vector.load %arg1[%c0_55, %c2_56, %c2_57, %c0_58] : memref<1x18x18x3xf32, #tpu.memory_space<vmem>>, vector<1x16x16x3xf32>
    %64 = vector.shape_cast %63 : vector<1x16x16x3xf32> to vector<16x16x3xf32>
    %65 = vector.shape_cast %64 : vector<16x16x3xf32> to vector<256x3xf32>
    %66 = arith.truncf %65 : vector<256x3xf32> to vector<256x3xbf16>
    %c8 = arith.constant 8 : index
    %c0_59 = arith.constant 0 : index
    %c0_60 = arith.constant 0 : index
    %67 = vector.load %arg5[%c8, %c0_59, %c0_60] : memref<9x3x8xbf16, #tpu.memory_space<vmem>>, vector<1x3x8xbf16>
    %68 = vector.shape_cast %67 : vector<1x3x8xbf16> to vector<3x8xbf16>
    %cst_61 = arith.constant dense<0.000000e+00> : vector<256x8xf32>
    %69 = tpu.matmul %66, %68, %cst_61 {dimension_numbers = #tpu.dot_dimension_numbers<[1], [0], [0], [1], [0, 0, 1, 1], [], []>} : vector<256x3xbf16>, vector<3x8xbf16>, vector<256x8xf32> -> vector<256x8xf32>
    %70 = arith.addf %62, %69 : vector<256x8xf32>
    %c0_62 = arith.constant 0 : index
    %c0_63 = arith.constant 0 : index
    %71 = vector.load %arg6[%c0_62, %c0_63] : memref<1x8xf32, #tpu.memory_space<vmem>>, vector<1x8xf32>
    %72 = vector.broadcast %71 : vector<1x8xf32> to vector<256x8xf32>
    %73 = arith.addf %70, %72 : vector<256x8xf32>
    %cst_64 = arith.constant 0.000000e+00 : f32
    %74 = vector.broadcast %cst_64 : f32 to vector<256x8xf32>
    %75 = arith.maximumf %73, %74 : vector<256x8xf32>
    %cst_65 = arith.constant 0.000000e+00 : f32
    %76 = vector.broadcast %cst_65 : f32 to vector<18x18x8xf32>
    %c0_66 = arith.constant 0 : index
    %c0_67 = arith.constant 0 : index
    %c0_68 = arith.constant 0 : index
    %77 = vector.load %arg20[%c0_66, %c0_67, %c0_68] : memref<18x18x8xf32, #tpu.memory_space<vmem>>, vector<18x18x8xf32>
    tpu.vector_store %arg20[%c0_66, %c0_67, %c0_68], %76 {strides = array<i32>} : memref<18x18x8xf32, #tpu.memory_space<vmem>>, vector<18x18x8xf32>,
    %78 = vector.shape_cast %75 : vector<256x8xf32> to vector<16x16x8xf32>
    %c1_69 = arith.constant 1 : index
    %c1_70 = arith.constant 1 : index
    %c0_71 = arith.constant 0 : index
    %79 = vector.load %arg20[%c1_69, %c1_70, %c0_71] : memref<18x18x8xf32, #tpu.memory_space<vmem>>, vector<16x16x8xf32>
    tpu.vector_store %arg20[%c1_69, %c1_70, %c0_71], %78 {strides = array<i32>} : memref<18x18x8xf32, #tpu.memory_space<vmem>>, vector<16x16x8xf32>,
    %c0_72 = arith.constant 0 : index
    %c0_73 = arith.constant 0 : index
    %c0_74 = arith.constant 0 : index
    %80 = vector.load %arg3[%c0_72, %c0_73, %c0_74] : memref<4x64x256xf32, #tpu.memory_space<vmem>>, vector<1x64x256xf32>
    %81 = vector.shape_cast %80 : vector<1x64x256xf32> to vector<64x256xf32>
    %cst_75 = arith.constant dense<0.000000e+00> : vector<64x8xf32>
    %82 = tpu.matmul %81, %75, %cst_75 {dimension_numbers = #tpu.dot_dimension_numbers<[1], [0], [0], [1], [0, 0, 1, 1], [], []>} : vector<64x256xf32>, vector<256x8xf32>, vector<64x8xf32> -> vector<64x8xf32>
    %c1_76 = arith.constant 1 : index
    %c0_77 = arith.constant 0 : index
    %c0_78 = arith.constant 0 : index
    %83 = vector.load %arg3[%c1_76, %c0_77, %c0_78] : memref<4x64x256xf32, #tpu.memory_space<vmem>>, vector<1x64x256xf32>
    %84 = vector.shape_cast %83 : vector<1x64x256xf32> to vector<64x256xf32>
    %cst_79 = arith.constant dense<0.000000e+00> : vector<64x8xf32>
    %85 = tpu.matmul %84, %75, %cst_79 {dimension_numbers = #tpu.dot_dimension_numbers<[1], [0], [0], [1], [0, 0, 1, 1], [], []>} : vector<64x256xf32>, vector<256x8xf32>, vector<64x8xf32> -> vector<64x8xf32>
    %86 = arith.maximumf %82, %85 : vector<64x8xf32>
    %c2_80 = arith.constant 2 : index
    %c0_81 = arith.constant 0 : index
    %c0_82 = arith.constant 0 : index
    %87 = vector.load %arg3[%c2_80, %c0_81, %c0_82] : memref<4x64x256xf32, #tpu.memory_space<vmem>>, vector<1x64x256xf32>
    %88 = vector.shape_cast %87 : vector<1x64x256xf32> to vector<64x256xf32>
    %cst_83 = arith.constant dense<0.000000e+00> : vector<64x8xf32>
    %89 = tpu.matmul %88, %75, %cst_83 {dimension_numbers = #tpu.dot_dimension_numbers<[1], [0], [0], [1], [0, 0, 1, 1], [], []>} : vector<64x256xf32>, vector<256x8xf32>, vector<64x8xf32> -> vector<64x8xf32>
    %90 = arith.maximumf %86, %89 : vector<64x8xf32>
    %c3_84 = arith.constant 3 : index
    %c0_85 = arith.constant 0 : index
    %c0_86 = arith.constant 0 : index
    %91 = vector.load %arg3[%c3_84, %c0_85, %c0_86] : memref<4x64x256xf32, #tpu.memory_space<vmem>>, vector<1x64x256xf32>
    %92 = vector.shape_cast %91 : vector<1x64x256xf32> to vector<64x256xf32>
    %cst_87 = arith.constant dense<0.000000e+00> : vector<64x8xf32>
    %93 = tpu.matmul %92, %75, %cst_87 {dimension_numbers = #tpu.dot_dimension_numbers<[1], [0], [0], [1], [0, 0, 1, 1], [], []>} : vector<64x256xf32>, vector<256x8xf32>, vector<64x8xf32> -> vector<64x8xf32>
    %94 = arith.maximumf %90, %93 : vector<64x8xf32>
    %cst_88 = arith.constant 0.000000e+00 : f32
    %95 = vector.broadcast %cst_88 : f32 to vector<10x10x8xf32>
    %c0_89 = arith.constant 0 : index
    %c0_90 = arith.constant 0 : index
    %c0_91 = arith.constant 0 : index
    %96 = vector.load %arg21[%c0_89, %c0_90, %c0_91] : memref<10x10x8xf32, #tpu.memory_space<vmem>>, vector<10x10x8xf32>
    tpu.vector_store %arg21[%c0_89, %c0_90, %c0_91], %95 {strides = array<i32>} : memref<10x10x8xf32, #tpu.memory_space<vmem>>, vector<10x10x8xf32>,
    %97 = vector.shape_cast %94 : vector<64x8xf32> to vector<8x8x8xf32>
    %c1_92 = arith.constant 1 : index
    %c1_93 = arith.constant 1 : index
    %c0_94 = arith.constant 0 : index
    %98 = vector.load %arg21[%c1_92, %c1_93, %c0_94] : memref<10x10x8xf32, #tpu.memory_space<vmem>>, vector<8x8x8xf32>
    tpu.vector_store %arg21[%c1_92, %c1_93, %c0_94], %97 {strides = array<i32>} : memref<10x10x8xf32, #tpu.memory_space<vmem>>, vector<8x8x8xf32>,
    %c0_95 = arith.constant 0 : index
    %c0_96 = arith.constant 0 : index
    %c0_97 = arith.constant 0 : index
    %99 = vector.load %arg21[%c0_95, %c0_96, %c0_97] : memref<10x10x8xf32, #tpu.memory_space<vmem>>, vector<8x8x8xf32>
    %100 = vector.shape_cast %99 : vector<8x8x8xf32> to vector<64x8xf32>
    %101 = arith.truncf %100 : vector<64x8xf32> to vector<64x8xbf16>
    %c0_98 = arith.constant 0 : index
    %c0_99 = arith.constant 0 : index
    %c0_100 = arith.constant 0 : index
    %102 = vector.load %arg7[%c0_98, %c0_99, %c0_100] : memref<9x8x16xbf16, #tpu.memory_space<vmem>>, vector<1x8x16xbf16>
    %103 = vector.shape_cast %102 : vector<1x8x16xbf16> to vector<8x16xbf16>
    %cst_101 = arith.constant dense<0.000000e+00> : vector<64x16xf32>
    %104 = tpu.matmul %101, %103, %cst_101 {dimension_numbers = #tpu.dot_dimension_numbers<[1], [0], [0], [1], [0, 0, 1, 1], [], []>} : vector<64x8xbf16>, vector<8x16xbf16>, vector<64x16xf32> -> vector<64x16xf32>
    %c0_102 = arith.constant 0 : index
    %c1_103 = arith.constant 1 : index
    %c0_104 = arith.constant 0 : index
    %105 = vector.load %arg21[%c0_102, %c1_103, %c0_104] : memref<10x10x8xf32, #tpu.memory_space<vmem>>, vector<8x8x8xf32>
    %106 = vector.shape_cast %105 : vector<8x8x8xf32> to vector<64x8xf32>
    %107 = arith.truncf %106 : vector<64x8xf32> to vector<64x8xbf16>
    %c1_105 = arith.constant 1 : index
    %c0_106 = arith.constant 0 : index
    %c0_107 = arith.constant 0 : index
    %108 = vector.load %arg7[%c1_105, %c0_106, %c0_107] : memref<9x8x16xbf16, #tpu.memory_space<vmem>>, vector<1x8x16xbf16>
    %109 = vector.shape_cast %108 : vector<1x8x16xbf16> to vector<8x16xbf16>
    %cst_108 = arith.constant dense<0.000000e+00> : vector<64x16xf32>
    %110 = tpu.matmul %107, %109, %cst_108 {dimension_numbers = #tpu.dot_dimension_numbers<[1], [0], [0], [1], [0, 0, 1, 1], [], []>} : vector<64x8xbf16>, vector<8x16xbf16>, vector<64x16xf32> -> vector<64x16xf32>
    %111 = arith.addf %104, %110 : vector<64x16xf32>
    %c0_109 = arith.constant 0 : index
    %c2_110 = arith.constant 2 : index
    %c0_111 = arith.constant 0 : index
    %112 = vector.load %arg21[%c0_109, %c2_110, %c0_111] : memref<10x10x8xf32, #tpu.memory_space<vmem>>, vector<8x8x8xf32>
    %113 = vector.shape_cast %112 : vector<8x8x8xf32> to vector<64x8xf32>
    %114 = arith.truncf %113 : vector<64x8xf32> to vector<64x8xbf16>
    %c2_112 = arith.constant 2 : index
    %c0_113 = arith.constant 0 : index
    %c0_114 = arith.constant 0 : index
    %115 = vector.load %arg7[%c2_112, %c0_113, %c0_114] : memref<9x8x16xbf16, #tpu.memory_space<vmem>>, vector<1x8x16xbf16>
    %116 = vector.shape_cast %115 : vector<1x8x16xbf16> to vector<8x16xbf16>
    %cst_115 = arith.constant dense<0.000000e+00> : vector<64x16xf32>
    %117 = tpu.matmul %114, %116, %cst_115 {dimension_numbers = #tpu.dot_dimension_numbers<[1], [0], [0], [1], [0, 0, 1, 1], [], []>} : vector<64x8xbf16>, vector<8x16xbf16>, vector<64x16xf32> -> vector<64x16xf32>
    %118 = arith.addf %111, %117 : vector<64x16xf32>
    %c1_116 = arith.constant 1 : index
    %c0_117 = arith.constant 0 : index
    %c0_118 = arith.constant 0 : index
    %119 = vector.load %arg21[%c1_116, %c0_117, %c0_118] : memref<10x10x8xf32, #tpu.memory_space<vmem>>, vector<8x8x8xf32>
    %120 = vector.shape_cast %119 : vector<8x8x8xf32> to vector<64x8xf32>
    %121 = arith.truncf %120 : vector<64x8xf32> to vector<64x8xbf16>
    %c3_119 = arith.constant 3 : index
    %c0_120 = arith.constant 0 : index
    %c0_121 = arith.constant 0 : index
    %122 = vector.load %arg7[%c3_119, %c0_120, %c0_121] : memref<9x8x16xbf16, #tpu.memory_space<vmem>>, vector<1x8x16xbf16>
    %123 = vector.shape_cast %122 : vector<1x8x16xbf16> to vector<8x16xbf16>
    %cst_122 = arith.constant dense<0.000000e+00> : vector<64x16xf32>
    %124 = tpu.matmul %121, %123, %cst_122 {dimension_numbers = #tpu.dot_dimension_numbers<[1], [0], [0], [1], [0, 0, 1, 1], [], []>} : vector<64x8xbf16>, vector<8x16xbf16>, vector<64x16xf32> -> vector<64x16xf32>
    %125 = arith.addf %118, %124 : vector<64x16xf32>
    %c1_123 = arith.constant 1 : index
    %c1_124 = arith.constant 1 : index
    %c0_125 = arith.constant 0 : index
    %126 = vector.load %arg21[%c1_123, %c1_124, %c0_125] : memref<10x10x8xf32, #tpu.memory_space<vmem>>, vector<8x8x8xf32>
    %127 = vector.shape_cast %126 : vector<8x8x8xf32> to vector<64x8xf32>
    %128 = arith.truncf %127 : vector<64x8xf32> to vector<64x8xbf16>
    %c4_126 = arith.constant 4 : index
    %c0_127 = arith.constant 0 : index
    %c0_128 = arith.constant 0 : index
    %129 = vector.load %arg7[%c4_126, %c0_127, %c0_128] : memref<9x8x16xbf16, #tpu.memory_space<vmem>>, vector<1x8x16xbf16>
    %130 = vector.shape_cast %129 : vector<1x8x16xbf16> to vector<8x16xbf16>
    %cst_129 = arith.constant dense<0.000000e+00> : vector<64x16xf32>
    %131 = tpu.matmul %128, %130, %cst_129 {dimension_numbers = #tpu.dot_dimension_numbers<[1], [0], [0], [1], [0, 0, 1, 1], [], []>} : vector<64x8xbf16>, vector<8x16xbf16>, vector<64x16xf32> -> vector<64x16xf32>
    %132 = arith.addf %125, %131 : vector<64x16xf32>
    %c1_130 = arith.constant 1 : index
    %c2_131 = arith.constant 2 : index
    %c0_132 = arith.constant 0 : index
    %133 = vector.load %arg21[%c1_130, %c2_131, %c0_132] : memref<10x10x8xf32, #tpu.memory_space<vmem>>, vector<8x8x8xf32>
    %134 = vector.shape_cast %133 : vector<8x8x8xf32> to vector<64x8xf32>
    %135 = arith.truncf %134 : vector<64x8xf32> to vector<64x8xbf16>
    %c5_133 = arith.constant 5 : index
    %c0_134 = arith.constant 0 : index
    %c0_135 = arith.constant 0 : index
    %136 = vector.load %arg7[%c5_133, %c0_134, %c0_135] : memref<9x8x16xbf16, #tpu.memory_space<vmem>>, vector<1x8x16xbf16>
    %137 = vector.shape_cast %136 : vector<1x8x16xbf16> to vector<8x16xbf16>
    %cst_136 = arith.constant dense<0.000000e+00> : vector<64x16xf32>
    %138 = tpu.matmul %135, %137, %cst_136 {dimension_numbers = #tpu.dot_dimension_numbers<[1], [0], [0], [1], [0, 0, 1, 1], [], []>} : vector<64x8xbf16>, vector<8x16xbf16>, vector<64x16xf32> -> vector<64x16xf32>
    %139 = arith.addf %132, %138 : vector<64x16xf32>
    %c2_137 = arith.constant 2 : index
    %c0_138 = arith.constant 0 : index
    %c0_139 = arith.constant 0 : index
    %140 = vector.load %arg21[%c2_137, %c0_138, %c0_139] : memref<10x10x8xf32, #tpu.memory_space<vmem>>, vector<8x8x8xf32>
    %141 = vector.shape_cast %140 : vector<8x8x8xf32> to vector<64x8xf32>
    %142 = arith.truncf %141 : vector<64x8xf32> to vector<64x8xbf16>
    %c6_140 = arith.constant 6 : index
    %c0_141 = arith.constant 0 : index
    %c0_142 = arith.constant 0 : index
    %143 = vector.load %arg7[%c6_140, %c0_141, %c0_142] : memref<9x8x16xbf16, #tpu.memory_space<vmem>>, vector<1x8x16xbf16>
    %144 = vector.shape_cast %143 : vector<1x8x16xbf16> to vector<8x16xbf16>
    %cst_143 = arith.constant dense<0.000000e+00> : vector<64x16xf32>
    %145 = tpu.matmul %142, %144, %cst_143 {dimension_numbers = #tpu.dot_dimension_numbers<[1], [0], [0], [1], [0, 0, 1, 1], [], []>} : vector<64x8xbf16>, vector<8x16xbf16>, vector<64x16xf32> -> vector<64x16xf32>
    %146 = arith.addf %139, %145 : vector<64x16xf32>
    %c2_144 = arith.constant 2 : index
    %c1_145 = arith.constant 1 : index
    %c0_146 = arith.constant 0 : index
    %147 = vector.load %arg21[%c2_144, %c1_145, %c0_146] : memref<10x10x8xf32, #tpu.memory_space<vmem>>, vector<8x8x8xf32>
    %148 = vector.shape_cast %147 : vector<8x8x8xf32> to vector<64x8xf32>
    %149 = arith.truncf %148 : vector<64x8xf32> to vector<64x8xbf16>
    %c7_147 = arith.constant 7 : index
    %c0_148 = arith.constant 0 : index
    %c0_149 = arith.constant 0 : index
    %150 = vector.load %arg7[%c7_147, %c0_148, %c0_149] : memref<9x8x16xbf16, #tpu.memory_space<vmem>>, vector<1x8x16xbf16>
    %151 = vector.shape_cast %150 : vector<1x8x16xbf16> to vector<8x16xbf16>
    %cst_150 = arith.constant dense<0.000000e+00> : vector<64x16xf32>
    %152 = tpu.matmul %149, %151, %cst_150 {dimension_numbers = #tpu.dot_dimension_numbers<[1], [0], [0], [1], [0, 0, 1, 1], [], []>} : vector<64x8xbf16>, vector<8x16xbf16>, vector<64x16xf32> -> vector<64x16xf32>
    %153 = arith.addf %146, %152 : vector<64x16xf32>
    %c2_151 = arith.constant 2 : index
    %c2_152 = arith.constant 2 : index
    %c0_153 = arith.constant 0 : index
    %154 = vector.load %arg21[%c2_151, %c2_152, %c0_153] : memref<10x10x8xf32, #tpu.memory_space<vmem>>, vector<8x8x8xf32>
    %155 = vector.shape_cast %154 : vector<8x8x8xf32> to vector<64x8xf32>
    %156 = arith.truncf %155 : vector<64x8xf32> to vector<64x8xbf16>
    %c8_154 = arith.constant 8 : index
    %c0_155 = arith.constant 0 : index
    %c0_156 = arith.constant 0 : index
    %157 = vector.load %arg7[%c8_154, %c0_155, %c0_156] : memref<9x8x16xbf16, #tpu.memory_space<vmem>>, vector<1x8x16xbf16>
    %158 = vector.shape_cast %157 : vector<1x8x16xbf16> to vector<8x16xbf16>
    %cst_157 = arith.constant dense<0.000000e+00> : vector<64x16xf32>
    %159 = tpu.matmul %156, %158, %cst_157 {dimension_numbers = #tpu.dot_dimension_numbers<[1], [0], [0], [1], [0, 0, 1, 1], [], []>} : vector<64x8xbf16>, vector<8x16xbf16>, vector<64x16xf32> -> vector<64x16xf32>
    %160 = arith.addf %153, %159 : vector<64x16xf32>
    %c0_158 = arith.constant 0 : index
    %c0_159 = arith.constant 0 : index
    %161 = vector.load %arg8[%c0_158, %c0_159] : memref<1x16xf32, #tpu.memory_space<vmem>>, vector<1x16xf32>
    %162 = vector.broadcast %161 : vector<1x16xf32> to vector<64x16xf32>
    %163 = arith.addf %160, %162 : vector<64x16xf32>
    %cst_160 = arith.constant 0.000000e+00 : f32
    %164 = vector.broadcast %cst_160 : f32 to vector<64x16xf32>
    %165 = arith.maximumf %163, %164 : vector<64x16xf32>
    %c0_161 = arith.constant 0 : index
    %c0_162 = arith.constant 0 : index
    %166 = vector.load %arg4[%c0_161, %c0_162] : memref<256x64xf32, #tpu.memory_space<vmem>>, vector<256x64xf32>
    %cst_163 = arith.constant dense<0.000000e+00> : vector<256x16xf32>
    %167 = tpu.matmul %166, %165, %cst_163 {dimension_numbers = #tpu.dot_dimension_numbers<[1], [0], [0], [1], [0, 0, 1, 1], [], []>} : vector<256x64xf32>, vector<64x16xf32>, vector<256x16xf32> -> vector<256x16xf32>
    %cst_164 = arith.constant 0.000000e+00 : f32
    %168 = vector.broadcast %cst_164 : f32 to vector<18x18x16xf32>
    %c0_165 = arith.constant 0 : index
    %c0_166 = arith.constant 0 : index
    %c0_167 = arith.constant 0 : index
    %169 = vector.load %arg22[%c0_165, %c0_166, %c0_167] : memref<18x18x16xf32, #tpu.memory_space<vmem>>, vector<18x18x16xf32>
    tpu.vector_store %arg22[%c0_165, %c0_166, %c0_167], %168 {strides = array<i32>} : memref<18x18x16xf32, #tpu.memory_space<vmem>>, vector<18x18x16xf32>,
    %170 = vector.shape_cast %167 : vector<256x16xf32> to vector<16x16x16xf32>
    %c1_168 = arith.constant 1 : index
    %c1_169 = arith.constant 1 : index
    %c0_170 = arith.constant 0 : index
    %171 = vector.load %arg22[%c1_168, %c1_169, %c0_170] : memref<18x18x16xf32, #tpu.memory_space<vmem>>, vector<16x16x16xf32>
    tpu.vector_store %arg22[%c1_168, %c1_169, %c0_170], %170 {strides = array<i32>} : memref<18x18x16xf32, #tpu.memory_space<vmem>>, vector<16x16x16xf32>,
    %c0_171 = arith.constant 0 : index
    %c0_172 = arith.constant 0 : index
    %c0_173 = arith.constant 0 : index
    %172 = vector.load %arg22[%c0_171, %c0_172, %c0_173] : memref<18x18x16xf32, #tpu.memory_space<vmem>>, vector<16x16x16xf32>
    %173 = vector.shape_cast %172 : vector<16x16x16xf32> to vector<256x16xf32>
    %174 = arith.truncf %173 : vector<256x16xf32> to vector<256x16xbf16>
    %c0_174 = arith.constant 0 : index
    %c0_175 = arith.constant 0 : index
    %c0_176 = arith.constant 0 : index
    %175 = vector.load %arg9[%c0_174, %c0_175, %c0_176] : memref<9x16x8xbf16, #tpu.memory_space<vmem>>, vector<1x16x8xbf16>
    %176 = vector.shape_cast %175 : vector<1x16x8xbf16> to vector<16x8xbf16>
    %cst_177 = arith.constant dense<0.000000e+00> : vector<256x8xf32>
    %177 = tpu.matmul %174, %176, %cst_177 {dimension_numbers = #tpu.dot_dimension_numbers<[1], [0], [0], [1], [0, 0, 1, 1], [], []>} : vector<256x16xbf16>, vector<16x8xbf16>, vector<256x8xf32> -> vector<256x8xf32>
    %c0_178 = arith.constant 0 : index
    %c1_179 = arith.constant 1 : index
    %c0_180 = arith.constant 0 : index
    %178 = vector.load %arg22[%c0_178, %c1_179, %c0_180] : memref<18x18x16xf32, #tpu.memory_space<vmem>>, vector<16x16x16xf32>
    %179 = vector.shape_cast %178 : vector<16x16x16xf32> to vector<256x16xf32>
    %180 = arith.truncf %179 : vector<256x16xf32> to vector<256x16xbf16>
    %c1_181 = arith.constant 1 : index
    %c0_182 = arith.constant 0 : index
    %c0_183 = arith.constant 0 : index
    %181 = vector.load %arg9[%c1_181, %c0_182, %c0_183] : memref<9x16x8xbf16, #tpu.memory_space<vmem>>, vector<1x16x8xbf16>
    %182 = vector.shape_cast %181 : vector<1x16x8xbf16> to vector<16x8xbf16>
    %cst_184 = arith.constant dense<0.000000e+00> : vector<256x8xf32>
    %183 = tpu.matmul %180, %182, %cst_184 {dimension_numbers = #tpu.dot_dimension_numbers<[1], [0], [0], [1], [0, 0, 1, 1], [], []>} : vector<256x16xbf16>, vector<16x8xbf16>, vector<256x8xf32> -> vector<256x8xf32>
    %184 = arith.addf %177, %183 : vector<256x8xf32>
    %c0_185 = arith.constant 0 : index
    %c2_186 = arith.constant 2 : index
    %c0_187 = arith.constant 0 : index
    %185 = vector.load %arg22[%c0_185, %c2_186, %c0_187] : memref<18x18x16xf32, #tpu.memory_space<vmem>>, vector<16x16x16xf32>
    %186 = vector.shape_cast %185 : vector<16x16x16xf32> to vector<256x16xf32>
    %187 = arith.truncf %186 : vector<256x16xf32> to vector<256x16xbf16>
    %c2_188 = arith.constant 2 : index
    %c0_189 = arith.constant 0 : index
    %c0_190 = arith.constant 0 : index
    %188 = vector.load %arg9[%c2_188, %c0_189, %c0_190] : memref<9x16x8xbf16, #tpu.memory_space<vmem>>, vector<1x16x8xbf16>
    %189 = vector.shape_cast %188 : vector<1x16x8xbf16> to vector<16x8xbf16>
    %cst_191 = arith.constant dense<0.000000e+00> : vector<256x8xf32>
    %190 = tpu.matmul %187, %189, %cst_191 {dimension_numbers = #tpu.dot_dimension_numbers<[1], [0], [0], [1], [0, 0, 1, 1], [], []>} : vector<256x16xbf16>, vector<16x8xbf16>, vector<256x8xf32> -> vector<256x8xf32>
    %191 = arith.addf %184, %190 : vector<256x8xf32>
    %c1_192 = arith.constant 1 : index
    %c0_193 = arith.constant 0 : index
    %c0_194 = arith.constant 0 : index
    %192 = vector.load %arg22[%c1_192, %c0_193, %c0_194] : memref<18x18x16xf32, #tpu.memory_space<vmem>>, vector<16x16x16xf32>
    %193 = vector.shape_cast %192 : vector<16x16x16xf32> to vector<256x16xf32>
    %194 = arith.truncf %193 : vector<256x16xf32> to vector<256x16xbf16>
    %c3_195 = arith.constant 3 : index
    %c0_196 = arith.constant 0 : index
    %c0_197 = arith.constant 0 : index
    %195 = vector.load %arg9[%c3_195, %c0_196, %c0_197] : memref<9x16x8xbf16, #tpu.memory_space<vmem>>, vector<1x16x8xbf16>
    %196 = vector.shape_cast %195 : vector<1x16x8xbf16> to vector<16x8xbf16>
    %cst_198 = arith.constant dense<0.000000e+00> : vector<256x8xf32>
    %197 = tpu.matmul %194, %196, %cst_198 {dimension_numbers = #tpu.dot_dimension_numbers<[1], [0], [0], [1], [0, 0, 1, 1], [], []>} : vector<256x16xbf16>, vector<16x8xbf16>, vector<256x8xf32> -> vector<256x8xf32>
    %198 = arith.addf %191, %197 : vector<256x8xf32>
    %c1_199 = arith.constant 1 : index
    %c1_200 = arith.constant 1 : index
    %c0_201 = arith.constant 0 : index
    %199 = vector.load %arg22[%c1_199, %c1_200, %c0_201] : memref<18x18x16xf32, #tpu.memory_space<vmem>>, vector<16x16x16xf32>
    %200 = vector.shape_cast %199 : vector<16x16x16xf32> to vector<256x16xf32>
    %201 = arith.truncf %200 : vector<256x16xf32> to vector<256x16xbf16>
    %c4_202 = arith.constant 4 : index
    %c0_203 = arith.constant 0 : index
    %c0_204 = arith.constant 0 : index
    %202 = vector.load %arg9[%c4_202, %c0_203, %c0_204] : memref<9x16x8xbf16, #tpu.memory_space<vmem>>, vector<1x16x8xbf16>
    %203 = vector.shape_cast %202 : vector<1x16x8xbf16> to vector<16x8xbf16>
    %cst_205 = arith.constant dense<0.000000e+00> : vector<256x8xf32>
    %204 = tpu.matmul %201, %203, %cst_205 {dimension_numbers = #tpu.dot_dimension_numbers<[1], [0], [0], [1], [0, 0, 1, 1], [], []>} : vector<256x16xbf16>, vector<16x8xbf16>, vector<256x8xf32> -> vector<256x8xf32>
    %205 = arith.addf %198, %204 : vector<256x8xf32>
    %c1_206 = arith.constant 1 : index
    %c2_207 = arith.constant 2 : index
    %c0_208 = arith.constant 0 : index
    %206 = vector.load %arg22[%c1_206, %c2_207, %c0_208] : memref<18x18x16xf32, #tpu.memory_space<vmem>>, vector<16x16x16xf32>
    %207 = vector.shape_cast %206 : vector<16x16x16xf32> to vector<256x16xf32>
    %208 = arith.truncf %207 : vector<256x16xf32> to vector<256x16xbf16>
    %c5_209 = arith.constant 5 : index
    %c0_210 = arith.constant 0 : index
    %c0_211 = arith.constant 0 : index
    %209 = vector.load %arg9[%c5_209, %c0_210, %c0_211] : memref<9x16x8xbf16, #tpu.memory_space<vmem>>, vector<1x16x8xbf16>
    %210 = vector.shape_cast %209 : vector<1x16x8xbf16> to vector<16x8xbf16>
    %cst_212 = arith.constant dense<0.000000e+00> : vector<256x8xf32>
    %211 = tpu.matmul %208, %210, %cst_212 {dimension_numbers = #tpu.dot_dimension_numbers<[1], [0], [0], [1], [0, 0, 1, 1], [], []>} : vector<256x16xbf16>, vector<16x8xbf16>, vector<256x8xf32> -> vector<256x8xf32>
    %212 = arith.addf %205, %211 : vector<256x8xf32>
    %c2_213 = arith.constant 2 : index
    %c0_214 = arith.constant 0 : index
    %c0_215 = arith.constant 0 : index
    %213 = vector.load %arg22[%c2_213, %c0_214, %c0_215] : memref<18x18x16xf32, #tpu.memory_space<vmem>>, vector<16x16x16xf32>
    %214 = vector.shape_cast %213 : vector<16x16x16xf32> to vector<256x16xf32>
    %215 = arith.truncf %214 : vector<256x16xf32> to vector<256x16xbf16>
    %c6_216 = arith.constant 6 : index
    %c0_217 = arith.constant 0 : index
    %c0_218 = arith.constant 0 : index
    %216 = vector.load %arg9[%c6_216, %c0_217, %c0_218] : memref<9x16x8xbf16, #tpu.memory_space<vmem>>, vector<1x16x8xbf16>
    %217 = vector.shape_cast %216 : vector<1x16x8xbf16> to vector<16x8xbf16>
    %cst_219 = arith.constant dense<0.000000e+00> : vector<256x8xf32>
    %218 = tpu.matmul %215, %217, %cst_219 {dimension_numbers = #tpu.dot_dimension_numbers<[1], [0], [0], [1], [0, 0, 1, 1], [], []>} : vector<256x16xbf16>, vector<16x8xbf16>, vector<256x8xf32> -> vector<256x8xf32>
    %219 = arith.addf %212, %218 : vector<256x8xf32>
    %c2_220 = arith.constant 2 : index
    %c1_221 = arith.constant 1 : index
    %c0_222 = arith.constant 0 : index
    %220 = vector.load %arg22[%c2_220, %c1_221, %c0_222] : memref<18x18x16xf32, #tpu.memory_space<vmem>>, vector<16x16x16xf32>
    %221 = vector.shape_cast %220 : vector<16x16x16xf32> to vector<256x16xf32>
    %222 = arith.truncf %221 : vector<256x16xf32> to vector<256x16xbf16>
    %c7_223 = arith.constant 7 : index
    %c0_224 = arith.constant 0 : index
    %c0_225 = arith.constant 0 : index
    %223 = vector.load %arg9[%c7_223, %c0_224, %c0_225] : memref<9x16x8xbf16, #tpu.memory_space<vmem>>, vector<1x16x8xbf16>
    %224 = vector.shape_cast %223 : vector<1x16x8xbf16> to vector<16x8xbf16>
    %cst_226 = arith.constant dense<0.000000e+00> : vector<256x8xf32>
    %225 = tpu.matmul %222, %224, %cst_226 {dimension_numbers = #tpu.dot_dimension_numbers<[1], [0], [0], [1], [0, 0, 1, 1], [], []>} : vector<256x16xbf16>, vector<16x8xbf16>, vector<256x8xf32> -> vector<256x8xf32>
    %226 = arith.addf %219, %225 : vector<256x8xf32>
    %c2_227 = arith.constant 2 : index
    %c2_228 = arith.constant 2 : index
    %c0_229 = arith.constant 0 : index
    %227 = vector.load %arg22[%c2_227, %c2_228, %c0_229] : memref<18x18x16xf32, #tpu.memory_space<vmem>>, vector<16x16x16xf32>
    %228 = vector.shape_cast %227 : vector<16x16x16xf32> to vector<256x16xf32>
    %229 = arith.truncf %228 : vector<256x16xf32> to vector<256x16xbf16>
    %c8_230 = arith.constant 8 : index
    %c0_231 = arith.constant 0 : index
    %c0_232 = arith.constant 0 : index
    %230 = vector.load %arg9[%c8_230, %c0_231, %c0_232] : memref<9x16x8xbf16, #tpu.memory_space<vmem>>, vector<1x16x8xbf16>
    %231 = vector.shape_cast %230 : vector<1x16x8xbf16> to vector<16x8xbf16>
    %cst_233 = arith.constant dense<0.000000e+00> : vector<256x8xf32>
    %232 = tpu.matmul %229, %231, %cst_233 {dimension_numbers = #tpu.dot_dimension_numbers<[1], [0], [0], [1], [0, 0, 1, 1], [], []>} : vector<256x16xbf16>, vector<16x8xbf16>, vector<256x8xf32> -> vector<256x8xf32>
    %233 = arith.addf %226, %232 : vector<256x8xf32>
    %c0_234 = arith.constant 0 : index
    %c0_235 = arith.constant 0 : index
    %c0_236 = arith.constant 0 : index
    %234 = vector.load %arg20[%c0_234, %c0_235, %c0_236] : memref<18x18x8xf32, #tpu.memory_space<vmem>>, vector<16x16x8xf32>
    %235 = vector.shape_cast %234 : vector<16x16x8xf32> to vector<256x8xf32>
    %236 = arith.truncf %235 : vector<256x8xf32> to vector<256x8xbf16>
    %c0_237 = arith.constant 0 : index
    %c0_238 = arith.constant 0 : index
    %c0_239 = arith.constant 0 : index
    %237 = vector.load %arg10[%c0_237, %c0_238, %c0_239] : memref<9x8x8xbf16, #tpu.memory_space<vmem>>, vector<1x8x8xbf16>
    %238 = vector.shape_cast %237 : vector<1x8x8xbf16> to vector<8x8xbf16>
    %cst_240 = arith.constant dense<0.000000e+00> : vector<256x8xf32>
    %239 = tpu.matmul %236, %238, %cst_240 {dimension_numbers = #tpu.dot_dimension_numbers<[1], [0], [0], [1], [0, 0, 1, 1], [], []>} : vector<256x8xbf16>, vector<8x8xbf16>, vector<256x8xf32> -> vector<256x8xf32>
    %c0_241 = arith.constant 0 : index
    %c1_242 = arith.constant 1 : index
    %c0_243 = arith.constant 0 : index
    %240 = vector.load %arg20[%c0_241, %c1_242, %c0_243] : memref<18x18x8xf32, #tpu.memory_space<vmem>>, vector<16x16x8xf32>
    %241 = vector.shape_cast %240 : vector<16x16x8xf32> to vector<256x8xf32>
    %242 = arith.truncf %241 : vector<256x8xf32> to vector<256x8xbf16>
    %c1_244 = arith.constant 1 : index
    %c0_245 = arith.constant 0 : index
    %c0_246 = arith.constant 0 : index
    %243 = vector.load %arg10[%c1_244, %c0_245, %c0_246] : memref<9x8x8xbf16, #tpu.memory_space<vmem>>, vector<1x8x8xbf16>
    %244 = vector.shape_cast %243 : vector<1x8x8xbf16> to vector<8x8xbf16>
    %cst_247 = arith.constant dense<0.000000e+00> : vector<256x8xf32>
    %245 = tpu.matmul %242, %244, %cst_247 {dimension_numbers = #tpu.dot_dimension_numbers<[1], [0], [0], [1], [0, 0, 1, 1], [], []>} : vector<256x8xbf16>, vector<8x8xbf16>, vector<256x8xf32> -> vector<256x8xf32>
    %246 = arith.addf %239, %245 : vector<256x8xf32>
    %c0_248 = arith.constant 0 : index
    %c2_249 = arith.constant 2 : index
    %c0_250 = arith.constant 0 : index
    %247 = vector.load %arg20[%c0_248, %c2_249, %c0_250] : memref<18x18x8xf32, #tpu.memory_space<vmem>>, vector<16x16x8xf32>
    %248 = vector.shape_cast %247 : vector<16x16x8xf32> to vector<256x8xf32>
    %249 = arith.truncf %248 : vector<256x8xf32> to vector<256x8xbf16>
    %c2_251 = arith.constant 2 : index
    %c0_252 = arith.constant 0 : index
    %c0_253 = arith.constant 0 : index
    %250 = vector.load %arg10[%c2_251, %c0_252, %c0_253] : memref<9x8x8xbf16, #tpu.memory_space<vmem>>, vector<1x8x8xbf16>
    %251 = vector.shape_cast %250 : vector<1x8x8xbf16> to vector<8x8xbf16>
    %cst_254 = arith.constant dense<0.000000e+00> : vector<256x8xf32>
    %252 = tpu.matmul %249, %251, %cst_254 {dimension_numbers = #tpu.dot_dimension_numbers<[1], [0], [0], [1], [0, 0, 1, 1], [], []>} : vector<256x8xbf16>, vector<8x8xbf16>, vector<256x8xf32> -> vector<256x8xf32>
    %253 = arith.addf %246, %252 : vector<256x8xf32>
    %c1_255 = arith.constant 1 : index
    %c0_256 = arith.constant 0 : index
    %c0_257 = arith.constant 0 : index
    %254 = vector.load %arg20[%c1_255, %c0_256, %c0_257] : memref<18x18x8xf32, #tpu.memory_space<vmem>>, vector<16x16x8xf32>
    %255 = vector.shape_cast %254 : vector<16x16x8xf32> to vector<256x8xf32>
    %256 = arith.truncf %255 : vector<256x8xf32> to vector<256x8xbf16>
    %c3_258 = arith.constant 3 : index
    %c0_259 = arith.constant 0 : index
    %c0_260 = arith.constant 0 : index
    %257 = vector.load %arg10[%c3_258, %c0_259, %c0_260] : memref<9x8x8xbf16, #tpu.memory_space<vmem>>, vector<1x8x8xbf16>
    %258 = vector.shape_cast %257 : vector<1x8x8xbf16> to vector<8x8xbf16>
    %cst_261 = arith.constant dense<0.000000e+00> : vector<256x8xf32>
    %259 = tpu.matmul %256, %258, %cst_261 {dimension_numbers = #tpu.dot_dimension_numbers<[1], [0], [0], [1], [0, 0, 1, 1], [], []>} : vector<256x8xbf16>, vector<8x8xbf16>, vector<256x8xf32> -> vector<256x8xf32>
    %260 = arith.addf %253, %259 : vector<256x8xf32>
    %c1_262 = arith.constant 1 : index
    %c1_263 = arith.constant 1 : index
    %c0_264 = arith.constant 0 : index
    %261 = vector.load %arg20[%c1_262, %c1_263, %c0_264] : memref<18x18x8xf32, #tpu.memory_space<vmem>>, vector<16x16x8xf32>
    %262 = vector.shape_cast %261 : vector<16x16x8xf32> to vector<256x8xf32>
    %263 = arith.truncf %262 : vector<256x8xf32> to vector<256x8xbf16>
    %c4_265 = arith.constant 4 : index
    %c0_266 = arith.constant 0 : index
    %c0_267 = arith.constant 0 : index
    %264 = vector.load %arg10[%c4_265, %c0_266, %c0_267] : memref<9x8x8xbf16, #tpu.memory_space<vmem>>, vector<1x8x8xbf16>
    %265 = vector.shape_cast %264 : vector<1x8x8xbf16> to vector<8x8xbf16>
    %cst_268 = arith.constant dense<0.000000e+00> : vector<256x8xf32>
    %266 = tpu.matmul %263, %265, %cst_268 {dimension_numbers = #tpu.dot_dimension_numbers<[1], [0], [0], [1], [0, 0, 1, 1], [], []>} : vector<256x8xbf16>, vector<8x8xbf16>, vector<256x8xf32> -> vector<256x8xf32>
    %267 = arith.addf %260, %266 : vector<256x8xf32>
    %c1_269 = arith.constant 1 : index
    %c2_270 = arith.constant 2 : index
    %c0_271 = arith.constant 0 : index
    %268 = vector.load %arg20[%c1_269, %c2_270, %c0_271] : memref<18x18x8xf32, #tpu.memory_space<vmem>>, vector<16x16x8xf32>
    %269 = vector.shape_cast %268 : vector<16x16x8xf32> to vector<256x8xf32>
    %270 = arith.truncf %269 : vector<256x8xf32> to vector<256x8xbf16>
    %c5_272 = arith.constant 5 : index
    %c0_273 = arith.constant 0 : index
    %c0_274 = arith.constant 0 : index
    %271 = vector.load %arg10[%c5_272, %c0_273, %c0_274] : memref<9x8x8xbf16, #tpu.memory_space<vmem>>, vector<1x8x8xbf16>
    %272 = vector.shape_cast %271 : vector<1x8x8xbf16> to vector<8x8xbf16>
    %cst_275 = arith.constant dense<0.000000e+00> : vector<256x8xf32>
    %273 = tpu.matmul %270, %272, %cst_275 {dimension_numbers = #tpu.dot_dimension_numbers<[1], [0], [0], [1], [0, 0, 1, 1], [], []>} : vector<256x8xbf16>, vector<8x8xbf16>, vector<256x8xf32> -> vector<256x8xf32>
    %274 = arith.addf %267, %273 : vector<256x8xf32>
    %c2_276 = arith.constant 2 : index
    %c0_277 = arith.constant 0 : index
    %c0_278 = arith.constant 0 : index
    %275 = vector.load %arg20[%c2_276, %c0_277, %c0_278] : memref<18x18x8xf32, #tpu.memory_space<vmem>>, vector<16x16x8xf32>
    %276 = vector.shape_cast %275 : vector<16x16x8xf32> to vector<256x8xf32>
    %277 = arith.truncf %276 : vector<256x8xf32> to vector<256x8xbf16>
    %c6_279 = arith.constant 6 : index
    %c0_280 = arith.constant 0 : index
    %c0_281 = arith.constant 0 : index
    %278 = vector.load %arg10[%c6_279, %c0_280, %c0_281] : memref<9x8x8xbf16, #tpu.memory_space<vmem>>, vector<1x8x8xbf16>
    %279 = vector.shape_cast %278 : vector<1x8x8xbf16> to vector<8x8xbf16>
    %cst_282 = arith.constant dense<0.000000e+00> : vector<256x8xf32>
    %280 = tpu.matmul %277, %279, %cst_282 {dimension_numbers = #tpu.dot_dimension_numbers<[1], [0], [0], [1], [0, 0, 1, 1], [], []>} : vector<256x8xbf16>, vector<8x8xbf16>, vector<256x8xf32> -> vector<256x8xf32>
    %281 = arith.addf %274, %280 : vector<256x8xf32>
    %c2_283 = arith.constant 2 : index
    %c1_284 = arith.constant 1 : index
    %c0_285 = arith.constant 0 : index
    %282 = vector.load %arg20[%c2_283, %c1_284, %c0_285] : memref<18x18x8xf32, #tpu.memory_space<vmem>>, vector<16x16x8xf32>
    %283 = vector.shape_cast %282 : vector<16x16x8xf32> to vector<256x8xf32>
    %284 = arith.truncf %283 : vector<256x8xf32> to vector<256x8xbf16>
    %c7_286 = arith.constant 7 : index
    %c0_287 = arith.constant 0 : index
    %c0_288 = arith.constant 0 : index
    %285 = vector.load %arg10[%c7_286, %c0_287, %c0_288] : memref<9x8x8xbf16, #tpu.memory_space<vmem>>, vector<1x8x8xbf16>
    %286 = vector.shape_cast %285 : vector<1x8x8xbf16> to vector<8x8xbf16>
    %cst_289 = arith.constant dense<0.000000e+00> : vector<256x8xf32>
    %287 = tpu.matmul %284, %286, %cst_289 {dimension_numbers = #tpu.dot_dimension_numbers<[1], [0], [0], [1], [0, 0, 1, 1], [], []>} : vector<256x8xbf16>, vector<8x8xbf16>, vector<256x8xf32> -> vector<256x8xf32>
    %288 = arith.addf %281, %287 : vector<256x8xf32>
    %c2_290 = arith.constant 2 : index
    %c2_291 = arith.constant 2 : index
    %c0_292 = arith.constant 0 : index
    %289 = vector.load %arg20[%c2_290, %c2_291, %c0_292] : memref<18x18x8xf32, #tpu.memory_space<vmem>>, vector<16x16x8xf32>
    %290 = vector.shape_cast %289 : vector<16x16x8xf32> to vector<256x8xf32>
    %291 = arith.truncf %290 : vector<256x8xf32> to vector<256x8xbf16>
    %c8_293 = arith.constant 8 : index
    %c0_294 = arith.constant 0 : index
    %c0_295 = arith.constant 0 : index
    %292 = vector.load %arg10[%c8_293, %c0_294, %c0_295] : memref<9x8x8xbf16, #tpu.memory_space<vmem>>, vector<1x8x8xbf16>
    %293 = vector.shape_cast %292 : vector<1x8x8xbf16> to vector<8x8xbf16>
    %cst_296 = arith.constant dense<0.000000e+00> : vector<256x8xf32>
    %294 = tpu.matmul %291, %293, %cst_296 {dimension_numbers = #tpu.dot_dimension_numbers<[1], [0], [0], [1], [0, 0, 1, 1], [], []>} : vector<256x8xbf16>, vector<8x8xbf16>, vector<256x8xf32> -> vector<256x8xf32>
    %295 = arith.addf %288, %294 : vector<256x8xf32>
    %296 = arith.addf %233, %295 : vector<256x8xf32>
    %c0_297 = arith.constant 0 : index
    %c0_298 = arith.constant 0 : index
    %297 = vector.load %arg11[%c0_297, %c0_298] : memref<1x8xf32, #tpu.memory_space<vmem>>, vector<1x8xf32>
    %298 = vector.broadcast %297 : vector<1x8xf32> to vector<256x8xf32>
    %299 = arith.addf %296, %298 : vector<256x8xf32>
    %cst_299 = arith.constant 0.000000e+00 : f32
    %300 = vector.broadcast %cst_299 : f32 to vector<256x8xf32>
    %301 = arith.maximumf %299, %300 : vector<256x8xf32>
    %302 = arith.truncf %301 : vector<256x8xf32> to vector<256x8xbf16>
    %c0_300 = arith.constant 0 : index
    %c0_301 = arith.constant 0 : index
    %303 = vector.load %arg12[%c0_300, %c0_301] : memref<8x4xbf16, #tpu.memory_space<vmem>>, vector<8x4xbf16>
    %cst_302 = arith.constant dense<0.000000e+00> : vector<256x4xf32>
    %304 = tpu.matmul %302, %303, %cst_302 {dimension_numbers = #tpu.dot_dimension_numbers<[1], [0], [0], [1], [0, 0, 1, 1], [], []>} : vector<256x8xbf16>, vector<8x4xbf16>, vector<256x4xf32> -> vector<256x4xf32>
    %c0_303 = arith.constant 0 : index
    %c0_304 = arith.constant 0 : index
    %305 = vector.load %arg13[%c0_303, %c0_304] : memref<1x4xf32, #tpu.memory_space<vmem>>, vector<1x4xf32>
    %306 = vector.broadcast %305 : vector<1x4xf32> to vector<256x4xf32>
    %307 = arith.addf %304, %306 : vector<256x4xf32>
    %c0_305 = arith.constant 0 : index
    %c0_306 = arith.constant 0 : index
    %c0_307 = arith.constant 0 : index
    %308 = vector.load %arg19[%c0_305, %c0_306, %c0_307] : memref<1x256x4xf32, #tpu.memory_space<vmem>>, vector<1x256x4xf32>
    %309 = vector.shape_cast %308 : vector<1x256x4xf32> to vector<256x4xf32>
    %310 = vector.shape_cast %307 : vector<256x4xf32> to vector<1x256x4xf32>
    tpu.vector_store %arg19[%c0_305, %c0_306, %c0_307], %310 {strides = array<i32>} : memref<1x256x4xf32, #tpu.memory_space<vmem>>, vector<1x256x4xf32>,
    %cst_308 = arith.constant dense<0xFF800000> : vector<256xf32>
    %311 = vector.multi_reduction <maximumf>, %307, %cst_308 [1] : vector<256x4xf32> to vector<256xf32>
    %312 = vector.shape_cast %311 : vector<256xf32> to vector<256x1xf32>
    %313 = vector.broadcast %312 : vector<256x1xf32> to vector<256x4xf32>
    %314 = arith.subf %307, %313 : vector<256x4xf32>
    %315 = math.exp %314 : vector<256x4xf32>
    %cst_309 = arith.constant dense<0.000000e+00> : vector<256xf32>
    %316 = vector.multi_reduction <add>, %315, %cst_309 [1] : vector<256x4xf32> to vector<256xf32>
    %317 = vector.shape_cast %316 : vector<256xf32> to vector<256x1xf32>
    %318 = vector.broadcast %317 : vector<256x1xf32> to vector<256x4xf32>
    %319 = arith.divf %315, %318 : vector<256x4xf32>
    %c0_310 = arith.constant 0 : index
    %c0_311 = arith.constant 0 : index
    %320 = vector.load %arg2[%c0_310, %c0_311] : memref<4x256xf32, #tpu.memory_space<vmem>>, vector<4x256xf32>
    %cst_312 = arith.constant dense<0.000000e+00> : vector<4x4xf32>
    %321 = tpu.matmul %320, %319, %cst_312 {dimension_numbers = #tpu.dot_dimension_numbers<[1], [0], [0], [1], [0, 0, 1, 1], [], []>} : vector<4x256xf32>, vector<256x4xf32>, vector<4x4xf32> -> vector<4x4xf32>
    %322 = arith.truncf %321 : vector<4x4xf32> to vector<4x4xbf16>
    %c0_313 = arith.constant 0 : index
    %c0_314 = arith.constant 0 : index
    %323 = vector.load %arg14[%c0_313, %c0_314] : memref<4x32xbf16, #tpu.memory_space<vmem>>, vector<4x32xbf16>
    %cst_315 = arith.constant dense<0.000000e+00> : vector<4x32xf32>
    %324 = tpu.matmul %322, %323, %cst_315 {dimension_numbers = #tpu.dot_dimension_numbers<[1], [0], [0], [1], [0, 0, 1, 1], [], []>} : vector<4x4xbf16>, vector<4x32xbf16>, vector<4x32xf32> -> vector<4x32xf32>
    %c0_316 = arith.constant 0 : index
    %c0_317 = arith.constant 0 : index
    %325 = vector.load %arg15[%c0_316, %c0_317] : memref<1x32xf32, #tpu.memory_space<vmem>>, vector<1x32xf32>
    %326 = vector.broadcast %325 : vector<1x32xf32> to vector<4x32xf32>
    %327 = arith.addf %324, %326 : vector<4x32xf32>
    %cst_318 = arith.constant 0.000000e+00 : f32
    %328 = vector.broadcast %cst_318 : f32 to vector<4x32xf32>
    %329 = arith.maximumf %327, %328 : vector<4x32xf32>
    %330 = arith.truncf %329 : vector<4x32xf32> to vector<4x32xbf16>
    %c0_319 = arith.constant 0 : index
    %c0_320 = arith.constant 0 : index
    %331 = vector.load %arg16[%c0_319, %c0_320] : memref<32x64xbf16, #tpu.memory_space<vmem>>, vector<32x64xbf16>
    %cst_321 = arith.constant dense<0.000000e+00> : vector<4x64xf32>
    %332 = tpu.matmul %330, %331, %cst_321 {dimension_numbers = #tpu.dot_dimension_numbers<[1], [0], [0], [1], [0, 0, 1, 1], [], []>} : vector<4x32xbf16>, vector<32x64xbf16>, vector<4x64xf32> -> vector<4x64xf32>
    %c0_322 = arith.constant 0 : index
    %c0_323 = arith.constant 0 : index
    %333 = vector.load %arg17[%c0_322, %c0_323] : memref<1x64xf32, #tpu.memory_space<vmem>>, vector<1x64xf32>
    %334 = vector.broadcast %333 : vector<1x64xf32> to vector<4x64xf32>
    %335 = arith.addf %332, %334 : vector<4x64xf32>
    %c0_324 = arith.constant 0 : index
    %c0_325 = arith.constant 0 : index
    %c0_326 = arith.constant 0 : index
    %336 = vector.load %arg18[%c0_324, %c0_325, %c0_326] : memref<1x4x64xf32, #tpu.memory_space<vmem>>, vector<1x4x64xf32>
    %337 = vector.shape_cast %336 : vector<1x4x64xf32> to vector<4x64xf32>
    %338 = vector.shape_cast %335 : vector<4x64xf32> to vector<1x4x64xf32>
    tpu.vector_store %arg18[%c0_324, %c0_325, %c0_326], %338 {strides = array<i32>} : memref<1x4x64xf32, #tpu.memory_space<vmem>>, vector<1x4x64xf32>,
    return
  }
  func.func @transform_0(%arg0: i32) -> (i32, i32, i32, i32) {
    %c0_i32 = arith.constant 0 : i32
    %c0_i32_0 = arith.constant 0 : i32
    %c0_i32_1 = arith.constant 0 : i32
    %c0_i32_2 = arith.constant 0 : i32
    return %arg0, %c0_i32, %c0_i32_0, %c0_i32_1 : i32, i32, i32, i32
  }
  func.func @transform_1(%arg0: i32) -> (i32, i32) {
    %c0_i32 = arith.constant 0 : i32
    %c0_i32_0 = arith.constant 0 : i32
    %c0_i32_1 = arith.constant 0 : i32
    return %c0_i32, %c0_i32_0 : i32, i32
  }
  func.func @transform_2(%arg0: i32) -> (i32, i32, i32) {
    %c0_i32 = arith.constant 0 : i32
    %c0_i32_0 = arith.constant 0 : i32
    %c0_i32_1 = arith.constant 0 : i32
    %c0_i32_2 = arith.constant 0 : i32
    return %c0_i32, %c0_i32_0, %c0_i32_1 : i32, i32, i32
  }
  func.func @transform_3(%arg0: i32) -> (i32, i32) {
    %c0_i32 = arith.constant 0 : i32
    %c0_i32_0 = arith.constant 0 : i32
    %c0_i32_1 = arith.constant 0 : i32
    return %c0_i32, %c0_i32_0 : i32, i32
  }
  func.func @transform_4(%arg0: i32) -> (i32, i32, i32) {
    %c0_i32 = arith.constant 0 : i32
    %c0_i32_0 = arith.constant 0 : i32
    %c0_i32_1 = arith.constant 0 : i32
    %c0_i32_2 = arith.constant 0 : i32
    return %c0_i32, %c0_i32_0, %c0_i32_1 : i32, i32, i32
  }
  func.func @transform_5(%arg0: i32) -> (i32, i32) {
    %c0_i32 = arith.constant 0 : i32
    %c0_i32_0 = arith.constant 0 : i32
    %c0_i32_1 = arith.constant 0 : i32
    return %c0_i32, %c0_i32_0 : i32, i32
  }
  func.func @transform_6(%arg0: i32) -> (i32, i32, i32) {
    %c0_i32 = arith.constant 0 : i32
    %c0_i32_0 = arith.constant 0 : i32
    %c0_i32_1 = arith.constant 0 : i32
    %c0_i32_2 = arith.constant 0 : i32
    return %c0_i32, %c0_i32_0, %c0_i32_1 : i32, i32, i32
  }
  func.func @transform_7(%arg0: i32) -> (i32, i32) {
    %c0_i32 = arith.constant 0 : i32
    %c0_i32_0 = arith.constant 0 : i32
    %c0_i32_1 = arith.constant 0 : i32
    return %c0_i32, %c0_i32_0 : i32, i32
  }
  func.func @transform_8(%arg0: i32) -> (i32, i32, i32) {
    %c0_i32 = arith.constant 0 : i32
    %c0_i32_0 = arith.constant 0 : i32
    %c0_i32_1 = arith.constant 0 : i32
    %c0_i32_2 = arith.constant 0 : i32
    return %c0_i32, %c0_i32_0, %c0_i32_1 : i32, i32, i32
  }
  func.func @transform_9(%arg0: i32) -> (i32, i32, i32) {
    %c0_i32 = arith.constant 0 : i32
    %c0_i32_0 = arith.constant 0 : i32
    %c0_i32_1 = arith.constant 0 : i32
    %c0_i32_2 = arith.constant 0 : i32
    return %c0_i32, %c0_i32_0, %c0_i32_1 : i32, i32, i32
  }
  func.func @transform_10(%arg0: i32) -> (i32, i32) {
    %c0_i32 = arith.constant 0 : i32
    %c0_i32_0 = arith.constant 0 : i32
    %c0_i32_1 = arith.constant 0 : i32
    return %c0_i32, %c0_i32_0 : i32, i32
  }
  func.func @transform_11(%arg0: i32) -> (i32, i32) {
    %c0_i32 = arith.constant 0 : i32
    %c0_i32_0 = arith.constant 0 : i32
    %c0_i32_1 = arith.constant 0 : i32
    return %c0_i32, %c0_i32_0 : i32, i32
  }
  func.func @transform_12(%arg0: i32) -> (i32, i32) {
    %c0_i32 = arith.constant 0 : i32
    %c0_i32_0 = arith.constant 0 : i32
    %c0_i32_1 = arith.constant 0 : i32
    return %c0_i32, %c0_i32_0 : i32, i32
  }
  func.func @transform_13(%arg0: i32) -> (i32, i32) {
    %c0_i32 = arith.constant 0 : i32
    %c0_i32_0 = arith.constant 0 : i32
    %c0_i32_1 = arith.constant 0 : i32
    return %c0_i32, %c0_i32_0 : i32, i32
  }
  func.func @transform_14(%arg0: i32) -> (i32, i32) {
    %c0_i32 = arith.constant 0 : i32
    %c0_i32_0 = arith.constant 0 : i32
    %c0_i32_1 = arith.constant 0 : i32
    return %c0_i32, %c0_i32_0 : i32, i32
  }
  func.func @transform_15(%arg0: i32) -> (i32, i32) {
    %c0_i32 = arith.constant 0 : i32
    %c0_i32_0 = arith.constant 0 : i32
    %c0_i32_1 = arith.constant 0 : i32
    return %c0_i32, %c0_i32_0 : i32, i32
  }
  func.func @transform_16(%arg0: i32) -> (i32, i32) {
    %c0_i32 = arith.constant 0 : i32
    %c0_i32_0 = arith.constant 0 : i32
    %c0_i32_1 = arith.constant 0 : i32
    return %c0_i32, %c0_i32_0 : i32, i32
  }
  func.func @transform_17(%arg0: i32) -> (i32, i32, i32) {
    %c0_i32 = arith.constant 0 : i32
    %c0_i32_0 = arith.constant 0 : i32
    %c0_i32_1 = arith.constant 0 : i32
    return %arg0, %c0_i32, %c0_i32_0 : i32, i32, i32
  }
  func.func @transform_18(%arg0: i32) -> (i32, i32, i32) {
    %c0_i32 = arith.constant 0 : i32
    %c0_i32_0 = arith.constant 0 : i32
    %c0_i32_1 = arith.constant 0 : i32
    return %arg0, %c0_i32, %c0_i32_0 : i32, i32, i32
  }
}

</mosaic_0001>

<bundles_post_ra>
// kernel: representation_unet_forward.1
= control target key start
LH: loop header
LB: loop body
LE: loop exit
PB: predicated region body
PF: predicated region fallthrough
CT: control target
= control target key end

     0   :  { %s18712_s0 = inlined_call_operand.vmem [shape: f32[2,18,18,3], index: 0, kind: input, shape index: {}]   ;;  %s18713_s1 = inlined_call_operand.vmem [shape: f32[4,256], index: 1, kind: input, shape index: {}]   ;;  %s18714_s2 = inlined_call_operand.vmem [shape: f32[4,64,256], index: 2, kind: input, shape index: {}]   ;;  %s18715_s3 = inlined_call_operand.vmem [shape: f32[256,64], index: 3, kind: input, shape index: {}]   ;;  %s18716_s4 = inlined_call_operand.vmem [shape: bf16[9,3,8], index: 4, kind: input, shape index: {}]   ;;  %s18717_s5 = inlined_call_operand.vmem [shape: f32[1,8], index: 5, kind: input, shape index: {}]   ;;  %s18718_s6 = inlined_call_operand.vmem [shape: bf16[9,8,16], index: 6, kind: input, shape index: {}]   ;;  %s18719_s7 = inlined_call_operand.vmem [shape: f32[1,16], index: 7, kind: input, shape index: {}]   ;;  %s18720_s8 = inlined_call_operand.vmem [shape: bf16[9,16,8], index: 8, kind: input, shape index: {}]   ;;  %s18721_s9 = inlined_call_operand.vmem [shape: bf16[9,8,8], index: 9, kind: input, shape index: {}]   ;;  %s18722_s10 = inlined_call_operand.vmem [shape: f32[1,8], index: 10, kind: input, shape index: {}]   ;;  %s18723_s11 = inlined_call_operand.vmem [shape: bf16[8,4], index: 11, kind: input, shape index: {}]   ;;  %s18724_s12 = inlined_call_operand.vmem [shape: f32[1,4], index: 12, kind: input, shape index: {}]   ;;  %s18725_s13 = inlined_call_operand.vmem [shape: bf16[4,32], index: 13, kind: input, shape index: {}]   ;;  %s18726_s14 = inlined_call_operand.vmem [shape: f32[1,32], index: 14, kind: input, shape index: {}]   ;;  %s18727_s15 = inlined_call_operand.vmem [shape: bf16[32,64], index: 15, kind: input, shape index: {}]   ;;  %s18728_s16 = inlined_call_operand.vmem [shape: f32[1,64], index: 16, kind: input, shape index: {}]   ;;  %s18729_s17 = inlined_call_operand.hbm [shape: f32[2,4,64], index: 17, kind: output, shape index: {0}]   ;;  %s18730_s18 = inlined_call_operand.vmem [shape: f32[2,256,4], index: 18, kind: output, shape index: {1}]  }
   0x1   :  { %18738 = sst [smem:[#allocation17_spill]] %s18712_s0 }
   0x2   :  { %18739 = sst [smem:[#allocation18_spill]] %s18713_s1 }
   0x3   :  { %18740 = sst [smem:[#allocation19_spill]] %s18714_s2 }
   0x4   :  { %18741 = sst [smem:[#allocation20_spill]] %s18716_s4 }
   0x5   :  { %18742 = sst [smem:[#allocation21_spill]] %s18717_s5 }
   0x6   :  { %24 = vsyncpa [#allocation6], 0 }
   0x7   :  { %26 = vsyncpa [#allocation6 + $0x1], 0  ;;  %s15655_s27 = smov 0   ;;  %s15657_s28 = smov 0  }
   0x8   :  { %s15659_s29 = smov 0   ;;  %s15661_s30 = smov 0  }
   0x9 LB: > { %18743 = sst [smem:[#allocation8_spill]] %s15550_s29  ;;  %s15676_s0 = sadd.s32 4294967295, %s15554_s30   ;;  %s15554_s30 = sphi %s15661_s30, %s18766_s30   ;;  %s15550_s29 = sphi %s15659_s29, %s18768_s29   ;;  %s15546_s28 = sphi %s15657_s28, %s18770_s28   ;;  %s15542_s27 = sphi %s15655_s27, %s18769_s27  }
   0xa   : > { %s11475_s19 = sadd.s32 4294967294, %s15554_s30   ;;  %s15680_s1 = sadd.s32 1, %s15554_s30  }
   0xb   : > { %18744 = sst [smem:[#allocation9_spill]] %s15680_s1  ;;  %s401_s20 = sadd.s32 1, %s15550_s29 }
   0xc   : > { %s398_s21 = ssub.s32 %s15554_s30, %s15680_s1  ;;  %p411_p0 = scmp.ne.s32.totalorder %s15550_s29, %s15546_s28 }
   0xd   : > { %p399_p1 = scmp.eq.s32.totalorder %s398_s21, 0  ;;  %p412_p2 = scmp.eq.s32.totalorder %s15676_s0, 1 }
   0xe   : > { %p417_p3 = scmp.ne.s32.totalorder %s15546_s28, %s15542_s27  ;;  %p418_p4 = scmp.eq.s32.totalorder %s11475_s19, 1 }
   0xf   : > { %s15691_s22 = scalar_select %p399_p1, %s15550_s29, %s401_s20  }
  0x10   : > { %p15693_p5 = por %p412_p2, %p411_p0  ;;  %p15697_p6 = por %p418_p4, %p417_p3 }
  0x11   : > { %18745 = sst [smem:[#allocation10_spill]] %s15691_s22  ;;  %p11478_p7 = scmp.ge.s32.totalorder %s15554_s30, 1 }
  0x12   : > { %s18747_s23 = scalar_select %p15697_p6, 1, 0 }
  0x13   : > { %p518_p8 = scmp.lt.s32.totalorder %s15554_s30, 3 }
  0x14   : > { %18748 = sst [smem:[#allocation11_spill]] %s18747_s23 }
  0x15   : > { %p519_p9 = pnand %p11478_p7, %p518_p8 }
  0x17   : > { %522 = sbr.rel (%p519_p9) target bundleno = 4033 (0xfc1), region = 88 }
  0x1e   : > { %s18749_s4 = sld [smem:[#allocation20_spill]]  ;;  %vm736_vm0 = vcmask 1040384   ;;  %vm737_vm1 = vcmask 1041408   ;;  %p577_p10 = scmp.lt.s32.totalorder %s15676_s0, 1  ;;  %v15556_v1 = vmov 65535   ;;  %vm687_vm2 = vcmask 23552  }
  0x1f   : > { %v738_v2 = vsel %vm736_vm0, 4294967295, %v15556_v1  ;;  %s18750_s19 = sld [smem:[#allocation17_spill]]  ;;  %vm3247_vm3 = vcmask 64512   ;;  %vm3250_vm4 = vcmask 58368   ;;  %s18752_s5 = sld [smem:[#allocation21_spill]]  ;;  %vm3915_vm5 = vcmask 1043456  }
  0x20   : > { %v15711_v4 = vsel %vm737_vm1, %v738_v2, 0  ;;  %s15714_s20 = scalar_select %p577_p10, %s15676_s0, 1  ;;  %vm4834_vm6 = vcmask 523264   ;;  %vm5156_vm7 = vcmask 130048   ;;  %vm5159_vm8 = vcmask 123904  }
  0x21   : > { %vm10784_vm9 = vcmask 31744   ;;  %vm15558_vm10 = vmmov 0   ;;  %vm11323_vm11 = vcmask 261120   ;;  %s12299_s22 = sshll.u32 %s15676_s0, 6  ;;  %vm11367_vm12 = vcmask 519168  }
  0x22   : > { %s15309_s21 = smul.u32 432, %s15714_s20  ;;  %s18670_s1 = scalar_lea.hbm %s18729_s17, %s12299_s22 }
  0x24   : > { %v11483_v0 = vld [vmem:[%s18749_s4 + $0x2] sm:$0x3]  ;;  %v636_v3 = vld [vmem:[%s18749_s4] sm:$0x3]  ;;  %v11516_v7 = vld [vmem:[%s18749_s4 + $0x4] sm:$0x3] }
  0x25   : > { %v741_v5 = vand.u32 %v11483_v0, %v15711_v4  ;;  %v953_v6 = vand.u32 %v15711_v4, %v636_v3  ;;  %s15725_s29 = scalar_lea.vmem %s18750_s19, %s15309_s21  ;;  %v15738_v17 = vand.u32 %v11516_v7, %v15711_v4  ;;  %v11565_v0 = vld [vmem:[%s18749_s4 + $0x6] sm:$0x3]  ;;  %s18751_s21 = sld [smem:[#allocation19_spill]] }
  0x26   : > { %v637_v8 = vld [vmem:[%s15725_s29 + $0x1] sm:$0xff]  ;;  %v638_v9 = vld [vmem:[%s15725_s29 + $0x9] sm:$0xff]  ;;  %v639_v10 = vld [vmem:[%s15725_s29 + $0x19] sm:$0xff]  ;;  %v15839_v3 = vand.u32 %v11565_v0, %v15711_v4  ;;  %s18763_s19 = sld [smem:[#allocation18_spill]] }
  0x27   : > { %13128 = vmatprep.subr.bf16.mxu0 %v741_v5  ;;  %v669_v11 = vpack.c.bf16 %v638_v9, %v637_v8  ;;  %v640_v12 = vld [vmem:[%s15725_s29 + $0x21] sm:$0xff]  ;;  %v641_v13 = vld [vmem:[%s15725_s29 + $0x31] sm:$0xff]  ;;  %v642_v14 = vld [vmem:[%s15725_s29 + $0x39] sm:$0xff] }
  0x28   : > { %13129 = vmatpush3.bf16.msra.mxu0 %v741_v5  ;;  %v15733_v15 = vpack.c.bf16 %v640_v12, %v639_v10  ;;  %v15735_v16 = vpack.c.bf16 %v642_v14, %v641_v13  ;;  %v643_v18 = vld [vmem:[%s15725_s29 + $0x49] sm:$0xff]  ;;  %v644_v19 = vld [vmem:[%s15725_s29 + $0x51] sm:$0xff]  ;;  %v645_v20 = vld [vmem:[%s15725_s29 + $0x61] sm:$0xff] }
  0x29   : > { %13162 = vmatprep.subr.bf16.mxu0 %v953_v6  ;;  %13130 = vmatprep.mubr.msk.bf16.mxu0 %vm687_vm2, %v669_v11  ;;  %v646_v21 = vld [vmem:[%s15725_s29 + $0x69] sm:$0xff]  ;;  %v15750_v22 = vpack.c.bf16 %v644_v19, %v643_v18  ;;  %v647_v24 = vld [vmem:[%s15725_s29 + $0x79] sm:$0xff]  ;;  %v648_v25 = vld [vmem:[%s15725_s29 + $0x81] sm:$0xff] }
  0x2a   : > { %v15752_v23 = vpack.c.bf16 %v646_v21, %v645_v20  ;;  %v649_v26 = vld [vmem:[%s15725_s29 + $0x91] sm:$0xff]  ;;  %v650_v27 = vld [vmem:[%s15725_s29 + $0x99] sm:$0xff]  ;;  %v15762_v28 = vpack.c.bf16 %v648_v25, %v647_v24  ;;  %v651_v30 = vld [vmem:[%s15725_s29 + $0xa9] sm:$0xff] }
  0x2b   : > { %13131 = vmatmul.mubr.msk.bf16.vlgmr.msra.gmra.mrb[0].mxu0 %vm687_vm2, %v15733_v15  ;;  %v15764_v29 = vpack.c.bf16 %v650_v27, %v649_v26  ;;  %v652_v31 = vld [vmem:[%s15725_s29 + $0xb1] sm:$0xff]  ;;  %v653_v32 = vld [vmem:[%s15725_s29 + $0xc1] sm:$0xff]  ;;  %v654_v33 = vld [vmem:[%s15725_s29 + $0xc9] sm:$0xff] }
  0x2c   : > { %13134 = vmatprep.mubr.msk.bf16.mxu0 %vm687_vm2, %v15735_v16  ;;  %13163 = vmatpush3.bf16.msra.mxu0 %v953_v6  ;;  %v15774_v34 = vpack.c.bf16 %v652_v31, %v651_v30  ;;  %v15776_v35 = vpack.c.bf16 %v654_v33, %v653_v32  ;;  %v655_v36 = vld [vmem:[%s15725_s29 + $0xd9] sm:$0xff]  ;;  %v656_v37 = vld [vmem:[%s15725_s29 + $0xe1] sm:$0xff]  ;;  %v657_v38 = vld [vmem:[%s15725_s29 + $0xf1] sm:$0xff] }
  0x2d   : > { %13196 = vmatprep.subr.bf16.mxu0 %v15738_v17  ;;  %v658_v39 = vld [vmem:[%s15725_s29 + $0xf9] sm:$0xff]  ;;  %v15786_v40 = vpack.c.bf16 %v656_v37, %v655_v36  ;;  %v659_v42 = vld [vmem:[%s15725_s29 + $0x109] sm:$0xff]  ;;  %v660_v43 = vld [vmem:[%s15725_s29 + $0x111] sm:$0xff] }
  0x2e   : > { %v15788_v41 = vpack.c.bf16 %v658_v39, %v657_v38  ;;  %v661_v44 = vld [vmem:[%s15725_s29 + $0x121] sm:$0xff]  ;;  %v662_v45 = vld [vmem:[%s15725_s29 + $0x129] sm:$0xff]  ;;  %v15798_v46 = vpack.c.bf16 %v660_v43, %v659_v42  ;;  %v663_v48 = vld [vmem:[%s15725_s29 + $0x139] sm:$0xff] }
  0x2f   : > { %v15800_v47 = vpack.c.bf16 %v662_v45, %v661_v44  ;;  %v664_v49 = vld [vmem:[%s15725_s29 + $0x141] sm:$0xff]  ;;  %v665_v50 = vld [vmem:[%s15725_s29 + $0x151] sm:$0xff]  ;;  %v666_v51 = vld [vmem:[%s15725_s29 + $0x159] sm:$0xff] }
  0x30   : > { %v15810_v52 = vpack.c.bf16 %v664_v49, %v663_v48  ;;  %v15812_v53 = vpack.c.bf16 %v666_v51, %v665_v50  ;;  %v667_v54 = vld [vmem:[%s15725_s29 + $0x169] sm:$0xff]  ;;  %v668_v55 = vld [vmem:[%s15725_s29 + $0x171] sm:$0xff]  ;;  %v588_v56 = vld [vmem:[%s15725_s29] sm:$0xff] }
  0x31   : > { %v589_v57 = vld [vmem:[%s15725_s29 + $0x8] sm:$0xff]  ;;  %v15822_v58 = vpack.c.bf16 %v668_v55, %v667_v54  ;;  %v590_v60 = vld [vmem:[%s15725_s29 + $0x18] sm:$0xff]  ;;  %v591_v61 = vld [vmem:[%s15725_s29 + $0x20] sm:$0xff] }
  0x32   : > { %v620_v59 = vpack.c.bf16 %v589_v57, %v588_v56  ;;  %v592_v62 = vld [vmem:[%s15725_s29 + $0x30] sm:$0xff]  ;;  %v593_v63 = vld [vmem:[%s15725_s29 + $0x38] sm:$0xff]  ;;  %v15834_v1 = vpack.c.bf16 %v591_v61, %v590_v60  ;;  %v594_v5 = vld [vmem:[%s15725_s29 + $0x48] sm:$0xff] }
  0x33   : > { %13135 = vmatmul.mubr.msk.bf16.gmra.mrb[4].mxu0 %vm687_vm2, %v15750_v22  ;;  %v15836_v2 = vpack.c.bf16 %v593_v63, %v592_v62  ;;  %v595_v6 = vld [vmem:[%s15725_s29 + $0x50] sm:$0xff]  ;;  %v596_v7 = vld [vmem:[%s15725_s29 + $0x60] sm:$0xff]  ;;  %v597_v8 = vld [vmem:[%s15725_s29 + $0x68] sm:$0xff] }
  0x34   : > { %13138 = vmatprep.mubr.msk.bf16.mxu0 %vm687_vm2, %v15752_v23  ;;  %v15851_v9 = vpack.c.bf16 %v595_v6, %v594_v5  ;;  %v15853_v10 = vpack.c.bf16 %v597_v8, %v596_v7  ;;  %v598_v11 = vld [vmem:[%s15725_s29 + $0x78] sm:$0xff]  ;;  %v599_v12 = vld [vmem:[%s15725_s29 + $0x80] sm:$0xff]  ;;  %v600_v13 = vld [vmem:[%s15725_s29 + $0x90] sm:$0xff] }
  0x35   : > { %v601_v14 = vld [vmem:[%s15725_s29 + $0x98] sm:$0xff]  ;;  %v602_v19 = vld [vmem:[%s15725_s29 + $0xa8] sm:$0xff]  ;;  %v603_v20 = vld [vmem:[%s15725_s29 + $0xb0] sm:$0xff] }
  0x36   : > { %v15865_v18 = vpack.c.bf16 %v601_v14, %v600_v13  ;;  %v604_v21 = vld [vmem:[%s15725_s29 + $0xc0] sm:$0xff]  ;;  %v605_v24 = vld [vmem:[%s15725_s29 + $0xc8] sm:$0xff]  ;;  %v15875_v25 = vpack.c.bf16 %v603_v20, %v602_v19  ;;  %v606_v27 = vld [vmem:[%s15725_s29 + $0xd8] sm:$0xff] }
  0x37   : > { %v15877_v26 = vpack.c.bf16 %v605_v24, %v604_v21  ;;  %v607_v30 = vld [vmem:[%s15725_s29 + $0xe0] sm:$0xff]  ;;  %v608_v31 = vld [vmem:[%s15725_s29 + $0xf0] sm:$0xff]  ;;  %v609_v32 = vld [vmem:[%s15725_s29 + $0xf8] sm:$0xff] }
  0x38   : > { %v15887_v33 = vpack.c.bf16 %v607_v30, %v606_v27  ;;  %v15889_v36 = vpack.c.bf16 %v609_v32, %v608_v31  ;;  %v610_v37 = vld [vmem:[%s15725_s29 + $0x108] sm:$0xff]  ;;  %v611_v38 = vld [vmem:[%s15725_s29 + $0x110] sm:$0xff]  ;;  %v612_v39 = vld [vmem:[%s15725_s29 + $0x120] sm:$0xff] }
  0x39   : > { %v613_v42 = vld [vmem:[%s15725_s29 + $0x128] sm:$0xff]  ;;  %v15899_v43 = vpack.c.bf16 %v611_v38, %v610_v37  ;;  %v614_v45 = vld [vmem:[%s15725_s29 + $0x138] sm:$0xff]  ;;  %v615_v48 = vld [vmem:[%s15725_s29 + $0x140] sm:$0xff] }
  0x3a   : > { %v15901_v44 = vpack.c.bf16 %v613_v42, %v612_v39  ;;  %v616_v49 = vld [vmem:[%s15725_s29 + $0x150] sm:$0xff]  ;;  %v617_v50 = vld [vmem:[%s15725_s29 + $0x158] sm:$0xff]  ;;  %v15911_v51 = vpack.c.bf16 %v615_v48, %v614_v45  ;;  %v618_v55 = vld [vmem:[%s15725_s29 + $0x168] sm:$0xff] }
  0x3b   : > { %13139 = vmatmul.mubr.msk.bf16.gmra.mrb[8].mxu0 %vm687_vm2, %v15762_v28  ;;  %v15913_v54 = vpack.c.bf16 %v617_v50, %v616_v49  ;;  %v619_v56 = vld [vmem:[%s15725_s29 + $0x170] sm:$0xff]  ;;  %v1116_v57 = vld [vmem:[%s15725_s29 + $0x2] sm:$0xff]  ;;  %v1118_v62 = vld [vmem:[%s15725_s29 + $0x1a] sm:$0xff] }
  0x3c   : > { %13142 = vmatprep.mubr.msk.bf16.mxu0 %vm687_vm2, %v15764_v29  ;;  %v15923_v60 = vpack.c.bf16 %v619_v56, %v618_v55  ;;  %v1119_v63 = vld [vmem:[%s15725_s29 + $0x22] sm:$0xff]  ;;  %v1120_v0 = vld [vmem:[%s15725_s29 + $0x32] sm:$0xff]  ;;  %v1121_v5 = vld [vmem:[%s15725_s29 + $0x3a] sm:$0xff] }
  0x3d   : > { %v11614_v6 = vld [vmem:[%s18749_s4 + $0x8] sm:$0x3]  ;;  %v15935_v7 = vpack.c.bf16 %v1119_v63, %v1118_v62  ;;  %v15937_v8 = vpack.c.bf16 %v1121_v5, %v1120_v0  ;;  %v1123_v13 = vld [vmem:[%s15725_s29 + $0x52] sm:$0xff]  ;;  %v1125_v19 = vld [vmem:[%s15725_s29 + $0x6a] sm:$0xff] }
  0x3e   : > { %v1124_v14 = vld [vmem:[%s15725_s29 + $0x62] sm:$0xff]  ;;  %v1126_v24 = vld [vmem:[%s15725_s29 + $0x7a] sm:$0xff]  ;;  %v1128_v27 = vld [vmem:[%s15725_s29 + $0x92] sm:$0xff] }
  0x3f   : > { %v15951_v21 = vpack.c.bf16 %v1125_v19, %v1124_v14  ;;  %v1129_v30 = vld [vmem:[%s15725_s29 + $0x9a] sm:$0xff]  ;;  %v1130_v37 = vld [vmem:[%s15725_s29 + $0xaa] sm:$0xff]  ;;  %v1131_v38 = vld [vmem:[%s15725_s29 + $0xb2] sm:$0xff] }
  0x40   : > { %v15963_v32 = vpack.c.bf16 %v1129_v30, %v1128_v27  ;;  %v1132_v39 = vld [vmem:[%s15725_s29 + $0xc2] sm:$0xff]  ;;  %v1133_v42 = vld [vmem:[%s15725_s29 + $0xca] sm:$0xff]  ;;  %v15973_v45 = vpack.c.bf16 %v1131_v38, %v1130_v37  ;;  %v1134_v49 = vld [vmem:[%s15725_s29 + $0xda] sm:$0xff] }
  0x41   : > { %v15975_v48 = vpack.c.bf16 %v1133_v42, %v1132_v39  ;;  %v1135_v50 = vld [vmem:[%s15725_s29 + $0xe2] sm:$0xff]  ;;  %v1136_v55 = vld [vmem:[%s15725_s29 + $0xf2] sm:$0xff]  ;;  %v1137_v56 = vld [vmem:[%s15725_s29 + $0xfa] sm:$0xff] }
  0x42   : > { %v1139_v62 = vld [vmem:[%s15725_s29 + $0x112] sm:$0xff]  ;;  %v1140_v63 = vld [vmem:[%s15725_s29 + $0x122] sm:$0xff]  ;;  %v1141_v0 = vld [vmem:[%s15725_s29 + $0x12a] sm:$0xff] }
  0x43   : > { %13143 = vmatmul.mubr.msk.bf16.gmra.mrb[12].mxu0 %vm687_vm2, %v15774_v34  ;;  %v1144_v14 = vld [vmem:[%s15725_s29 + $0x152] sm:$0xff]  ;;  %v1145_v19 = vld [vmem:[%s15725_s29 + $0x15a] sm:$0xff]  ;;  %v1146_v27 = vld [vmem:[%s15725_s29 + $0x16a] sm:$0xff] }
  0x44   : > { %13146 = vmatprep.mubr.msk.bf16.mxu0 %vm687_vm2, %v15776_v35  ;;  %v1147_v30 = vld [vmem:[%s15725_s29 + $0x172] sm:$0xff]  ;;  %v11663_v38 = vld [vmem:[%s18749_s4 + $0xa] sm:$0x3] }
  0x45   : > { %v16019_v37 = vpack.c.bf16 %v1147_v30, %v1146_v27  ;;  %v2098_v39 = vand.u32 %v11663_v38, %v15711_v4 }
  0x4b   : > { %13147 = vmatmul.mubr.msk.bf16.gmra.mrb[16].mxu0 %vm687_vm2, %v15786_v40 }
  0x4c   : > { %13150 = vmatprep.mubr.msk.bf16.mxu0 %vm687_vm2, %v15788_v41 }
  0x53   : > { %13151 = vmatmul.mubr.msk.bf16.gmra.mrb[20].mxu0 %vm687_vm2, %v15798_v46 }
  0x54   : > { %13154 = vmatprep.mubr.msk.bf16.mxu0 %vm687_vm2, %v15800_v47 }
  0x5b   : > { %13155 = vmatmul.mubr.msk.bf16.gmra.mrb[24].mxu0 %vm687_vm2, %v15810_v52 }
  0x5c   : > { %13158 = vmatprep.mubr.msk.bf16.mxu0 %vm687_vm2, %v15812_v53 }
  0x63   : > { %13159 = vmatmul.mubr.msk.bf16.gmra.mrb[28].mxu0 %vm687_vm2, %v15822_v58 }
  0x64   : > { %13164 = vmatprep.mubr.msk.bf16.mxu0 %vm687_vm2, %v620_v59  ;;  %v1117_v59 = vld [vmem:[%s15725_s29 + $0xa] sm:$0xff] }
  0x65   : > { %v1148_v61 = vpack.c.bf16 %v1117_v59, %v1116_v57  ;;  %v15985_v57 = vpack.c.bf16 %v1135_v50, %v1134_v49  ;;  %v15987_v59 = vpack.c.bf16 %v1137_v56, %v1136_v55  ;;  %v11712_v49 = vld [vmem:[%s18749_s4 + $0xc] sm:$0x3] }
  0x66   : > { %v2393_v50 = vand.u32 %v11712_v49, %v15711_v4  ;;  %v11613_v55 = vld [vmem:[%s15725_s29 + $0x189] sm:$0xff] }
  0x6b   : > { %13165 = vmatmul.mubr.msk.bf16.vlgmr.msra.gmra.mrb[0].mxu0 %vm687_vm2, %v15834_v1 }
  0x6c   : > { %13168 = vmatprep.mubr.msk.bf16.mxu0 %vm687_vm2, %v15836_v2  ;;  %13197 = vmatpush3.bf16.msra.mxu0 %v15738_v17  ;;  %v15863_v17 = vpack.c.bf16 %v599_v12, %v598_v11  ;;  %v1804_v11 = vand.u32 %v11614_v6, %v15711_v4  ;;  %v1122_v12 = vld [vmem:[%s15725_s29 + $0x4a] sm:$0xff]  ;;  %v15999_v6 = vpack.c.bf16 %v1141_v0, %v1140_v63 }
  0x6d   : > { %13230 = vmatprep.subr.bf16.mxu0 %v15839_v3  ;;  %v15949_v20 = vpack.c.bf16 %v1123_v13, %v1122_v12  ;;  %v1142_v12 = vld [vmem:[%s15725_s29 + $0x13a] sm:$0xff]  ;;  %v1143_v13 = vld [vmem:[%s15725_s29 + $0x142] sm:$0xff]  ;;  %v11662_v63 = vld [vmem:[%s15725_s29 + $0x18a] sm:$0xff] }
  0x73   : > { %13169 = vmatmul.mubr.msk.bf16.gmra.mrb[4].mxu0 %vm687_vm2, %v15851_v9 }
  0x74   : > { %13172 = vmatprep.mubr.msk.bf16.mxu0 %vm687_vm2, %v15853_v10 }
  0x7b   : > { %13173 = vmatmul.mubr.msk.bf16.gmra.mrb[8].mxu0 %vm687_vm2, %v15863_v17 }
  0x7c   : > { %13176 = vmatprep.mubr.msk.bf16.mxu0 %vm687_vm2, %v15865_v18 }
  0x83   : > { %13177 = vmatmul.mubr.msk.bf16.gmra.mrb[12].mxu0 %vm687_vm2, %v15875_v25 }
  0x84   : > { %13180 = vmatprep.mubr.msk.bf16.mxu0 %vm687_vm2, %v15877_v26 }
  0x8b   : > { %13181 = vmatmul.mubr.msk.bf16.gmra.mrb[16].mxu0 %vm687_vm2, %v15887_v33 }
  0x8c   : > { %13184 = vmatprep.mubr.msk.bf16.mxu0 %vm687_vm2, %v15889_v36 }
  0x93   : > { %13185 = vmatmul.mubr.msk.bf16.gmra.mrb[20].mxu0 %vm687_vm2, %v15899_v43 }
  0x94   : > { %13188 = vmatprep.mubr.msk.bf16.mxu0 %vm687_vm2, %v15901_v44 }
  0x9b   : > { %13189 = vmatmul.mubr.msk.bf16.gmra.mrb[24].mxu0 %vm687_vm2, %v15911_v51 }
  0x9c   : > { %13192 = vmatprep.mubr.msk.bf16.mxu0 %vm687_vm2, %v15913_v54 }
  0xa3   : > { %13193 = vmatmul.mubr.msk.bf16.gmra.mrb[28].mxu0 %vm687_vm2, %v15923_v60 }
  0xa4   : > { %13198 = vmatprep.mubr.msk.bf16.mxu0 %vm687_vm2, %v1148_v61  ;;  %v1138_v61 = vld [vmem:[%s15725_s29 + $0x10a] sm:$0xff] }
  0xa5   : > { %v15997_v5 = vpack.c.bf16 %v1139_v62, %v1138_v61  ;;  %v11761_v61 = vld [vmem:[%s18749_s4 + $0xe] sm:$0x3] }
  0xa6   : > { %v2687_v62 = vand.u32 %v11761_v61, %v15711_v4 }
  0xab   : > { %13199 = vmatmul.mubr.msk.bf16.vlgmr.msra.gmra.mrb[0].mxu0 %vm687_vm2, %v15935_v7 }
  0xac   : > { %13202 = vmatprep.mubr.msk.bf16.mxu0 %vm687_vm2, %v15937_v8  ;;  %13231 = vmatpush3.bf16.msra.mxu0 %v15839_v3  ;;  %v1127_v3 = vld [vmem:[%s15725_s29 + $0x82] sm:$0xff] }
  0xad   : > { %13264 = vmatprep.subr.bf16.mxu0 %v1804_v11  ;;  %v15961_v31 = vpack.c.bf16 %v1127_v3, %v1126_v24  ;;  %v16009_v24 = vpack.c.bf16 %v1143_v13, %v1142_v12  ;;  %v16011_v3 = vpack.c.bf16 %v1145_v19, %v1144_v14  ;;  %v11810_v12 = vld [vmem:[%s18749_s4 + $0x10] sm:$0x3]  ;;  %s12302_s4 = sshll.u32 %s15714_s20, 8  ;;  %s567_s20 = sand.u32 1, %s15546_s28  }
  0xae   : > { %v2981_v13 = vand.u32 %v11810_v12, %v15711_v4  ;;  %v11710_v4 = vld [vmem:[%s15725_s29 + $0x198] sm:$0xff]  ;;  %s18179_s23 = scalar_lea.vmem %s18730_s18, %s12302_s4  ;;  %s11479_s26 = sshll.u32 %s567_s20, 2 }
  0xaf   : > { %s569_s4 = scalar_lea.vmem [#allocation5], %s11479_s26  ;;  %s11370_s0 = scalar_lea.sflag [#allocation6], %s567_s20 }
  0xb0   : > { %s15559_s26 = smov [#allocation5]  }
  0xb3   : > { %13203 = vmatmul.mubr.msk.bf16.gmra.mrb[4].mxu0 %vm687_vm2, %v15949_v20 }
  0xb4   : > { %13206 = vmatprep.mubr.msk.bf16.mxu0 %vm687_vm2, %v15951_v21 }
  0xbb   : > { %13207 = vmatmul.mubr.msk.bf16.gmra.mrb[8].mxu0 %vm687_vm2, %v15961_v31 }
  0xbc   : > { %13210 = vmatprep.mubr.msk.bf16.mxu0 %vm687_vm2, %v15963_v32 }
  0xc3   : > { %13211 = vmatmul.mubr.msk.bf16.gmra.mrb[12].mxu0 %vm687_vm2, %v15973_v45 }
  0xc4   : > { %13214 = vmatprep.mubr.msk.bf16.mxu0 %vm687_vm2, %v15975_v48 }
  0xcb   : > { %13215 = vmatmul.mubr.msk.bf16.gmra.mrb[16].mxu0 %vm687_vm2, %v15985_v57 }
  0xcc   : > { %13218 = vmatprep.mubr.msk.bf16.mxu0 %vm687_vm2, %v15987_v59 }
  0xd3   : > { %13219 = vmatmul.mubr.msk.bf16.gmra.mrb[20].mxu0 %vm687_vm2, %v15997_v5 }
  0xd4   : > { %13222 = vmatprep.mubr.msk.bf16.mxu0 %vm687_vm2, %v15999_v6 }
  0xdb   : > { %13223 = vmatmul.mubr.msk.bf16.gmra.mrb[24].mxu0 %vm687_vm2, %v16009_v24 }
  0xdc   : > { %13226 = vmatprep.mubr.msk.bf16.mxu0 %vm687_vm2, %v16011_v3 }
  0xe3   : > { %13227 = vmatmul.mubr.msk.bf16.gmra.mrb[28].mxu0 %vm687_vm2, %v16019_v37 }
  0xe4   : > { %13232 = vmatprep.mubr.msk.bf16.mxu0 %vm687_vm2, %v15834_v1  ;;  %v11563_v1 = vld [vmem:[%s15725_s29 + $0x180] sm:$0xff] }
  0xeb   : > { %13233 = vmatmul.mubr.msk.bf16.vlgmr.msra.gmra.mrb[0].mxu0 %vm687_vm2, %v15836_v2 }
  0xec   : > { %13236 = vmatprep.mubr.msk.bf16.mxu0 %vm687_vm2, %v15851_v9  ;;  %13265 = vmatpush3.bf16.msra.mxu0 %v1804_v11  ;;  %v11564_v11 = vld [vmem:[%s15725_s29 + $0x188] sm:$0xff] }
  0xed   : > { %13298 = vmatprep.subr.bf16.mxu0 %v2098_v39  ;;  %v16059_v42 = vpack.c.bf16 %v11564_v11, %v11563_v1 }
  0xf3   : > { %13237 = vmatmul.mubr.msk.bf16.gmra.mrb[4].mxu0 %vm687_vm2, %v15853_v10 }
  0xf4   : > { %13240 = vmatprep.mubr.msk.bf16.mxu0 %vm687_vm2, %v15863_v17 }
  0xfb   : > { %13241 = vmatmul.mubr.msk.bf16.gmra.mrb[8].mxu0 %vm687_vm2, %v15865_v18 }
  0xfc   : > { %13244 = vmatprep.mubr.msk.bf16.mxu0 %vm687_vm2, %v15875_v25 }
 0x103   : > { %13245 = vmatmul.mubr.msk.bf16.gmra.mrb[12].mxu0 %vm687_vm2, %v15877_v26 }
 0x104   : > { %13248 = vmatprep.mubr.msk.bf16.mxu0 %vm687_vm2, %v15887_v33 }
 0x10b   : > { %13249 = vmatmul.mubr.msk.bf16.gmra.mrb[16].mxu0 %vm687_vm2, %v15889_v36 }
 0x10c   : > { %13252 = vmatprep.mubr.msk.bf16.mxu0 %vm687_vm2, %v15899_v43 }
 0x113   : > { %13253 = vmatmul.mubr.msk.bf16.gmra.mrb[20].mxu0 %vm687_vm2, %v15901_v44 }
 0x114   : > { %13256 = vmatprep.mubr.msk.bf16.mxu0 %vm687_vm2, %v15911_v51 }
 0x11b   : > { %13257 = vmatmul.mubr.msk.bf16.gmra.mrb[24].mxu0 %vm687_vm2, %v15913_v54 }
 0x11c   : > { %13260 = vmatprep.mubr.msk.bf16.mxu0 %vm687_vm2, %v15923_v60 }
 0x123   : > { %13261 = vmatmul.mubr.msk.bf16.gmra.mrb[28].mxu0 %vm687_vm2, %v16059_v42 }
 0x124   : > { %13266 = vmatprep.mubr.msk.bf16.mxu0 %vm687_vm2, %v15733_v15  ;;  %v11612_v15 = vld [vmem:[%s15725_s29 + $0x181] sm:$0xff] }
 0x125   : > { %v16099_v56 = vpack.c.bf16 %v11613_v55, %v11612_v15 }
 0x12b   : > { %13267 = vmatmul.mubr.msk.bf16.vlgmr.msra.gmra.mrb[0].mxu0 %vm687_vm2, %v15735_v16 }
 0x12c   : > { %13270 = vmatprep.mubr.msk.bf16.mxu0 %vm687_vm2, %v15750_v22  ;;  %13299 = vmatpush3.bf16.msra.mxu0 %v2098_v39 }
 0x12d   : > { %13332 = vmatprep.subr.bf16.mxu0 %v2393_v50 }
 0x133   : > { %13271 = vmatmul.mubr.msk.bf16.gmra.mrb[4].mxu0 %vm687_vm2, %v15752_v23 }
 0x134   : > { %13274 = vmatprep.mubr.msk.bf16.mxu0 %vm687_vm2, %v15762_v28 }
 0x13b   : > { %13275 = vmatmul.mubr.msk.bf16.gmra.mrb[8].mxu0 %vm687_vm2, %v15764_v29 }
 0x13c   : > { %13278 = vmatprep.mubr.msk.bf16.mxu0 %vm687_vm2, %v15774_v34 }
 0x143   : > { %13279 = vmatmul.mubr.msk.bf16.gmra.mrb[12].mxu0 %vm687_vm2, %v15776_v35 }
 0x144   : > { %13282 = vmatprep.mubr.msk.bf16.mxu0 %vm687_vm2, %v15786_v40 }
 0x14b   : > { %13283 = vmatmul.mubr.msk.bf16.gmra.mrb[16].mxu0 %vm687_vm2, %v15788_v41 }
 0x14c   : > { %13286 = vmatprep.mubr.msk.bf16.mxu0 %vm687_vm2, %v15798_v46 }
 0x153   : > { %13287 = vmatmul.mubr.msk.bf16.gmra.mrb[20].mxu0 %vm687_vm2, %v15800_v47 }
 0x154   : > { %13290 = vmatprep.mubr.msk.bf16.mxu0 %vm687_vm2, %v15810_v52 }
 0x15b   : > { %13291 = vmatmul.mubr.msk.bf16.gmra.mrb[24].mxu0 %vm687_vm2, %v15812_v53 }
 0x15c   : > { %13294 = vmatprep.mubr.msk.bf16.mxu0 %vm687_vm2, %v15822_v58 }
 0x163   : > { %13295 = vmatmul.mubr.msk.bf16.gmra.mrb[28].mxu0 %vm687_vm2, %v16099_v56 }
 0x164   : > { %13300 = vmatprep.mubr.msk.bf16.mxu0 %vm687_vm2, %v15935_v7  ;;  %v11661_v7 = vld [vmem:[%s15725_s29 + $0x182] sm:$0xff] }
 0x165   : > { %v2046_v0 = vpack.c.bf16 %v11662_v63, %v11661_v7 }
 0x16b   : > { %13301 = vmatmul.mubr.msk.bf16.vlgmr.msra.gmra.mrb[0].mxu0 %vm687_vm2, %v15937_v8 }
 0x16c   : > { %13304 = vmatprep.mubr.msk.bf16.mxu0 %vm687_vm2, %v15949_v20  ;;  %13333 = vmatpush3.bf16.msra.mxu0 %v2393_v50 }
 0x16d   : > { %13366 = vmatprep.subr.bf16.mxu0 %v2687_v62 }
 0x173   : > { %13305 = vmatmul.mubr.msk.bf16.gmra.mrb[4].mxu0 %vm687_vm2, %v15951_v21 }
 0x174   : > { %13308 = vmatprep.mubr.msk.bf16.mxu0 %vm687_vm2, %v15961_v31 }
 0x17b   : > { %13309 = vmatmul.mubr.msk.bf16.gmra.mrb[8].mxu0 %vm687_vm2, %v15963_v32 }
 0x17c   : > { %13312 = vmatprep.mubr.msk.bf16.mxu0 %vm687_vm2, %v15973_v45 }
 0x183   : > { %13313 = vmatmul.mubr.msk.bf16.gmra.mrb[12].mxu0 %vm687_vm2, %v15975_v48 }
 0x184   : > { %13316 = vmatprep.mubr.msk.bf16.mxu0 %vm687_vm2, %v15985_v57 }
 0x18b   : > { %13317 = vmatmul.mubr.msk.bf16.gmra.mrb[16].mxu0 %vm687_vm2, %v15987_v59 }
 0x18c   : > { %13320 = vmatprep.mubr.msk.bf16.mxu0 %vm687_vm2, %v15997_v5 }
 0x193   : > { %13321 = vmatmul.mubr.msk.bf16.gmra.mrb[20].mxu0 %vm687_vm2, %v15999_v6 }
 0x194   : > { %13324 = vmatprep.mubr.msk.bf16.mxu0 %vm687_vm2, %v16009_v24 }
 0x19b   : > { %13325 = vmatmul.mubr.msk.bf16.gmra.mrb[24].mxu0 %vm687_vm2, %v16011_v3 }
 0x19c   : > { %13328 = vmatprep.mubr.msk.bf16.mxu0 %vm687_vm2, %v16019_v37 }
 0x1a3   : > { %13329 = vmatmul.mubr.msk.bf16.gmra.mrb[28].mxu0 %vm687_vm2, %v2046_v0 }
 0x1a4   : > { %13334 = vmatprep.mubr.msk.bf16.mxu0 %vm687_vm2, %v15836_v2  ;;  %v11711_v2 = vld [vmem:[%s15725_s29 + $0x1a0] sm:$0xff] }
 0x1ab   : > { %13335 = vmatmul.mubr.msk.bf16.vlgmr.msra.gmra.mrb[0].mxu0 %vm687_vm2, %v15851_v9  ;;  %v2341_v9 = vpack.c.bf16 %v11711_v2, %v11710_v4 }
 0x1ac   : > { %13338 = vmatprep.mubr.msk.bf16.mxu0 %vm687_vm2, %v15853_v10  ;;  %13367 = vmatpush3.bf16.msra.mxu0 %v2687_v62 }
 0x1ad   : > { %13400 = vmatprep.subr.bf16.mxu0 %v2981_v13 }
 0x1b3   : > { %13339 = vmatmul.mubr.msk.bf16.gmra.mrb[4].mxu0 %vm687_vm2, %v15863_v17 }
 0x1b4   : > { %13342 = vmatprep.mubr.msk.bf16.mxu0 %vm687_vm2, %v15865_v18 }
 0x1bb   : > { %13343 = vmatmul.mubr.msk.bf16.gmra.mrb[8].mxu0 %vm687_vm2, %v15875_v25 }
 0x1bc   : > { %13346 = vmatprep.mubr.msk.bf16.mxu0 %vm687_vm2, %v15877_v26 }
 0x1c3   : > { %13347 = vmatmul.mubr.msk.bf16.gmra.mrb[12].mxu0 %vm687_vm2, %v15887_v33 }
 0x1c4   : > { %13350 = vmatprep.mubr.msk.bf16.mxu0 %vm687_vm2, %v15889_v36 }
 0x1cb   : > { %13351 = vmatmul.mubr.msk.bf16.gmra.mrb[16].mxu0 %vm687_vm2, %v15899_v43 }
 0x1cc   : > { %13354 = vmatprep.mubr.msk.bf16.mxu0 %vm687_vm2, %v15901_v44 }
 0x1d3   : > { %13355 = vmatmul.mubr.msk.bf16.gmra.mrb[20].mxu0 %vm687_vm2, %v15911_v51 }
 0x1d4   : > { %13358 = vmatprep.mubr.msk.bf16.mxu0 %vm687_vm2, %v15913_v54 }
 0x1db   : > { %13359 = vmatmul.mubr.msk.bf16.gmra.mrb[24].mxu0 %vm687_vm2, %v15923_v60 }
 0x1dc   : > { %13362 = vmatprep.mubr.msk.bf16.mxu0 %vm687_vm2, %v16059_v42 }
 0x1e3   : > { %13363 = vmatmul.mubr.msk.bf16.gmra.mrb[28].mxu0 %vm687_vm2, %v2341_v9 }
 0x1e4   : > { %13368 = vmatprep.mubr.msk.bf16.mxu0 %vm687_vm2, %v15735_v16  ;;  %v11759_v16 = vld [vmem:[%s15725_s29 + $0x199] sm:$0xff] }
 0x1eb   : > { %13369 = vmatmul.mubr.msk.bf16.vlgmr.msra.gmra.mrb[0].mxu0 %vm687_vm2, %v15750_v22  ;;  %v11760_v22 = vld [vmem:[%s15725_s29 + $0x1a1] sm:$0xff] }
 0x1ec   : > { %13372 = vmatprep.mubr.msk.bf16.mxu0 %vm687_vm2, %v15752_v23  ;;  %13401 = vmatpush3.bf16.msra.mxu0 %v2981_v13  ;;  %v2635_v23 = vpack.c.bf16 %v11760_v22, %v11759_v16 }
 0x1f3   : > { %13373 = vmatmul.mubr.msk.bf16.gmra.mrb[4].mxu0 %vm687_vm2, %v15762_v28  ;;  %v11808_v28 = vld [vmem:[%s15725_s29 + $0x19a] sm:$0xff] }
 0x1f4   : > { %13376 = vmatprep.mubr.msk.bf16.mxu0 %vm687_vm2, %v15764_v29  ;;  %v11809_v29 = vld [vmem:[%s15725_s29 + $0x1a2] sm:$0xff] }
 0x1fb   : > { %13377 = vmatmul.mubr.msk.bf16.gmra.mrb[8].mxu0 %vm687_vm2, %v15774_v34  ;;  %v2929_v34 = vpack.c.bf16 %v11809_v29, %v11808_v28 }
 0x1fc   : > { %13380 = vmatprep.mubr.msk.bf16.mxu0 %vm687_vm2, %v15776_v35  ;;  %v18736_v35 = vmov 0.0  }
 0x1fd   : > { %3255 = vst.msk [vmem:[#allocation2 + $0x30] sm:$0xff] %vm3247_vm3, %v18736_v35  ;;  %3256 = vst.msk [vmem:[#allocation2 + $0x38] sm:$0xff] %vm3247_vm3, %v18736_v35 }
 0x1fe   : > { %3248 = vst.msk [vmem:[#allocation2] sm:$0xff] %vm3247_vm3, %v18736_v35  ;;  %3249 = vst.msk [vmem:[#allocation2 + $0x8] sm:$0xff] %vm3247_vm3, %v18736_v35 }
 0x1ff   : > { %3252 = vst.msk [vmem:[#allocation2 + $0x18] sm:$0xff] %vm3247_vm3, %v18736_v35  ;;  %3253 = vst.msk [vmem:[#allocation2 + $0x20] sm:$0xff] %vm3247_vm3, %v18736_v35 }
 0x200   : > { %3258 = vst.msk [vmem:[#allocation2 + $0x48] sm:$0xff] %vm3247_vm3, %v18736_v35  ;;  %3259 = vst.msk [vmem:[#allocation2 + $0x50] sm:$0xff] %vm3247_vm3, %v18736_v35 }
 0x201   : > { %3261 = vst.msk [vmem:[#allocation2 + $0x60] sm:$0xff] %vm3247_vm3, %v18736_v35  ;;  %3262 = vst.msk [vmem:[#allocation2 + $0x68] sm:$0xff] %vm3247_vm3, %v18736_v35 }
 0x202   : > { %3264 = vst.msk [vmem:[#allocation2 + $0x78] sm:$0xff] %vm3247_vm3, %v18736_v35  ;;  %3265 = vst.msk [vmem:[#allocation2 + $0x80] sm:$0xff] %vm3247_vm3, %v18736_v35 }
 0x203   : > { %13381 = vmatmul.mubr.msk.bf16.gmra.mrb[12].mxu0 %vm687_vm2, %v15786_v40  ;;  %3267 = vst.msk [vmem:[#allocation2 + $0x90] sm:$0xff] %vm3247_vm3, %v18736_v35  ;;  %3268 = vst.msk [vmem:[#allocation2 + $0x98] sm:$0xff] %vm3247_vm3, %v18736_v35  ;;  %v3337_v40 = vld [vmem:[%s18751_s21 + $0x8] sm:$0xff] }
 0x204   : > { %13384 = vmatprep.mubr.msk.bf16.mxu0 %vm687_vm2, %v15788_v41  ;;  %3270 = vst.msk [vmem:[#allocation2 + $0xa8] sm:$0xff] %vm3247_vm3, %v18736_v35  ;;  %3271 = vst.msk [vmem:[#allocation2 + $0xb0] sm:$0xff] %vm3247_vm3, %v18736_v35  ;;  %3416 = vmatprep.mubr.f32.mxu1 %v3337_v40  ;;  %v16396_v41 = vld [vmem:[%s18752_s5] ss:$0 sm:$0xff]  ;;  %s11388_s5 = sshll.u32 %s569_s4, 4  ;;  %s18672_s5 = int_to_ptr.vmem [resolvable:$true] %s11388_s5 }
 0x205   : > { %3273 = vst.msk [vmem:[#allocation2 + $0xc0] sm:$0xff] %vm3247_vm3, %v18736_v35  ;;  %3274 = vst.msk [vmem:[#allocation2 + $0xc8] sm:$0xff] %vm3247_vm3, %v18736_v35 }
 0x206   : > { %3276 = vst.msk [vmem:[#allocation2 + $0xd8] sm:$0xff] %vm3247_vm3, %v18736_v35  ;;  %3277 = vst.msk [vmem:[#allocation2 + $0xe0] sm:$0xff] %vm3247_vm3, %v18736_v35 }
 0x207   : > { %3279 = vst.msk [vmem:[#allocation2 + $0xf0] sm:$0xff] %vm3247_vm3, %v18736_v35  ;;  %3280 = vst.msk [vmem:[#allocation2 + $0xf8] sm:$0xff] %vm3247_vm3, %v18736_v35 }
 0x208   : > { %3282 = vst.msk [vmem:[#allocation2 + $0x108] sm:$0xff] %vm3247_vm3, %v18736_v35  ;;  %3283 = vst.msk [vmem:[#allocation2 + $0x110] sm:$0xff] %vm3247_vm3, %v18736_v35 }
 0x209   : > { %3285 = vst.msk [vmem:[#allocation2 + $0x120] sm:$0xff] %vm3247_vm3, %v18736_v35  ;;  %3286 = vst.msk [vmem:[#allocation2 + $0x128] sm:$0xff] %vm3247_vm3, %v18736_v35 }
 0x20a   : > { %3288 = vst.msk [vmem:[#allocation2 + $0x138] sm:$0xff] %vm3247_vm3, %v18736_v35  ;;  %3289 = vst.msk [vmem:[#allocation2 + $0x140] sm:$0xff] %vm3247_vm3, %v18736_v35 }
 0x20b   : > { %13385 = vmatmul.mubr.msk.bf16.gmra.mrb[16].mxu0 %vm687_vm2, %v15798_v46  ;;  %3291 = vst.msk [vmem:[#allocation2 + $0x150] sm:$0xff] %vm3247_vm3, %v18736_v35  ;;  %3292 = vst.msk [vmem:[#allocation2 + $0x158] sm:$0xff] %vm3247_vm3, %v18736_v35 }
 0x20c   : > { %13388 = vmatprep.mubr.msk.bf16.mxu0 %vm687_vm2, %v15800_v47  ;;  %3294 = vst.msk [vmem:[#allocation2 + $0x168] sm:$0xff] %vm3247_vm3, %v18736_v35  ;;  %3295 = vst.msk [vmem:[#allocation2 + $0x170] sm:$0xff] %vm3247_vm3, %v18736_v35 }
 0x20d   : > { %3297 = vst.msk [vmem:[#allocation2 + $0x180] sm:$0xff] %vm3247_vm3, %v18736_v35  ;;  %3298 = vst.msk [vmem:[#allocation2 + $0x188] sm:$0xff] %vm3247_vm3, %v18736_v35 }
 0x20e   : > { %3300 = vst.msk [vmem:[#allocation2 + $0x198] sm:$0xff] %vm3247_vm3, %v18736_v35  ;;  %3301 = vst.msk [vmem:[#allocation2 + $0x1a0] sm:$0xff] %vm3247_vm3, %v18736_v35 }
 0x20f   : > { %3847 = vst.msk [vmem:[#allocation3] sm:$0xff] %vm3247_vm3, %v18736_v35  ;;  %3849 = vst.msk [vmem:[#allocation3 + $0x10] sm:$0xff] %vm3247_vm3, %v18736_v35 }
 0x210   : > { %3851 = vst.msk [vmem:[#allocation3 + $0x20] sm:$0xff] %vm3247_vm3, %v18736_v35  ;;  %3853 = vst.msk [vmem:[#allocation3 + $0x30] sm:$0xff] %vm3247_vm3, %v18736_v35 }
 0x211   : > { %3855 = vst.msk [vmem:[#allocation3 + $0x40] sm:$0xff] %vm3247_vm3, %v18736_v35  ;;  %3857 = vst.msk [vmem:[#allocation3 + $0x50] sm:$0xff] %vm3247_vm3, %v18736_v35 }
 0x212   : > { %3859 = vst.msk [vmem:[#allocation3 + $0x60] sm:$0xff] %vm3247_vm3, %v18736_v35  ;;  %3861 = vst.msk [vmem:[#allocation3 + $0x70] sm:$0xff] %vm3247_vm3, %v18736_v35 }
 0x213   : > { %13389 = vmatmul.mubr.msk.bf16.gmra.mrb[20].mxu0 %vm687_vm2, %v15810_v52  ;;  %3863 = vst.msk [vmem:[#allocation3 + $0x80] sm:$0xff] %vm3247_vm3, %v18736_v35  ;;  %3865 = vst.msk [vmem:[#allocation3 + $0x90] sm:$0xff] %vm3247_vm3, %v18736_v35 }
 0x214   : > { %13392 = vmatprep.mubr.msk.bf16.mxu0 %vm687_vm2, %v15812_v53  ;;  %3257 = vst.msk [vmem:[#allocation2 + $0x40] sm:$0x3] %vm3250_vm4, %v18736_v35  ;;  %3251 = vst.msk [vmem:[#allocation2 + $0x10] sm:$0x3] %vm3250_vm4, %v18736_v35 }
 0x215   : > { %3254 = vst.msk [vmem:[#allocation2 + $0x28] sm:$0x3] %vm3250_vm4, %v18736_v35  ;;  %3260 = vst.msk [vmem:[#allocation2 + $0x58] sm:$0x3] %vm3250_vm4, %v18736_v35 }
 0x216   : > { %3263 = vst.msk [vmem:[#allocation2 + $0x70] sm:$0x3] %vm3250_vm4, %v18736_v35  ;;  %3266 = vst.msk [vmem:[#allocation2 + $0x88] sm:$0x3] %vm3250_vm4, %v18736_v35 }
 0x217   : > { %3269 = vst.msk [vmem:[#allocation2 + $0xa0] sm:$0x3] %vm3250_vm4, %v18736_v35  ;;  %3272 = vst.msk [vmem:[#allocation2 + $0xb8] sm:$0x3] %vm3250_vm4, %v18736_v35 }
 0x218   : > { %3275 = vst.msk [vmem:[#allocation2 + $0xd0] sm:$0x3] %vm3250_vm4, %v18736_v35  ;;  %3278 = vst.msk [vmem:[#allocation2 + $0xe8] sm:$0x3] %vm3250_vm4, %v18736_v35 }
 0x219   : > { %3281 = vst.msk [vmem:[#allocation2 + $0x100] sm:$0x3] %vm3250_vm4, %v18736_v35  ;;  %3284 = vst.msk [vmem:[#allocation2 + $0x118] sm:$0x3] %vm3250_vm4, %v18736_v35 }
 0x21a   : > { %3287 = vst.msk [vmem:[#allocation2 + $0x130] sm:$0x3] %vm3250_vm4, %v18736_v35  ;;  %3290 = vst.msk [vmem:[#allocation2 + $0x148] sm:$0x3] %vm3250_vm4, %v18736_v35 }
 0x21b   : > { %13393 = vmatmul.mubr.msk.bf16.gmra.mrb[24].mxu0 %vm687_vm2, %v15822_v58  ;;  %3293 = vst.msk [vmem:[#allocation2 + $0x160] sm:$0x3] %vm3250_vm4, %v18736_v35  ;;  %3296 = vst.msk [vmem:[#allocation2 + $0x178] sm:$0x3] %vm3250_vm4, %v18736_v35 }
 0x21c   : > { %13396 = vmatprep.mubr.msk.bf16.mxu0 %vm687_vm2, %v16099_v56  ;;  %3299 = vst.msk [vmem:[#allocation2 + $0x190] sm:$0x3] %vm3250_vm4, %v18736_v35  ;;  %3302 = vst.msk [vmem:[#allocation2 + $0x1a8] sm:$0x3] %vm3250_vm4, %v18736_v35 }
 0x21d   : > { %3848 = vst.msk [vmem:[#allocation3 + $0x8] sm:$0x3] %vm3250_vm4, %v18736_v35  ;;  %3850 = vst.msk [vmem:[#allocation3 + $0x18] sm:$0x3] %vm3250_vm4, %v18736_v35 }
 0x21e   : > { %3852 = vst.msk [vmem:[#allocation3 + $0x28] sm:$0x3] %vm3250_vm4, %v18736_v35  ;;  %3854 = vst.msk [vmem:[#allocation3 + $0x38] sm:$0x3] %vm3250_vm4, %v18736_v35 }
 0x21f   : > { %3856 = vst.msk [vmem:[#allocation3 + $0x48] sm:$0x3] %vm3250_vm4, %v18736_v35  ;;  %3858 = vst.msk [vmem:[#allocation3 + $0x58] sm:$0x3] %vm3250_vm4, %v18736_v35 }
 0x220   : > { %3860 = vst.msk [vmem:[#allocation3 + $0x68] sm:$0x3] %vm3250_vm4, %v18736_v35  ;;  %3862 = vst.msk [vmem:[#allocation3 + $0x78] sm:$0x3] %vm3250_vm4, %v18736_v35 }
 0x221   : > { %3864 = vst.msk [vmem:[#allocation3 + $0x88] sm:$0x3] %vm3250_vm4, %v18736_v35  ;;  %3866 = vst.msk [vmem:[#allocation3 + $0x98] sm:$0x3] %vm3250_vm4, %v18736_v35 }
 0x222   : > { %5162 = vst.msk [vmem:[#allocation4 + $0x20] sm:$0xff] %vm5156_vm7, %v18736_v35  ;;  %5157 = vst.msk [vmem:[#allocation4] sm:$0xff] %vm5156_vm7, %v18736_v35 }
 0x223   : > { %13397 = vmatmul.mubr.msk.bf16.gmra.mrb[28].mxu0 %vm687_vm2, %v2635_v23  ;;  %5163 = vst.msk [vmem:[#allocation4 + $0x28] sm:$0x3] %vm5159_vm8, %v18736_v35  ;;  %5160 = vst.msk [vmem:[#allocation4 + $0x10] sm:$0x3] %vm5159_vm8, %v18736_v35 }
 0x224   : > { %13402 = vmatprep.mubr.msk.bf16.mxu0 %vm687_vm2, %v15937_v8  ;;  %5158 = vst.msk [vmem:[#allocation4 + $0x8] sm:$0xff] %vm5156_vm7, %v18736_v35  ;;  %5161 = vst.msk [vmem:[#allocation4 + $0x18] sm:$0xff] %vm5156_vm7, %v18736_v35 }
 0x225   : > { %5164 = vst.msk [vmem:[#allocation4 + $0x30] sm:$0xff] %vm5156_vm7, %v18736_v35  ;;  %5165 = vst.msk [vmem:[#allocation4 + $0x38] sm:$0xff] %vm5156_vm7, %v18736_v35 }
 0x226   : > { %5166 = vst.msk [vmem:[#allocation4 + $0x40] sm:$0x3] %vm5159_vm8, %v18736_v35  ;;  %5169 = vst.msk [vmem:[#allocation4 + $0x58] sm:$0x3] %vm5159_vm8, %v18736_v35 }
 0x227   : > { %5167 = vst.msk [vmem:[#allocation4 + $0x48] sm:$0xff] %vm5156_vm7, %v18736_v35  ;;  %5168 = vst.msk [vmem:[#allocation4 + $0x50] sm:$0xff] %vm5156_vm7, %v18736_v35 }
 0x228   : > { %5170 = vst.msk [vmem:[#allocation4 + $0x60] sm:$0xff] %vm5156_vm7, %v18736_v35  ;;  %5171 = vst.msk [vmem:[#allocation4 + $0x68] sm:$0xff] %vm5156_vm7, %v18736_v35 }
 0x229   : > { %5172 = vst.msk [vmem:[#allocation4 + $0x70] sm:$0x3] %vm5159_vm8, %v18736_v35  ;;  %5175 = vst.msk [vmem:[#allocation4 + $0x88] sm:$0x3] %vm5159_vm8, %v18736_v35 }
 0x22a   : > { %5173 = vst.msk [vmem:[#allocation4 + $0x78] sm:$0xff] %vm5156_vm7, %v18736_v35  ;;  %5174 = vst.msk [vmem:[#allocation4 + $0x80] sm:$0xff] %vm5156_vm7, %v18736_v35 }
 0x22b   : > { %13403 = vmatmul.mubr.msk.bf16.vlgmr.msra.gmra.mrb[0].mxu0 %vm687_vm2, %v15949_v20  ;;  %5176 = vst.msk [vmem:[#allocation4 + $0x90] sm:$0xff] %vm5156_vm7, %v18736_v35  ;;  %5177 = vst.msk [vmem:[#allocation4 + $0x98] sm:$0xff] %vm5156_vm7, %v18736_v35 }
 0x22c   : > { %13406 = vmatprep.mubr.msk.bf16.mxu0 %vm687_vm2, %v15951_v21  ;;  %5178 = vst.msk [vmem:[#allocation4 + $0xa0] sm:$0x3] %vm5159_vm8, %v18736_v35  ;;  %5181 = vst.msk [vmem:[#allocation4 + $0xb8] sm:$0x3] %vm5159_vm8, %v18736_v35 }
 0x22d   : > { %5179 = vst.msk [vmem:[#allocation4 + $0xa8] sm:$0xff] %vm5156_vm7, %v18736_v35  ;;  %5180 = vst.msk [vmem:[#allocation4 + $0xb0] sm:$0xff] %vm5156_vm7, %v18736_v35 }
 0x22e   : > { %5182 = vst.msk [vmem:[#allocation4 + $0xc0] sm:$0xff] %vm5156_vm7, %v18736_v35  ;;  %5183 = vst.msk [vmem:[#allocation4 + $0xc8] sm:$0xff] %vm5156_vm7, %v18736_v35 }
 0x22f   : > { %5184 = vst.msk [vmem:[#allocation4 + $0xd0] sm:$0x3] %vm5159_vm8, %v18736_v35  ;;  %5187 = vst.msk [vmem:[#allocation4 + $0xe8] sm:$0x3] %vm5159_vm8, %v18736_v35 }
 0x230   : > { %5185 = vst.msk [vmem:[#allocation4 + $0xd8] sm:$0xff] %vm5156_vm7, %v18736_v35  ;;  %5186 = vst.msk [vmem:[#allocation4 + $0xe0] sm:$0xff] %vm5156_vm7, %v18736_v35 }
 0x231   : > { %5188 = vst.msk [vmem:[#allocation4 + $0xf0] sm:$0xff] %vm5156_vm7, %v18736_v35  ;;  %5189 = vst.msk [vmem:[#allocation4 + $0xf8] sm:$0xff] %vm5156_vm7, %v18736_v35 }
 0x232   : > { %5190 = vst.msk [vmem:[#allocation4 + $0x100] sm:$0x3] %vm5159_vm8, %v18736_v35  ;;  %5193 = vst.msk [vmem:[#allocation4 + $0x118] sm:$0x3] %vm5159_vm8, %v18736_v35 }
 0x233   : > { %13407 = vmatmul.mubr.msk.bf16.gmra.mrb[4].mxu0 %vm687_vm2, %v15961_v31  ;;  %5191 = vst.msk [vmem:[#allocation4 + $0x108] sm:$0xff] %vm5156_vm7, %v18736_v35  ;;  %5192 = vst.msk [vmem:[#allocation4 + $0x110] sm:$0xff] %vm5156_vm7, %v18736_v35 }
 0x234   : > { %13410 = vmatprep.mubr.msk.bf16.mxu0 %vm687_vm2, %v15963_v32  ;;  %5194 = vst.msk [vmem:[#allocation4 + $0x120] sm:$0xff] %vm5156_vm7, %v18736_v35  ;;  %5195 = vst.msk [vmem:[#allocation4 + $0x128] sm:$0xff] %vm5156_vm7, %v18736_v35 }
 0x235   : > { %5196 = vst.msk [vmem:[#allocation4 + $0x130] sm:$0x3] %vm5159_vm8, %v18736_v35  ;;  %5199 = vst.msk [vmem:[#allocation4 + $0x148] sm:$0x3] %vm5159_vm8, %v18736_v35 }
 0x236   : > { %5197 = vst.msk [vmem:[#allocation4 + $0x138] sm:$0xff] %vm5156_vm7, %v18736_v35  ;;  %5198 = vst.msk [vmem:[#allocation4 + $0x140] sm:$0xff] %vm5156_vm7, %v18736_v35 }
 0x237   : > { %5200 = vst.msk [vmem:[#allocation4 + $0x150] sm:$0xff] %vm5156_vm7, %v18736_v35  ;;  %5201 = vst.msk [vmem:[#allocation4 + $0x158] sm:$0xff] %vm5156_vm7, %v18736_v35 }
 0x238   : > { %5202 = vst.msk [vmem:[#allocation4 + $0x160] sm:$0x3] %vm5159_vm8, %v18736_v35  ;;  %5205 = vst.msk [vmem:[#allocation4 + $0x178] sm:$0x3] %vm5159_vm8, %v18736_v35 }
 0x239   : > { %5203 = vst.msk [vmem:[#allocation4 + $0x168] sm:$0xff] %vm5156_vm7, %v18736_v35  ;;  %5204 = vst.msk [vmem:[#allocation4 + $0x170] sm:$0xff] %vm5156_vm7, %v18736_v35 }
 0x23a   : > { %5206 = vst.msk [vmem:[#allocation4 + $0x180] sm:$0xff] %vm5156_vm7, %v18736_v35  ;;  %5207 = vst.msk [vmem:[#allocation4 + $0x188] sm:$0xff] %vm5156_vm7, %v18736_v35 }
 0x23b   : > { %13411 = vmatmul.mubr.msk.bf16.gmra.mrb[8].mxu0 %vm687_vm2, %v15973_v45  ;;  %5208 = vst.msk [vmem:[#allocation4 + $0x190] sm:$0x3] %vm5159_vm8, %v18736_v35  ;;  %5211 = vst.msk [vmem:[#allocation4 + $0x1a8] sm:$0x3] %vm5159_vm8, %v18736_v35 }
 0x23c   : > { %13414 = vmatprep.mubr.msk.bf16.mxu0 %vm687_vm2, %v15975_v48  ;;  %5209 = vst.msk [vmem:[#allocation4 + $0x198] sm:$0xff] %vm5156_vm7, %v18736_v35  ;;  %5210 = vst.msk [vmem:[#allocation4 + $0x1a0] sm:$0xff] %vm5156_vm7, %v18736_v35 }
 0x243   : > { %13415 = vmatmul.mubr.msk.bf16.gmra.mrb[12].mxu0 %vm687_vm2, %v15985_v57 }
 0x244   : > { %13418 = vmatprep.mubr.msk.bf16.mxu0 %vm687_vm2, %v15987_v59 }
 0x24b   : > { %13419 = vmatmul.mubr.msk.bf16.gmra.mrb[16].mxu0 %vm687_vm2, %v15997_v5 }
 0x24c   : > { %13422 = vmatprep.mubr.msk.bf16.mxu0 %vm687_vm2, %v15999_v6 }
 0x253   : > { %13423 = vmatmul.mubr.msk.bf16.gmra.mrb[20].mxu0 %vm687_vm2, %v16009_v24 }
 0x254   : > { %13426 = vmatprep.mubr.msk.bf16.mxu0 %vm687_vm2, %v16011_v3 }
 0x25b   : > { %13427 = vmatmul.mubr.msk.bf16.gmra.mrb[24].mxu0 %vm687_vm2, %v16019_v37 }
 0x25c   : > { %13430 = vmatprep.mubr.msk.bf16.mxu0 %vm687_vm2, %v2046_v0 }
 0x263   : > { %13431 = vmatmul.mubr.msk.bf16.gmra.mrb[28].mxu0 %vm687_vm2, %v2929_v34 }
 0x2fe   : > { %v13404_v46 = vpop.f32.mrb[0].mxu0 }
 0x2ff   : > { %v3185_v47 = vadd.f32 %v13404_v46, %v16396_v41  ;;  %v3017_v52 = vpop.f32.mrb[1].mxu0 }
 0x300   : > { %v3183_v53 = vadd.f32 %v16396_v41, %v3017_v52  ;;  %v13405_v58 = vpop.f32.mrb[2].mxu0 }
 0x301   : > { %v3217_v10 = vmax.f32 %v3185_v47, 0.0  ;;  %v3186_v17 = vadd.f32 %v13405_v58, %v16396_v41  ;;  %v3020_v18 = vpop.f32.mrb[3].mxu0 }
 0x302   : > { %v3215_v25 = vmax.f32 %v3183_v53, 0.0  ;;  %v3184_v26 = vadd.f32 %v16396_v41, %v3020_v18 }
 0x303   : > { %3306 = vst.msk [vmem:[#allocation2 + $0x31] sm:$0xff] %vm3247_vm3, %v3217_v10  ;;  %v3218_v33 = vmax.f32 %v3186_v17, 0.0 }
 0x304   : > { %3304 = vst.msk [vmem:[#allocation2 + $0x19] sm:$0xff] %vm3247_vm3, %v3215_v25  ;;  %v3216_v36 = vmax.f32 %v3184_v26, 0.0 }
 0x305   : > { %3307 = vst.msk [vmem:[#allocation2 + $0x39] sm:$0xff] %vm3247_vm3, %v3218_v33  ;;  %v16405_v43 = vpack.c.bf16 %v3218_v33, %v3217_v10 }
 0x306   : > { %3305 = vst.msk [vmem:[#allocation2 + $0x21] sm:$0xff] %vm3247_vm3, %v3216_v36  ;;  %v16408_v44 = vpack.c.bf16 %v3216_v36, %v3215_v25  ;;  %v13408_v51 = vpop.f32.mrb[4].mxu0 }
 0x307   : > { %v3189_v54 = vadd.f32 %v13408_v51, %v16396_v41  ;;  %v3033_v60 = vpop.f32.mrb[5].mxu0 }
 0x308   : > { %v3187_v8 = vadd.f32 %v16396_v41, %v3033_v60  ;;  %v13409_v20 = vpop.f32.mrb[6].mxu0 }
 0x309   : > { %v3221_v21 = vmax.f32 %v3189_v54, 0.0  ;;  %v3190_v31 = vadd.f32 %v13409_v20, %v16396_v41  ;;  %v3036_v32 = vpop.f32.mrb[7].mxu0 }
 0x30a   : > { %v3219_v45 = vmax.f32 %v3187_v8, 0.0  ;;  %v3188_v48 = vadd.f32 %v16396_v41, %v3036_v32 }
 0x30b   : > { %3310 = vst.msk [vmem:[#allocation2 + $0x61] sm:$0xff] %vm3247_vm3, %v3221_v21  ;;  %v3222_v57 = vmax.f32 %v3190_v31, 0.0 }
 0x30c   : > { %3308 = vst.msk [vmem:[#allocation2 + $0x49] sm:$0xff] %vm3247_vm3, %v3219_v45  ;;  %v3220_v59 = vmax.f32 %v3188_v48, 0.0 }
 0x30d   : > { %3311 = vst.msk [vmem:[#allocation2 + $0x69] sm:$0xff] %vm3247_vm3, %v3222_v57  ;;  %v16417_v5 = vpack.c.bf16 %v3222_v57, %v3221_v21 }
 0x30e   : > { %3309 = vst.msk [vmem:[#allocation2 + $0x51] sm:$0xff] %vm3247_vm3, %v3220_v59  ;;  %v16420_v6 = vpack.c.bf16 %v3220_v59, %v3219_v45  ;;  %v13412_v14 = vpop.f32.mrb[8].mxu0 }
 0x30f   : > { %v3193_v19 = vadd.f32 %v13412_v14, %v16396_v41  ;;  %v3049_v24 = vpop.f32.mrb[9].mxu0 }
 0x310   : > { %v3191_v3 = vadd.f32 %v16396_v41, %v3049_v24  ;;  %v13413_v27 = vpop.f32.mrb[10].mxu0 }
 0x311   : > { %v3225_v30 = vmax.f32 %v3193_v19, 0.0  ;;  %v3194_v37 = vadd.f32 %v13413_v27, %v16396_v41  ;;  %v3052_v38 = vpop.f32.mrb[11].mxu0 }
 0x312   : > { %v3223_v39 = vmax.f32 %v3191_v3, 0.0  ;;  %v3192_v1 = vadd.f32 %v16396_v41, %v3052_v38 }
 0x313   : > { %3314 = vst.msk [vmem:[#allocation2 + $0x91] sm:$0xff] %vm3247_vm3, %v3225_v30  ;;  %v3226_v11 = vmax.f32 %v3194_v37, 0.0 }
 0x314   : > { %3312 = vst.msk [vmem:[#allocation2 + $0x79] sm:$0xff] %vm3247_vm3, %v3223_v39  ;;  %v3224_v42 = vmax.f32 %v3192_v1, 0.0 }
 0x315   : > { %3315 = vst.msk [vmem:[#allocation2 + $0x99] sm:$0xff] %vm3247_vm3, %v3226_v11  ;;  %v16429_v49 = vpack.c.bf16 %v3226_v11, %v3225_v30 }
 0x316   : > { %3313 = vst.msk [vmem:[#allocation2 + $0x81] sm:$0xff] %vm3247_vm3, %v3224_v42  ;;  %v16432_v50 = vpack.c.bf16 %v3224_v42, %v3223_v39  ;;  %v13416_v15 = vpop.f32.mrb[12].mxu0 }
 0x317   : > { %v3197_v55 = vadd.f32 %v13416_v15, %v16396_v41  ;;  %v3065_v56 = vpop.f32.mrb[13].mxu0 }
 0x318   : > { %v3195_v61 = vadd.f32 %v16396_v41, %v3065_v56  ;;  %v13417_v62 = vpop.f32.mrb[14].mxu0 }
 0x319   : > { %v3229_v7 = vmax.f32 %v3197_v55, 0.0  ;;  %v3198_v63 = vadd.f32 %v13417_v62, %v16396_v41  ;;  %v3068_v0 = vpop.f32.mrb[15].mxu0 }
 0x31a   : > { %v3227_v12 = vmax.f32 %v3195_v61, 0.0  ;;  %v3196_v13 = vadd.f32 %v16396_v41, %v3068_v0 }
 0x31b   : > { %3318 = vst.msk [vmem:[#allocation2 + $0xc1] sm:$0xff] %vm3247_vm3, %v3229_v7  ;;  %v3230_v4 = vmax.f32 %v3198_v63, 0.0 }
 0x31c   : > { %3316 = vst.msk [vmem:[#allocation2 + $0xa9] sm:$0xff] %vm3247_vm3, %v3227_v12  ;;  %v3228_v2 = vmax.f32 %v3196_v13, 0.0 }
 0x31d   : > { %3319 = vst.msk [vmem:[#allocation2 + $0xc9] sm:$0xff] %vm3247_vm3, %v3230_v4  ;;  %v16441_v9 = vpack.c.bf16 %v3230_v4, %v3229_v7 }
 0x31e   : > { %3317 = vst.msk [vmem:[#allocation2 + $0xb1] sm:$0xff] %vm3247_vm3, %v3228_v2  ;;  %v16444_v16 = vpack.c.bf16 %v3228_v2, %v3227_v12  ;;  %v13420_v22 = vpop.f32.mrb[16].mxu0 }
 0x31f   : > { %v3201_v23 = vadd.f32 %v13420_v22, %v16396_v41  ;;  %v3081_v28 = vpop.f32.mrb[17].mxu0 }
 0x320   : > { %v3199_v29 = vadd.f32 %v16396_v41, %v3081_v28  ;;  %v13421_v34 = vpop.f32.mrb[18].mxu0  ;;  %v3339_v28 = vld [vmem:[%s18751_s21 + $0x18] sm:$0xff] }
 0x321   : > { %v3233_v40 = vmax.f32 %v3201_v23, 0.0  ;;  %v3202_v46 = vadd.f32 %v13421_v34, %v16396_v41  ;;  %v3084_v47 = vpop.f32.mrb[19].mxu0  ;;  %v3341_v34 = vld [vmem:[%s18751_s21 + $0x28] sm:$0xff] }
 0x322   : > { %v3231_v52 = vmax.f32 %v3199_v29, 0.0  ;;  %v3200_v53 = vadd.f32 %v16396_v41, %v3084_v47  ;;  %v3338_v29 = vld [vmem:[%s18751_s21 + $0x10] sm:$0xff] }
 0x323   : > { %3322 = vst.msk [vmem:[#allocation2 + $0xf1] sm:$0xff] %vm3247_vm3, %v3233_v40  ;;  %v3234_v58 = vmax.f32 %v3202_v46, 0.0  ;;  %v3343_v46 = vld [vmem:[%s18751_s21 + $0x38] sm:$0xff]  ;;  %v3342_v47 = vld [vmem:[%s18751_s21 + $0x30] sm:$0xff] }
 0x324   : > { %3320 = vst.msk [vmem:[#allocation2 + $0xd9] sm:$0xff] %vm3247_vm3, %v3231_v52  ;;  %v3232_v10 = vmax.f32 %v3200_v53, 0.0  ;;  %v3344_v53 = vld [vmem:[%s18751_s21 + $0x40] sm:$0xff] }
 0x325   : > { %3323 = vst.msk [vmem:[#allocation2 + $0xf9] sm:$0xff] %vm3247_vm3, %v3234_v58  ;;  %v16453_v17 = vpack.c.bf16 %v3234_v58, %v3233_v40  ;;  %v3340_v40 = vld [vmem:[%s18751_s21 + $0x20] sm:$0xff]  ;;  %v3347_v58 = vld [vmem:[%s18751_s21 + $0x58] sm:$0xff] }
 0x326   : > { %3321 = vst.msk [vmem:[#allocation2 + $0xe1] sm:$0xff] %vm3247_vm3, %v3232_v10  ;;  %v16456_v18 = vpack.c.bf16 %v3232_v10, %v3231_v52  ;;  %v13424_v25 = vpop.f32.mrb[20].mxu0  ;;  %v3345_v52 = vld [vmem:[%s18751_s21 + $0x48] sm:$0xff]  ;;  %v3346_v10 = vld [vmem:[%s18751_s21 + $0x50] sm:$0xff] }
 0x327   : > { %v3205_v26 = vadd.f32 %v13424_v25, %v16396_v41  ;;  %v3097_v33 = vpop.f32.mrb[21].mxu0  ;;  %v3349_v25 = vld [vmem:[%s18751_s21 + $0x68] sm:$0xff] }
 0x328   : > { %v3203_v36 = vadd.f32 %v16396_v41, %v3097_v33  ;;  %v13425_v51 = vpop.f32.mrb[22].mxu0  ;;  %14249 = vmatprep.subr.bf16.mxu1 %v16456_v18  ;;  %v3351_v33 = vld [vmem:[%s18751_s21 + $0x78] sm:$0xff] }
 0x329   : > { %v3237_v54 = vmax.f32 %v3205_v26, 0.0  ;;  %v3206_v60 = vadd.f32 %v13425_v51, %v16396_v41  ;;  %v3100_v8 = vpop.f32.mrb[23].mxu0  ;;  %14251 = vmatpush3.bf16.msra.mxu1 %v16408_v44  ;;  %v3348_v26 = vld [vmem:[%s18751_s21 + $0x60] sm:$0xff]  ;;  %v11829_v51 = vld [vmem:[%s18751_s21 + $0x88] sm:$0xff] }
 0x32a   : > { %v3235_v20 = vmax.f32 %v3203_v36, 0.0  ;;  %v3204_v21 = vadd.f32 %v16396_v41, %v3100_v8  ;;  %14253 = vmatprep.subr.bf16.mxu1 %v16453_v17  ;;  %v3350_v36 = vld [vmem:[%s18751_s21 + $0x70] sm:$0xff] }
 0x32b   : > { %3326 = vst.msk [vmem:[#allocation2 + $0x121] sm:$0xff] %vm3247_vm3, %v3237_v54  ;;  %v3238_v31 = vmax.f32 %v3206_v60, 0.0  ;;  %v11831_v60 = vld [vmem:[%s18751_s21 + $0x98] sm:$0xff]  ;;  %v11830_v8 = vld [vmem:[%s18751_s21 + $0x90] sm:$0xff] }
 0x32c   : > { %3324 = vst.msk [vmem:[#allocation2 + $0x109] sm:$0xff] %vm3247_vm3, %v3235_v20  ;;  %v3236_v32 = vmax.f32 %v3204_v21, 0.0  ;;  %v11832_v21 = vld [vmem:[%s18751_s21 + $0xa0] sm:$0xff] }
 0x32d   : > { %3327 = vst.msk [vmem:[#allocation2 + $0x129] sm:$0xff] %vm3247_vm3, %v3238_v31  ;;  %v16468_v45 = vpack.c.bf16 %v3238_v31, %v3237_v54  ;;  %14255 = vmatpush3.bf16.msra.mxu1 %v16405_v43  ;;  %v11828_v54 = vld [vmem:[%s18751_s21 + $0x80] sm:$0xff]  ;;  %v11835_v31 = vld [vmem:[%s18751_s21 + $0xb8] sm:$0xff] }
 0x32e   : > { %3325 = vst.msk [vmem:[#allocation2 + $0x111] sm:$0xff] %vm3247_vm3, %v3236_v32  ;;  %v16472_v48 = vpack.c.bf16 %v3236_v32, %v3235_v20  ;;  %v13428_v57 = vpop.f32.mrb[24].mxu0  ;;  %v11833_v20 = vld [vmem:[%s18751_s21 + $0xa8] sm:$0xff]  ;;  %v11834_v32 = vld [vmem:[%s18751_s21 + $0xb0] sm:$0xff] }
 0x32f   : > { %v3209_v59 = vadd.f32 %v13428_v57, %v16396_v41  ;;  %v3113_v14 = vpop.f32.mrb[25].mxu0  ;;  %v11837_v57 = vld [vmem:[%s18751_s21 + $0xc8] sm:$0xff] }
 0x330   : > { %v3207_v19 = vadd.f32 %v16396_v41, %v3113_v14  ;;  %v13429_v24 = vpop.f32.mrb[26].mxu0  ;;  %14257 = vmatprep.subr.bf16.mxu1 %v16472_v48  ;;  %v11839_v14 = vld [vmem:[%s18751_s21 + $0xd8] sm:$0xff] }
 0x331   : > { %v3241_v3 = vmax.f32 %v3209_v59, 0.0  ;;  %v3210_v27 = vadd.f32 %v13429_v24, %v16396_v41  ;;  %v3116_v30 = vpop.f32.mrb[27].mxu0  ;;  %14259 = vmatpush3.bf16.msra.mxu1 %v16420_v6  ;;  %v11836_v59 = vld [vmem:[%s18751_s21 + $0xc0] sm:$0xff]  ;;  %v11841_v24 = vld [vmem:[%s18751_s21 + $0xe8] sm:$0xff] }
 0x332   : > { %v3239_v37 = vmax.f32 %v3207_v19, 0.0  ;;  %v3208_v38 = vadd.f32 %v16396_v41, %v3116_v30  ;;  %14261 = vmatprep.subr.bf16.mxu1 %v16468_v45  ;;  %v11838_v19 = vld [vmem:[%s18751_s21 + $0xd0] sm:$0xff] }
 0x333   : > { %3330 = vst.msk [vmem:[#allocation2 + $0x151] sm:$0xff] %vm3247_vm3, %v3241_v3  ;;  %v3242_v39 = vmax.f32 %v3210_v27, 0.0  ;;  %v11843_v27 = vld [vmem:[%s18751_s21 + $0xf8] sm:$0xff]  ;;  %v11842_v30 = vld [vmem:[%s18751_s21 + $0xf0] sm:$0xff] }
 0x334   : > { %3328 = vst.msk [vmem:[#allocation2 + $0x139] sm:$0xff] %vm3247_vm3, %v3239_v37  ;;  %v3240_v1 = vmax.f32 %v3208_v38, 0.0  ;;  %v11844_v38 = vld [vmem:[%s18751_s21 + $0x100] sm:$0xff] }
 0x335   : > { %3331 = vst.msk [vmem:[#allocation2 + $0x159] sm:$0xff] %vm3247_vm3, %v3242_v39  ;;  %v16484_v11 = vpack.c.bf16 %v3242_v39, %v3241_v3  ;;  %14263 = vmatpush3.bf16.msra.mxu1 %v16417_v5  ;;  %v11840_v3 = vld [vmem:[%s18751_s21 + $0xe0] sm:$0xff]  ;;  %v11847_v39 = vld [vmem:[%s18751_s21 + $0x118] sm:$0xff] }
 0x336   : > { %3329 = vst.msk [vmem:[#allocation2 + $0x141] sm:$0xff] %vm3247_vm3, %v3240_v1  ;;  %v16488_v42 = vpack.c.bf16 %v3240_v1, %v3239_v37  ;;  %v13432_v15 = vpop.f32.mrb[28].mxu0  ;;  %v11845_v37 = vld [vmem:[%s18751_s21 + $0x108] sm:$0xff]  ;;  %v11846_v1 = vld [vmem:[%s18751_s21 + $0x110] sm:$0xff] }
 0x337   : > { %v3213_v55 = vadd.f32 %v13432_v15, %v16396_v41  ;;  %v3129_v56 = vpop.f32.mrb[29].mxu0  ;;  %v11849_v15 = vld [vmem:[%s18751_s21 + $0x128] sm:$0xff] }
 0x338   : > { %v3211_v61 = vadd.f32 %v16396_v41, %v3129_v56  ;;  %v13433_v62 = vpop.f32.mrb[30].mxu0  ;;  %14265 = vmatprep.subr.bf16.mxu1 %v16488_v42  ;;  %v11862_v56 = vld [vmem:[%s18751_s21 + $0x190] sm:$0xff] }
 0x339   : > { %v3245_v7 = vmax.f32 %v3213_v55, 0.0  ;;  %v3214_v63 = vadd.f32 %v13433_v62, %v16396_v41  ;;  %v3132_v0 = vpop.f32.mrb[31].mxu0  ;;  %14267 = vmatpush3.bf16.msra.mxu1 %v16432_v50  ;;  %v11860_v55 = vld [vmem:[%s18751_s21 + $0x180] sm:$0xff]  ;;  %v11867_v62 = vld [vmem:[%s18751_s21 + $0x1b8] sm:$0xff] }
 0x33a   : > { %v3243_v12 = vmax.f32 %v3211_v61, 0.0  ;;  %v3212_v13 = vadd.f32 %v16396_v41, %v3132_v0  ;;  %14269 = vmatprep.subr.bf16.mxu1 %v16484_v11  ;;  %v3336_v41 = vld [vmem:[%s18751_s21] sm:$0xff]  ;;  %v11865_v61 = vld [vmem:[%s18751_s21 + $0x1a8] sm:$0xff] }
 0x33b   : > { %3334 = vst.msk [vmem:[#allocation2 + $0x181] sm:$0xff] %vm3247_vm3, %v3245_v7  ;;  %v3246_v4 = vmax.f32 %v3214_v63, 0.0  ;;  %v11869_v63 = vld [vmem:[%s18751_s21 + $0x1c8] sm:$0xff]  ;;  %v11868_v0 = vld [vmem:[%s18751_s21 + $0x1c0] sm:$0xff] }
 0x33c   : > { %3332 = vst.msk [vmem:[#allocation2 + $0x169] sm:$0xff] %vm3247_vm3, %v3243_v12  ;;  %v3244_v2 = vmax.f32 %v3212_v13, 0.0  ;;  %v11870_v13 = vld [vmem:[%s18751_s21 + $0x1d0] sm:$0xff] }
 0x33d   : > { %3335 = vst.msk [vmem:[#allocation2 + $0x189] sm:$0xff] %vm3247_vm3, %v3246_v4  ;;  %v16500_v22 = vpack.c.bf16 %v3246_v4, %v3245_v7  ;;  %14271 = vmatpush3.bf16.msra.mxu1 %v16429_v49  ;;  %v11866_v7 = vld [vmem:[%s18751_s21 + $0x1b0] sm:$0xff]  ;;  %v11873_v4 = vld [vmem:[%s18751_s21 + $0x1e8] sm:$0xff] }
 0x33e   : > { %3333 = vst.msk [vmem:[#allocation2 + $0x171] sm:$0xff] %vm3247_vm3, %v3244_v2  ;;  %v16504_v23 = vpack.c.bf16 %v3244_v2, %v3243_v12  ;;  %v11871_v12 = vld [vmem:[%s18751_s21 + $0x1d8] sm:$0xff]  ;;  %v11872_v2 = vld [vmem:[%s18751_s21 + $0x1e0] sm:$0xff] }
 0x340   : > { %14273 = vmatprep.subr.bf16.mxu1 %v16504_v23 }
 0x341   : > { %14275 = vmatpush3.bf16.msra.mxu1 %v16444_v16 }
 0x342   : > { %14277 = vmatprep.subr.bf16.mxu1 %v16500_v22 }
 0x345   : > { %14279 = vmatpush3.bf16.msra.mxu1 %v16441_v9 }
 0x346   : > { %14281 = vmatprep.subr.bf16.mxu1 %v16456_v18 }
 0x348   : > { %3417 = vmatmul.mubr.f32.vlgmr.msra.gmra.mrb[0].mxu1 %v3336_v41  ;;  %v11876_v41 = vld [vmem:[%s18718_s6 + $0x4] sm:$0xf] }
 0x349   : > { %14283 = vmatpush3.bf16.msra.mxu1 %v16408_v44  ;;  %3421 = vmatprep.mubr.f32.mxu1 %v3339_v28  ;;  %v3917_v28 = vsel %vm3915_vm5, %v11876_v41, 0 }
 0x34a   : > { %14285 = vmatprep.subr.bf16.mxu1 %v16453_v17 }
 0x34c   : > { %3422 = vmatmul.mubr.f32.gmra.mrb[2].mxu1 %v3338_v29 }
 0x34d   : > { %14287 = vmatpush3.bf16.msra.mxu1 %v16405_v43  ;;  %3426 = vmatprep.mubr.f32.mxu1 %v3341_v34 }
 0x34e   : > { %14289 = vmatprep.subr.bf16.mxu1 %v16472_v48 }
 0x350   : > { %3427 = vmatmul.mubr.f32.gmra.mrb[4].mxu1 %v3340_v40 }
 0x351   : > { %14291 = vmatpush3.bf16.msra.mxu1 %v16420_v6  ;;  %3431 = vmatprep.mubr.f32.mxu1 %v3343_v46 }
 0x352   : > { %14293 = vmatprep.subr.bf16.mxu1 %v16468_v45 }
 0x354   : > { %3432 = vmatmul.mubr.f32.gmra.mrb[6].mxu1 %v3342_v47 }
 0x355   : > { %14295 = vmatpush3.bf16.msra.mxu1 %v16417_v5  ;;  %3436 = vmatprep.mubr.f32.mxu1 %v3345_v52 }
 0x356   : > { %14297 = vmatprep.subr.bf16.mxu1 %v16488_v42 }
 0x358   : > { %3437 = vmatmul.mubr.f32.gmra.mrb[8].mxu1 %v3344_v53 }
 0x359   : > { %14299 = vmatpush3.bf16.msra.mxu1 %v16432_v50  ;;  %3441 = vmatprep.mubr.f32.mxu1 %v3347_v58 }
 0x35a   : > { %14301 = vmatprep.subr.bf16.mxu1 %v16484_v11 }
 0x35c   : > { %3442 = vmatmul.mubr.f32.gmra.mrb[10].mxu1 %v3346_v10  ;;  %v16755_v10 = vld [vmem:[%s18718_s6] sm:$0xf] }
 0x35d   : > { %14303 = vmatpush3.bf16.msra.mxu1 %v16429_v49  ;;  %3446 = vmatprep.mubr.f32.mxu1 %v3349_v25 }
 0x35e   : > { %14305 = vmatprep.subr.bf16.mxu1 %v16504_v23 }
 0x360   : > { %3447 = vmatmul.mubr.f32.gmra.mrb[12].mxu1 %v3348_v26 }
 0x361   : > { %14307 = vmatpush3.bf16.msra.mxu1 %v16444_v16  ;;  %3451 = vmatprep.mubr.f32.mxu1 %v3351_v33 }
 0x362   : > { %14309 = vmatprep.subr.bf16.mxu1 %v16500_v22 }
 0x364   : > { %3452 = vmatmul.mubr.f32.gmra.mrb[14].mxu1 %v3350_v36 }
 0x365   : > { %14311 = vmatpush3.bf16.msra.mxu1 %v16441_v9  ;;  %3538 = vmatprep.mubr.f32.mxu1 %v11829_v51 }
 0x366   : > { %14313 = vmatprep.subr.bf16.mxu1 %v16456_v18 }
 0x368   : > { %3539 = vmatmul.mubr.f32.vlgmr.msra.gmra.mrb[16].mxu1 %v11828_v54 }
 0x369   : > { %14315 = vmatpush3.bf16.msra.mxu1 %v16408_v44  ;;  %3543 = vmatprep.mubr.f32.mxu1 %v11831_v60 }
 0x36a   : > { %14317 = vmatprep.subr.bf16.mxu1 %v16453_v17 }
 0x36c   : > { %3544 = vmatmul.mubr.f32.gmra.mrb[18].mxu1 %v11830_v8 }
 0x36d   : > { %14319 = vmatpush3.bf16.msra.mxu1 %v16405_v43  ;;  %3548 = vmatprep.mubr.f32.mxu1 %v11833_v20 }
 0x36e   : > { %14321 = vmatprep.subr.bf16.mxu1 %v16472_v48 }
 0x370   : > { %3549 = vmatmul.mubr.f32.gmra.mrb[20].mxu1 %v11832_v21 }
 0x371   : > { %14323 = vmatpush3.bf16.msra.mxu1 %v16420_v6  ;;  %3553 = vmatprep.mubr.f32.mxu1 %v11835_v31 }
 0x372   : > { %14325 = vmatprep.subr.bf16.mxu1 %v16468_v45 }
 0x374   : > { %3554 = vmatmul.mubr.f32.gmra.mrb[22].mxu1 %v11834_v32 }
 0x375   : > { %14327 = vmatpush3.bf16.msra.mxu1 %v16417_v5  ;;  %3558 = vmatprep.mubr.f32.mxu1 %v11837_v57 }
 0x376   : > { %14329 = vmatprep.subr.bf16.mxu1 %v16488_v42 }
 0x378   : > { %3559 = vmatmul.mubr.f32.gmra.mrb[24].mxu1 %v11836_v59 }
 0x379   : > { %14331 = vmatpush3.bf16.msra.mxu1 %v16432_v50  ;;  %3563 = vmatprep.mubr.f32.mxu1 %v11839_v14 }
 0x37a   : > { %14333 = vmatprep.subr.bf16.mxu1 %v16484_v11 }
 0x37c   : > { %3564 = vmatmul.mubr.f32.gmra.mrb[26].mxu1 %v11838_v19 }
 0x37d   : > { %14335 = vmatpush3.bf16.msra.mxu1 %v16429_v49  ;;  %3568 = vmatprep.mubr.f32.mxu1 %v11841_v24 }
 0x37e   : > { %14337 = vmatprep.subr.bf16.mxu1 %v16504_v23 }
 0x380   : > { %3569 = vmatmul.mubr.f32.gmra.mrb[28].mxu1 %v11840_v3 }
 0x381   : > { %14339 = vmatpush3.bf16.msra.mxu1 %v16444_v16  ;;  %3573 = vmatprep.mubr.f32.mxu1 %v11843_v27 }
 0x382   : > { %14341 = vmatprep.subr.bf16.mxu1 %v16500_v22 }
 0x384   : > { %3574 = vmatmul.mubr.f32.gmra.mrb[30].mxu1 %v11842_v30 }
 0x385   : > { %14343 = vmatpush3.bf16.msra.mxu1 %v16441_v9  ;;  %3668 = vmatprep.mubr.f32.mxu1 %v11845_v37 }
 0x386   : > { %14345 = vmatprep.subr.bf16.mxu1 %v16456_v18  ;;  %v11848_v18 = vld [vmem:[%s18751_s21 + $0x120] sm:$0xff] }
 0x388   : > { %3669 = vmatmul.mubr.f32.vlgmr.msra.gmra.mrb[32].mxu1 %v11844_v38 }
 0x389   : > { %14347 = vmatpush3.bf16.msra.mxu1 %v16408_v44  ;;  %3673 = vmatprep.mubr.f32.mxu1 %v11847_v39  ;;  %v11851_v44 = vld [vmem:[%s18751_s21 + $0x138] sm:$0xff] }
 0x38a   : > { %14349 = vmatprep.subr.bf16.mxu1 %v16453_v17  ;;  %v11850_v17 = vld [vmem:[%s18751_s21 + $0x130] sm:$0xff] }
 0x38c   : > { %3674 = vmatmul.mubr.f32.gmra.mrb[34].mxu1 %v11846_v1 }
 0x38d   : > { %14351 = vmatpush3.bf16.msra.mxu1 %v16405_v43  ;;  %3678 = vmatprep.mubr.f32.mxu1 %v11849_v15  ;;  %v11853_v43 = vld [vmem:[%s18751_s21 + $0x148] sm:$0xff] }
 0x38e   : > { %14353 = vmatprep.subr.bf16.mxu1 %v16472_v48  ;;  %v11852_v48 = vld [vmem:[%s18751_s21 + $0x140] sm:$0xff] }
 0x390   : > { %3679 = vmatmul.mubr.f32.gmra.mrb[36].mxu1 %v11848_v18 }
 0x391   : > { %14355 = vmatpush3.bf16.msra.mxu1 %v16420_v6  ;;  %3683 = vmatprep.mubr.f32.mxu1 %v11851_v44  ;;  %v11855_v6 = vld [vmem:[%s18751_s21 + $0x158] sm:$0xff] }
 0x392   : > { %14357 = vmatprep.subr.bf16.mxu1 %v16468_v45  ;;  %v11854_v45 = vld [vmem:[%s18751_s21 + $0x150] sm:$0xff] }
 0x394   : > { %3684 = vmatmul.mubr.f32.gmra.mrb[38].mxu1 %v11850_v17 }
 0x395   : > { %14359 = vmatpush3.bf16.msra.mxu1 %v16417_v5  ;;  %3688 = vmatprep.mubr.f32.mxu1 %v11853_v43  ;;  %v11857_v5 = vld [vmem:[%s18751_s21 + $0x168] sm:$0xff] }
 0x396   : > { %14361 = vmatprep.subr.bf16.mxu1 %v16488_v42  ;;  %v11856_v42 = vld [vmem:[%s18751_s21 + $0x160] sm:$0xff] }
 0x398   : > { %3689 = vmatmul.mubr.f32.gmra.mrb[40].mxu1 %v11852_v48 }
 0x399   : > { %14363 = vmatpush3.bf16.msra.mxu1 %v16432_v50  ;;  %3693 = vmatprep.mubr.f32.mxu1 %v11855_v6  ;;  %v11859_v50 = vld [vmem:[%s18751_s21 + $0x178] sm:$0xff] }
 0x39a   : > { %14365 = vmatprep.subr.bf16.mxu1 %v16484_v11  ;;  %v11858_v11 = vld [vmem:[%s18751_s21 + $0x170] sm:$0xff] }
 0x39c   : > { %3694 = vmatmul.mubr.f32.gmra.mrb[42].mxu1 %v11854_v45 }
 0x39d   : > { %14367 = vmatpush3.bf16.msra.mxu1 %v16429_v49  ;;  %3698 = vmatprep.mubr.f32.mxu1 %v11857_v5  ;;  %v11861_v49 = vld [vmem:[%s18751_s21 + $0x188] sm:$0xff] }
 0x39e   : > { %14369 = vmatprep.subr.bf16.mxu1 %v16504_v23  ;;  %v11874_v23 = vld [vmem:[%s18751_s21 + $0x1f0] sm:$0xff] }
 0x3a0   : > { %3699 = vmatmul.mubr.f32.gmra.mrb[44].mxu1 %v11856_v42 }
 0x3a1   : > { %14371 = vmatpush3.bf16.msra.mxu1 %v16444_v16  ;;  %3703 = vmatprep.mubr.f32.mxu1 %v11859_v50  ;;  %v11863_v16 = vld [vmem:[%s18751_s21 + $0x198] sm:$0xff] }
 0x3a2   : > { %14373 = vmatprep.subr.bf16.mxu1 %v16500_v22  ;;  %v11875_v22 = vld [vmem:[%s18751_s21 + $0x1f8] sm:$0xff] }
 0x3a4   : > { %3704 = vmatmul.mubr.f32.gmra.mrb[46].mxu1 %v11858_v11 }
 0x3a5   : > { %14375 = vmatpush3.bf16.msra.mxu1 %v16441_v9  ;;  %3798 = vmatprep.mubr.f32.mxu1 %v11861_v49  ;;  %v11864_v9 = vld [vmem:[%s18751_s21 + $0x1a0] sm:$0xff] }
 0x3a6   : > { %15290 = vmatprep.subr.msk.bf16.mxu1 %vm3915_vm5, %v11876_v41 }
 0x3a8   : > { %3799 = vmatmul.mubr.f32.vlgmr.msra.gmra.mrb[48].mxu1 %v11860_v55 }
 0x3a9   : > { %3803 = vmatprep.mubr.f32.mxu1 %v11863_v16  ;;  %13435 = vmatpush3.bf16.msra.mxu1 %v3917_v28 }
 0x3aa   : > { %15291 = vmatprep.subr.msk.bf16.mxu1 %vm3915_vm5, %v16755_v10 }
 0x3ac   : > { %3804 = vmatmul.mubr.f32.gmra.mrb[50].mxu1 %v11862_v56 }
 0x3ad   : > { %3808 = vmatprep.mubr.f32.mxu1 %v11865_v61 }
 0x3b0   : > { %3809 = vmatmul.mubr.f32.gmra.mrb[52].mxu1 %v11864_v9 }
 0x3b1   : > { %3813 = vmatprep.mubr.f32.mxu1 %v11867_v62 }
 0x3b4   : > { %3814 = vmatmul.mubr.f32.gmra.mrb[54].mxu1 %v11866_v7 }
 0x3b5   : > { %3818 = vmatprep.mubr.f32.mxu1 %v11869_v63 }
 0x3b8   : > { %3819 = vmatmul.mubr.f32.gmra.mrb[56].mxu1 %v11868_v0 }
 0x3b9   : > { %3823 = vmatprep.mubr.f32.mxu1 %v11871_v12 }
 0x3bc   : > { %3824 = vmatmul.mubr.f32.gmra.mrb[58].mxu1 %v11870_v13 }
 0x3bd   : > { %3828 = vmatprep.mubr.f32.mxu1 %v11873_v4 }
 0x3c0   : > { %3829 = vmatmul.mubr.f32.gmra.mrb[60].mxu1 %v11872_v2 }
 0x3c1   : > { %3833 = vmatprep.mubr.f32.mxu1 %v11875_v22 }
 0x3c4   : > { %3834 = vmatmul.mubr.f32.gmra.mrb[62].mxu1 %v11874_v23 }
 0x41b   : > { %v12488_v29 = vpop.f32.mrb[0].mxu1 }
 0x41c   : > { %v12489_v34 = vpop.f32.mrb[1].mxu1 }
 0x41d   : > { %v12490_v40 = vadd.f32 %v12489_v34, %v12488_v29 }
 0x41f   : > { %v12491_v46 = vpop.f32.mrb[2].mxu1 }
 0x420   : > { %v12492_v47 = vpop.f32.mrb[3].mxu1 }
 0x421   : > { %v12493_v52 = vadd.f32 %v12492_v47, %v12491_v46 }
 0x423   : > { %v12494_v53 = vpop.f32.mrb[4].mxu1 }
 0x424   : > { %v12495_v58 = vpop.f32.mrb[5].mxu1 }
 0x425   : > { %v12496_v25 = vadd.f32 %v12495_v58, %v12494_v53 }
 0x427   : > { %v12497_v26 = vpop.f32.mrb[6].mxu1 }
 0x428   : > { %v12498_v33 = vpop.f32.mrb[7].mxu1 }
 0x429   : > { %v12499_v36 = vadd.f32 %v12498_v33, %v12497_v26 }
 0x42b   : > { %v12500_v51 = vpop.f32.mrb[8].mxu1 }
 0x42c   : > { %v12501_v54 = vpop.f32.mrb[9].mxu1 }
 0x42d   : > { %v12502_v60 = vadd.f32 %v12501_v54, %v12500_v51 }
 0x42f   : > { %v12503_v8 = vpop.f32.mrb[10].mxu1 }
 0x430   : > { %v12504_v20 = vpop.f32.mrb[11].mxu1 }
 0x431   : > { %v16759_v21 = vadd.f32 %v12504_v20, %v12503_v8 }
 0x433   : > { %v12506_v31 = vpop.f32.mrb[12].mxu1 }
 0x434   : > { %v12507_v32 = vpop.f32.mrb[13].mxu1 }
 0x435   : > { %v16761_v57 = vadd.f32 %v12507_v32, %v12506_v31 }
 0x437   : > { %v12509_v59 = vpop.f32.mrb[14].mxu1 }
 0x438   : > { %v12510_v14 = vpop.f32.mrb[15].mxu1 }
 0x439   : > { %v16763_v19 = vadd.f32 %v12510_v14, %v12509_v59 }
 0x43b   : > { %v12544_v24 = vpop.f32.mrb[16].mxu1 }
 0x43c   : > { %v12545_v3 = vpop.f32.mrb[17].mxu1 }
 0x43d   : > { %v12546_v27 = vadd.f32 %v12545_v3, %v12544_v24 }
 0x43f   : > { %v3579_v30 = vmax.f32 %v12490_v40, %v12546_v27  ;;  %v12547_v37 = vpop.f32.mrb[18].mxu1 }
 0x440   : > { %v12548_v38 = vpop.f32.mrb[19].mxu1 }
 0x441   : > { %v12549_v39 = vadd.f32 %v12548_v38, %v12547_v37 }
 0x443   : > { %v3580_v1 = vmax.f32 %v12493_v52, %v12549_v39  ;;  %v12550_v15 = vpop.f32.mrb[20].mxu1 }
 0x444   : > { %v12551_v18 = vpop.f32.mrb[21].mxu1 }
 0x445   : > { %v12552_v44 = vadd.f32 %v12551_v18, %v12550_v15 }
 0x447   : > { %v3581_v17 = vmax.f32 %v12496_v25, %v12552_v44  ;;  %v12553_v43 = vpop.f32.mrb[22].mxu1 }
 0x448   : > { %v12554_v48 = vpop.f32.mrb[23].mxu1 }
 0x449   : > { %v12555_v6 = vadd.f32 %v12554_v48, %v12553_v43  ;;  %v3889_v48 = vld [vmem:[#allocation3 + $0x1] sm:$0xff] }
 0x44b   : > { %v3582_v45 = vmax.f32 %v12499_v36, %v12555_v6  ;;  %v12556_v5 = vpop.f32.mrb[24].mxu1 }
 0x44c   : > { %v12557_v42 = vpop.f32.mrb[25].mxu1 }
 0x44d   : > { %v12558_v50 = vadd.f32 %v12557_v42, %v12556_v5 }
 0x44f   : > { %v3583_v11 = vmax.f32 %v12502_v60, %v12558_v50  ;;  %v12559_v49 = vpop.f32.mrb[26].mxu1 }
 0x450   : > { %v12560_v55 = vpop.f32.mrb[27].mxu1 }
 0x451   : > { %v12561_v16 = vadd.f32 %v12560_v55, %v12559_v49 }
 0x453   : > { %v3584_v56 = vmax.f32 %v16759_v21, %v12561_v16  ;;  %v12562_v61 = vpop.f32.mrb[28].mxu1 }
 0x454   : > { %v12563_v9 = vpop.f32.mrb[29].mxu1 }
 0x455   : > { %v12564_v62 = vadd.f32 %v12563_v9, %v12562_v61 }
 0x457   : > { %v3585_v7 = vmax.f32 %v16761_v57, %v12564_v62  ;;  %v12565_v63 = vpop.f32.mrb[30].mxu1 }
 0x458   : > { %v12566_v0 = vpop.f32.mrb[31].mxu1 }
 0x459   : > { %v12567_v12 = vadd.f32 %v12566_v0, %v12565_v63 }
 0x45b   : > { %v3586_v13 = vmax.f32 %v16763_v19, %v12567_v12  ;;  %v12600_v4 = vpop.f32.mrb[32].mxu1 }
 0x45c   : > { %v12601_v2 = vpop.f32.mrb[33].mxu1 }
 0x45d   : > { %v12602_v22 = vadd.f32 %v12601_v2, %v12600_v4  ;;  %v3997_v4 = vsel %vm3915_vm5, %v16755_v10, 0  ;;  %v11885_v2 = vld [vmem:[%s18718_s6 + $0x8] sm:$0xf] }
 0x45f   : > { %v3709_v23 = vmax.f32 %v3579_v30, %v12602_v22  ;;  %v12603_v41 = vpop.f32.mrb[34].mxu1 }
 0x460   : > { %v12604_v28 = vpop.f32.mrb[35].mxu1 }
 0x461   : > { %v12605_v29 = vadd.f32 %v12604_v28, %v12603_v41 }
 0x463   : > { %v3710_v34 = vmax.f32 %v3580_v1, %v12605_v29  ;;  %v12606_v40 = vpop.f32.mrb[36].mxu1 }
 0x464   : > { %v12607_v46 = vpop.f32.mrb[37].mxu1 }
 0x465   : > { %v12608_v47 = vadd.f32 %v12607_v46, %v12606_v40 }
 0x467   : > { %v3711_v52 = vmax.f32 %v3581_v17, %v12608_v47  ;;  %v12609_v53 = vpop.f32.mrb[38].mxu1 }
 0x468   : > { %v12610_v58 = vpop.f32.mrb[39].mxu1 }
 0x469   : > { %v12611_v25 = vadd.f32 %v12610_v58, %v12609_v53 }
 0x46b   : > { %v3712_v26 = vmax.f32 %v3582_v45, %v12611_v25  ;;  %v12612_v33 = vpop.f32.mrb[40].mxu1  ;;  %v3876_v25 = vld [vmem:[#allocation3] sm:$0xff] }
 0x46c   : > { %v12613_v36 = vpop.f32.mrb[41].mxu1 }
 0x46d   : > { %v12614_v51 = vadd.f32 %v12613_v36, %v12612_v33 }
 0x46f   : > { %v3713_v54 = vmax.f32 %v3583_v11, %v12614_v51  ;;  %v12615_v60 = vpop.f32.mrb[42].mxu1 }
 0x470   : > { %v12616_v8 = vpop.f32.mrb[43].mxu1 }
 0x471   : > { %v12617_v20 = vadd.f32 %v12616_v8, %v12615_v60 }
 0x473   : > { %v3714_v21 = vmax.f32 %v3584_v56, %v12617_v20  ;;  %v12618_v31 = vpop.f32.mrb[44].mxu1 }
 0x474   : > { %v12619_v32 = vpop.f32.mrb[45].mxu1 }
 0x475   : > { %v12620_v57 = vadd.f32 %v12619_v32, %v12618_v31  ;;  %v4091_v32 = vsel %vm3915_vm5, %v11885_v2, 0 }
 0x477   : > { %v3715_v59 = vmax.f32 %v3585_v7, %v12620_v57  ;;  %v12621_v14 = vpop.f32.mrb[46].mxu1 }
 0x478   : > { %v12622_v19 = vpop.f32.mrb[47].mxu1 }
 0x479   : > { %v12623_v24 = vadd.f32 %v12622_v19, %v12621_v14  ;;  %v4064_v19 = vld [vmem:[#allocation3 + $0x2] sm:$0xff] }
 0x47b   : > { %v3716_v3 = vmax.f32 %v3586_v13, %v12623_v24  ;;  %v12656_v27 = vpop.f32.mrb[48].mxu1 }
 0x47c   : > { %v12657_v30 = vpop.f32.mrb[49].mxu1 }
 0x47d   : > { %v12658_v37 = vadd.f32 %v12657_v30, %v12656_v27 }
 0x47f   : > { %v3839_v38 = vmax.f32 %v3709_v23, %v12658_v37  ;;  %v12659_v39 = vpop.f32.mrb[50].mxu1 }
 0x480   : > { %v12660_v1 = vpop.f32.mrb[51].mxu1 }
 0x481   : > { %3868 = vst.msk [vmem:[#allocation3 + $0x11] sm:$0xff] %vm3247_vm3, %v3839_v38  ;;  %v12661_v15 = vadd.f32 %v12660_v1, %v12659_v39 }
 0x483   : > { %v3840_v18 = vmax.f32 %v3710_v34, %v12661_v15  ;;  %v12662_v44 = vpop.f32.mrb[52].mxu1 }
 0x484   : > { %v12663_v17 = vpop.f32.mrb[53].mxu1 }
 0x485   : > { %3869 = vst.msk [vmem:[#allocation3 + $0x21] sm:$0xff] %vm3247_vm3, %v3840_v18  ;;  %v12664_v43 = vadd.f32 %v12663_v17, %v12662_v44  ;;  %v11895_v17 = vld [vmem:[%s18718_s6 + $0x10] sm:$0xf] }
 0x487   : > { %v3841_v6 = vmax.f32 %v3711_v52, %v12664_v43  ;;  %v12665_v45 = vpop.f32.mrb[54].mxu1 }
 0x488   : > { %v12666_v5 = vpop.f32.mrb[55].mxu1  ;;  %v16770_v42 = vld [vmem:[#allocation3 + $0x11] sm:$0xff] }
 0x489   : > { %3870 = vst.msk [vmem:[#allocation3 + $0x31] sm:$0xff] %vm3247_vm3, %v3841_v6  ;;  %v12667_v50 = vadd.f32 %v12666_v5, %v12665_v45  ;;  %v3897_v11 = vpack.c.bf16 %v16770_v42, %v3889_v48  ;;  %v4065_v24 = vld [vmem:[#allocation3 + $0x12] sm:$0xff] }
 0x48a   : > { %v4072_v30 = vpack.c.bf16 %v4065_v24, %v4064_v19 }
 0x48b   : > { %v3842_v49 = vmax.f32 %v3712_v26, %v12667_v50  ;;  %v12668_v55 = vpop.f32.mrb[56].mxu1  ;;  %13436 = vmatprep.mubr.msk.bf16.mxu1 %vm3247_vm3, %v3897_v11  ;;  %v3877_v26 = vld [vmem:[#allocation3 + $0x10] sm:$0xff]  ;;  %v4295_v50 = vsel %vm3915_vm5, %v11895_v17, 0 }
 0x48c   : > { %v12669_v16 = vpop.f32.mrb[57].mxu1  ;;  %v16775_v56 = vld [vmem:[#allocation3 + $0x21] sm:$0xff] }
 0x48d   : > { %3871 = vst.msk [vmem:[#allocation3 + $0x41] sm:$0xff] %vm3247_vm3, %v3842_v49  ;;  %v12670_v61 = vadd.f32 %v12669_v16, %v12668_v55  ;;  %v4276_v9 = vpack.c.bf16 %v16775_v56, %v16770_v42  ;;  %v3878_v20 = vld [vmem:[#allocation3 + $0x20] sm:$0xff] }
 0x48e   : > { %v4066_v39 = vld [vmem:[#allocation3 + $0x22] sm:$0xff]  ;;  %v4174_v45 = vpack.c.bf16 %v3878_v20, %v3877_v26 }
 0x48f   : > { %v3843_v62 = vmax.f32 %v3713_v54, %v12670_v61  ;;  %v12671_v7 = vpop.f32.mrb[58].mxu1  ;;  %v3884_v54 = vpack.c.bf16 %v3877_v26, %v3876_v25  ;;  %v11900_v49 = vld [vmem:[%s18718_s6 + $0x14] sm:$0xf] }
 0x490   : > { %v12672_v63 = vpop.f32.mrb[59].mxu1  ;;  %v16780_v0 = vld [vmem:[#allocation3 + $0x31] sm:$0xff]  ;;  %v4397_v61 = vsel %vm3915_vm5, %v11900_v49, 0 }
 0x491   : > { %3872 = vst.msk [vmem:[#allocation3 + $0x51] sm:$0xff] %vm3247_vm3, %v3843_v62  ;;  %v12673_v12 = vadd.f32 %v12672_v63, %v12671_v7  ;;  %v16785_v13 = vpack.c.bf16 %v16780_v0, %v16775_v56  ;;  %v3879_v60 = vld [vmem:[#allocation3 + $0x30] sm:$0xff]  ;;  %v11905_v7 = vld [vmem:[%s18718_s6 + $0x18] sm:$0xf] }
 0x492   : > { %v4067_v37 = vld [vmem:[#allocation3 + $0x32] sm:$0xff] }
 0x493   : > { %v3844_v22 = vmax.f32 %v3714_v21, %v12673_v12  ;;  %v12674_v23 = vpop.f32.mrb[60].mxu1  ;;  %13437 = vmatmul.mubr.msk.bf16.vlgmr.msra.gmra.mrb[64].mxu1 %vm3247_vm3, %v16785_v13  ;;  %v16818_v21 = vpack.c.bf16 %v3879_v60, %v3878_v20  ;;  %v16833_v1 = vpack.c.bf16 %v4067_v37, %v4066_v39  ;;  %v4500_v12 = vsel %vm3915_vm5, %v11905_v7, 0 }
 0x494   : > { %v12675_v41 = vpop.f32.mrb[61].mxu1  ;;  %v16794_v28 = vld [vmem:[#allocation3 + $0x41] sm:$0xff]  ;;  %13445 = vmatpush3.bf16.msra.mxu1 %v3997_v4 }
 0x495   : > { %3873 = vst.msk [vmem:[#allocation3 + $0x61] sm:$0xff] %vm3247_vm3, %v3844_v22  ;;  %v12676_v29 = vadd.f32 %v12675_v41, %v12674_v23  ;;  %15292 = vmatprep.subr.msk.bf16.mxu1 %vm3915_vm5, %v11885_v2  ;;  %v4277_v10 = vpack.c.bf16 %v16794_v28, %v16780_v0  ;;  %v3880_v31 = vld [vmem:[#allocation3 + $0x40] sm:$0xff]  ;;  %v11910_v0 = vld [vmem:[%s18718_s6 + $0x1c] sm:$0xf]  ;;  %v11915_v41 = vld [vmem:[%s18718_s6 + $0x20] sm:$0xf] }
 0x496   : > { %v4068_v15 = vld [vmem:[#allocation3 + $0x42] sm:$0xff]  ;;  %v4175_v5 = vpack.c.bf16 %v3880_v31, %v3879_v60  ;;  %v4602_v23 = vsel %vm3915_vm5, %v11910_v0, 0 }
 0x497   : > { %v3845_v34 = vmax.f32 %v3715_v59, %v12676_v29  ;;  %v12677_v40 = vpop.f32.mrb[62].mxu1  ;;  %v11890_v59 = vld [vmem:[%s18718_s6 + $0xc] sm:$0xf]  ;;  %v4379_v63 = vpack.c.bf16 %v4068_v15, %v4067_v37 }
 0x498   : > { %v12678_v46 = vpop.f32.mrb[63].mxu1  ;;  %v16800_v47 = vld [vmem:[#allocation3 + $0x51] sm:$0xff]  ;;  %v4193_v18 = vsel %vm3915_vm5, %v11890_v59, 0 }
 0x499   : > { %3874 = vst.msk [vmem:[#allocation3 + $0x71] sm:$0xff] %vm3247_vm3, %v3845_v34  ;;  %v12679_v52 = vadd.f32 %v12678_v46, %v12677_v40  ;;  %v16805_v53 = vpack.c.bf16 %v16800_v47, %v16794_v28  ;;  %v3881_v8 = vld [vmem:[#allocation3 + $0x50] sm:$0xff] }
 0x49a   : > { %v16821_v57 = vpack.c.bf16 %v3881_v8, %v3880_v31  ;;  %v4069_v38 = vld [vmem:[#allocation3 + $0x52] sm:$0xff] }
 0x49b   : > { %v3846_v58 = vmax.f32 %v3716_v3, %v12679_v52  ;;  %13440 = vmatprep.mubr.msk.bf16.mxu1 %vm3247_vm3, %v16805_v53  ;;  %v16836_v44 = vpack.c.bf16 %v4069_v38, %v4068_v15  ;;  %v4480_v28 = vld [vmem:[#allocation3 + $0x90] sm:$0xff] }
 0x49c   : > { %v3895_v33 = vld [vmem:[#allocation3 + $0x61] sm:$0xff]  ;;  %v4582_v34 = vld [vmem:[#allocation3 + $0x91] sm:$0xff]  ;;  %v11920_v52 = vld [vmem:[%s18719_s7] ss:$0 sm:$0xff] }
 0x49d   : > { %3875 = vst.msk [vmem:[#allocation3 + $0x81] sm:$0xff] %vm3247_vm3, %v3846_v58  ;;  %v3882_v3 = vld [vmem:[#allocation3 + $0x60] sm:$0xff]  ;;  %v4278_v62 = vpack.c.bf16 %v3895_v33, %v16800_v47  ;;  %v4802_v47 = vld [vmem:[%s18715_s3] sm:$0xff] }
 0x49e   : > { %v4070_v48 = vld [vmem:[#allocation3 + $0x62] sm:$0xff]  ;;  %v4176_v11 = vpack.c.bf16 %v3882_v3, %v3881_v8  ;;  %13540 = vmatprep.mubr.msk.f32.mxu0 %vm4834_vm6, %v4802_v47 }
 0x49f   : > { %v4380_v4 = vpack.c.bf16 %v4070_v48, %v4069_v38  ;;  %v5296_v47 = vld [vmem:[#allocation4 + $0x9] sm:$0xff] }
 0x4a0   : > { %v16810_v36 = vld [vmem:[#allocation3 + $0x71] sm:$0xff] }
 0x4a1   : > { %v16813_v51 = vpack.c.bf16 %v16810_v36, %v3895_v33  ;;  %v3883_v14 = vld [vmem:[#allocation3 + $0x70] sm:$0xff] }
 0x4a2   : > { %v3887_v27 = vpack.c.bf16 %v3883_v14, %v3882_v3  ;;  %v4071_v43 = vld [vmem:[#allocation3 + $0x72] sm:$0xff] }
 0x4a3   : > { %13441 = vmatmul.mubr.msk.bf16.gmra.mrb[68].mxu1 %vm3247_vm3, %v16813_v51  ;;  %v4075_v6 = vpack.c.bf16 %v4071_v43, %v4070_v48  ;;  %v4806_v48 = vld [vmem:[%s18715_s3 + $0x20] sm:$0xff] }
 0x4a4   : > { %13446 = vmatprep.mubr.msk.bf16.mxu1 %vm3247_vm3, %v3884_v54  ;;  %v4173_v55 = vld [vmem:[#allocation3 + $0x80] sm:$0xff] }
 0x4a5   : > { %v4177_v16 = vpack.c.bf16 %v4173_v55, %v3883_v14  ;;  %v4275_v42 = vld [vmem:[#allocation3 + $0x81] sm:$0xff]  ;;  %v4484_v29 = vpack.c.bf16 %v4480_v28, %v4173_v55 }
 0x4a6   : > { %v4279_v56 = vpack.c.bf16 %v4275_v42, %v16810_v36  ;;  %v4377_v2 = vld [vmem:[#allocation3 + $0x82] sm:$0xff]  ;;  %v4586_v40 = vpack.c.bf16 %v4582_v34, %v4275_v42  ;;  %v4818_v42 = vld [vmem:[%s18715_s3 + $0x80] sm:$0xff] }
 0x4a7   : > { %v4381_v22 = vpack.c.bf16 %v4377_v2, %v4071_v43  ;;  %v4805_v43 = vld [vmem:[%s18715_s3 + $0x18] sm:$0xff]  ;;  %v4832_v34 = vld [vmem:[%s18715_s3 + $0xf0] sm:$0xff] }
 0x4a8   : > { %v4813_v55 = vld [vmem:[%s18715_s3 + $0x58] sm:$0xff] }
 0x4a9   : > { %v4829_v28 = vld [vmem:[%s18715_s3 + $0xd8] sm:$0xff] }
 0x4ab   : > { %13447 = vmatmul.mubr.msk.bf16.vlgmr.msra.gmra.mrb[64].mxu1 %vm3247_vm3, %v16818_v21 }
 0x4ac   : > { %13450 = vmatprep.mubr.msk.bf16.mxu1 %vm3247_vm3, %v16821_v57  ;;  %13455 = vmatpush3.bf16.msra.mxu1 %v4091_v32 }
 0x4ad   : > { %15293 = vmatprep.subr.msk.bf16.mxu1 %vm3915_vm5, %v11890_v59 }
 0x4b3   : > { %13451 = vmatmul.mubr.msk.bf16.gmra.mrb[68].mxu1 %vm3247_vm3, %v3887_v27 }
 0x4b4   : > { %13456 = vmatprep.mubr.msk.bf16.mxu1 %vm3247_vm3, %v4072_v30 }
 0x4bb   : > { %13457 = vmatmul.mubr.msk.bf16.vlgmr.msra.gmra.mrb[64].mxu1 %vm3247_vm3, %v16833_v1 }
 0x4bc   : > { %13460 = vmatprep.mubr.msk.bf16.mxu1 %vm3247_vm3, %v16836_v44  ;;  %13465 = vmatpush3.bf16.msra.mxu1 %v4193_v18 }
 0x4bd   : > { %15294 = vmatprep.subr.msk.bf16.mxu1 %vm3915_vm5, %v11895_v17  ;;  %v4804_v17 = vld [vmem:[%s18715_s3 + $0x10] sm:$0xff] }
 0x4c3   : > { %13461 = vmatmul.mubr.msk.bf16.gmra.mrb[68].mxu1 %vm3247_vm3, %v4075_v6 }
 0x4c4   : > { %13466 = vmatprep.mubr.msk.bf16.mxu1 %vm3247_vm3, %v4174_v45  ;;  %v4808_v45 = vld [vmem:[%s18715_s3 + $0x30] sm:$0xff] }
 0x4cb   : > { %13467 = vmatmul.mubr.msk.bf16.vlgmr.msra.gmra.mrb[64].mxu1 %vm3247_vm3, %v4175_v5  ;;  %v4809_v5 = vld [vmem:[%s18715_s3 + $0x38] sm:$0xff] }
 0x4cc   : > { %13470 = vmatprep.mubr.msk.bf16.mxu1 %vm3247_vm3, %v4176_v11  ;;  %13475 = vmatpush3.bf16.msra.mxu1 %v4295_v50  ;;  %v4810_v50 = vld [vmem:[%s18715_s3 + $0x40] sm:$0xff]  ;;  %v4811_v11 = vld [vmem:[%s18715_s3 + $0x48] sm:$0xff] }
 0x4cd   : > { %15295 = vmatprep.subr.msk.bf16.mxu1 %vm3915_vm5, %v11900_v49  ;;  %v4812_v49 = vld [vmem:[%s18715_s3 + $0x50] sm:$0xff] }
 0x4d3   : > { %13471 = vmatmul.mubr.msk.bf16.gmra.mrb[68].mxu1 %vm3247_vm3, %v4177_v16  ;;  %v4814_v16 = vld [vmem:[%s18715_s3 + $0x60] sm:$0xff] }
 0x4d4   : > { %13476 = vmatprep.mubr.msk.bf16.mxu1 %vm3247_vm3, %v4276_v9  ;;  %v4378_v9 = vpack.c.bf16 %v4066_v39, %v4065_v24 }
 0x4db   : > { %13477 = vmatmul.mubr.msk.bf16.vlgmr.msra.gmra.mrb[64].mxu1 %vm3247_vm3, %v4277_v10  ;;  %v4704_v10 = vsel %vm3915_vm5, %v11915_v41, 0 }
 0x4dc   : > { %13480 = vmatprep.mubr.msk.bf16.mxu1 %vm3247_vm3, %v4278_v62  ;;  %13485 = vmatpush3.bf16.msra.mxu1 %v4397_v61  ;;  %v4815_v61 = vld [vmem:[%s18715_s3 + $0x68] sm:$0xff]  ;;  %v4816_v62 = vld [vmem:[%s18715_s3 + $0x70] sm:$0xff] }
 0x4dd   : > { %15296 = vmatprep.subr.msk.bf16.mxu1 %vm3915_vm5, %v11905_v7  ;;  %v4817_v7 = vld [vmem:[%s18715_s3 + $0x78] sm:$0xff] }
 0x4e3   : > { %13481 = vmatmul.mubr.msk.bf16.gmra.mrb[68].mxu1 %vm3247_vm3, %v4279_v56  ;;  %v4819_v56 = vld [vmem:[%s18715_s3 + $0x88] sm:$0xff] }
 0x4e4   : > { %13486 = vmatprep.mubr.msk.bf16.mxu1 %vm3247_vm3, %v4378_v9  ;;  %v4820_v9 = vld [vmem:[%s18715_s3 + $0x90] sm:$0xff] }
 0x4eb   : > { %13487 = vmatmul.mubr.msk.bf16.vlgmr.msra.gmra.mrb[64].mxu1 %vm3247_vm3, %v4379_v63  ;;  %v4821_v63 = vld [vmem:[%s18715_s3 + $0x98] sm:$0xff] }
 0x4ec   : > { %13490 = vmatprep.mubr.msk.bf16.mxu1 %vm3247_vm3, %v4380_v4  ;;  %13495 = vmatpush3.bf16.msra.mxu1 %v4500_v12  ;;  %v4822_v12 = vld [vmem:[%s18715_s3 + $0xa0] sm:$0xff]  ;;  %v4823_v4 = vld [vmem:[%s18715_s3 + $0xa8] sm:$0xff] }
 0x4ed   : > { %15297 = vmatprep.subr.msk.bf16.mxu1 %vm3915_vm5, %v11910_v0  ;;  %v4824_v0 = vld [vmem:[%s18715_s3 + $0xb0] sm:$0xff] }
 0x4f3   : > { %13491 = vmatmul.mubr.msk.bf16.gmra.mrb[68].mxu1 %vm3247_vm3, %v4381_v22  ;;  %v4826_v22 = vld [vmem:[%s18715_s3 + $0xc0] sm:$0xff] }
 0x4f4   : > { %13496 = vmatprep.mubr.msk.bf16.mxu1 %vm3247_vm3, %v16818_v21 }
 0x4fb   : > { %13497 = vmatmul.mubr.msk.bf16.vlgmr.msra.gmra.mrb[64].mxu1 %vm3247_vm3, %v16821_v57 }
 0x4fc   : > { %13500 = vmatprep.mubr.msk.bf16.mxu1 %vm3247_vm3, %v3887_v27  ;;  %13505 = vmatpush3.bf16.msra.mxu1 %v4602_v23  ;;  %v4827_v23 = vld [vmem:[%s18715_s3 + $0xc8] sm:$0xff] }
 0x4fd   : > { %15298 = vmatprep.subr.msk.bf16.mxu1 %vm3915_vm5, %v11915_v41  ;;  %v4828_v41 = vld [vmem:[%s18715_s3 + $0xd0] sm:$0xff] }
 0x503   : > { %13501 = vmatmul.mubr.msk.bf16.gmra.mrb[68].mxu1 %vm3247_vm3, %v4484_v29  ;;  %v4830_v29 = vld [vmem:[%s18715_s3 + $0xe0] sm:$0xff] }
 0x504   : > { %13506 = vmatprep.mubr.msk.bf16.mxu1 %vm3247_vm3, %v16785_v13  ;;  %v4684_v13 = vld [vmem:[#allocation3 + $0x92] sm:$0xff] }
 0x505   : > { %v4688_v46 = vpack.c.bf16 %v4684_v13, %v4377_v2  ;;  %v4825_v2 = vld [vmem:[%s18715_s3 + $0xb8] sm:$0xff]  ;;  %v15352_v13 = vld [vmem:[%s18720_s8 + $0x8] sm:$0xff]  }
 0x50b   : > { %13507 = vmatmul.mubr.msk.bf16.vlgmr.msra.gmra.mrb[64].mxu1 %vm3247_vm3, %v16805_v53 }
 0x50c   : > { %13510 = vmatprep.mubr.msk.bf16.mxu1 %vm3247_vm3, %v16813_v51  ;;  %13515 = vmatpush3.bf16.msra.mxu1 %v4704_v10  ;;  %v4831_v10 = vld [vmem:[%s18715_s3 + $0xe8] sm:$0xff] }
 0x513   : > { %13511 = vmatmul.mubr.msk.bf16.gmra.mrb[68].mxu1 %vm3247_vm3, %v4586_v40  ;;  %v4833_v40 = vld [vmem:[%s18715_s3 + $0xf8] sm:$0xff] }
 0x514   : > { %13516 = vmatprep.mubr.msk.bf16.mxu1 %vm3247_vm3, %v16833_v1 }
 0x51b   : > { %13517 = vmatmul.mubr.msk.bf16.vlgmr.msra.gmra.mrb[64].mxu1 %vm3247_vm3, %v16836_v44  ;;  %v4803_v44 = vld [vmem:[%s18715_s3 + $0x8] sm:$0xff] }
 0x51c   : > { %13520 = vmatprep.mubr.msk.bf16.mxu1 %vm3247_vm3, %v4075_v6  ;;  %v4807_v6 = vld [vmem:[%s18715_s3 + $0x28] sm:$0xff] }
 0x523   : > { %13521 = vmatmul.mubr.msk.bf16.gmra.mrb[68].mxu1 %vm3247_vm3, %v4688_v46  ;;  %v5295_v46 = vld [vmem:[#allocation4 + $0x1] sm:$0xff] }
 0x5ee   : > { %v13518_v53 = vpop.f32.mrb[64].mxu1 }
 0x5ef   : > { %v4788_v58 = vadd.f32 %v13518_v53, %v11920_v52  ;;  %v4740_v25 = vpop.f32.mrb[65].mxu1  ;;  %v17153_v53 = vld [vmem:[%s18720_s8 + $0x28] sm:$0xff]  }
 0x5f0   : > { %v4786_v26 = vadd.f32 %v11920_v52, %v4740_v25  ;;  %v13519_v33 = vpop.f32.mrb[66].mxu1  ;;  %14424 = vmatprep.subr.bf16.mxu1 %v17153_v53  ;;  %v17163_v25 = vld [vmem:[%s18720_s8 + $0x30] sm:$0xff]  }
 0x5f1   : > { %v4789_v36 = vadd.f32 %v13519_v33, %v11920_v52  ;;  %v4743_v51 = vpop.f32.mrb[67].mxu1  ;;  %v4796_v60 = vmax.f32 %v4788_v58, 0.0  ;;  %14425 = vmatpush3.bf16.msra.mxu1 %v17153_v53  ;;  %v15354_v58 = vld [vmem:[%s18720_s8] sm:$0xff]  }
 0x5f2   : > { %v4787_v54 = vadd.f32 %v11920_v52, %v4743_v51  ;;  %v4794_v20 = vmax.f32 %v4786_v26, 0.0  ;;  %13792 = vmatprep.subr.bf16.mxu1 %v17163_v25 }
 0x5f3   : > { %v4797_v8 = vmax.f32 %v4789_v36, 0.0 }
 0x5f4   : > { %v4795_v21 = vmax.f32 %v4787_v54, 0.0 }
 0x5f5   : > { %v14380_v31 = vpack.c.bf16 %v4797_v8, %v4796_v60 }
 0x5f6   : > { %v14376_v32 = vpack.c.bf16 %v4795_v21, %v4794_v20  ;;  %v13522_v57 = vpop.f32.mrb[68].mxu1 }
 0x5f7   : > { %v4792_v59 = vadd.f32 %v13522_v57, %v11920_v52  ;;  %v4756_v14 = vpop.f32.mrb[69].mxu1 }
 0x5f8   : > { %v4790_v19 = vadd.f32 %v11920_v52, %v4756_v14  ;;  %v13523_v24 = vpop.f32.mrb[70].mxu1  ;;  %14377 = vmatprep.subr.bf16.mxu0 %v14376_v32 }
 0x5f9   : > { %v4793_v3 = vadd.f32 %v13523_v24, %v11920_v52  ;;  %v4759_v27 = vpop.f32.mrb[71].mxu1  ;;  %14379 = vmatpush3.bf16.msra.mxu0 %v14376_v32  ;;  %v4800_v37 = vmax.f32 %v4792_v59, 0.0 }
 0x5fa   : > { %v4791_v30 = vadd.f32 %v11920_v52, %v4759_v27  ;;  %14381 = vmatprep.subr.bf16.mxu0 %v14380_v31  ;;  %v4798_v39 = vmax.f32 %v4790_v19, 0.0  ;;  %v5327_v52 = vpack.c.bf16 %v5296_v47, %v5295_v46 }
 0x5fb   : > { %v4801_v38 = vmax.f32 %v4793_v3, 0.0 }
 0x5fc   : > { %v4799_v1 = vmax.f32 %v4791_v30, 0.0 }
 0x5fd   : > { %v14388_v15 = vpack.c.bf16 %v4801_v38, %v4800_v37  ;;  %14383 = vmatpush3.bf16.msra.mxu0 %v14380_v31  ;;  %v17175_v31 = vld [vmem:[%s18720_s8 + $0x10] sm:$0xff]  }
 0x5fe   : > { %v14384_v18 = vpack.c.bf16 %v4799_v1, %v4798_v39 }
 0x600   : > { %14385 = vmatprep.subr.bf16.mxu0 %v14384_v18 }
 0x601   : > { %14387 = vmatpush3.bf16.msra.mxu0 %v14384_v18 }
 0x602   : > { %14389 = vmatprep.subr.bf16.mxu0 %v14388_v15 }
 0x605   : > { %14391 = vmatpush3.bf16.msra.mxu0 %v14388_v15 }
 0x606   : > { %13588 = vmatprep.subr.bf16.mxu0 %v15352_v13 }
 0x608   : > { %13541 = vmatmul.mubr.msk.f32.vlgmr.msra.gmra.mrb[32].mxu0 %vm4834_vm6, %v4803_v44 }
 0x609   : > { %13543 = vmatprep.mubr.msk.f32.mxu0 %vm4834_vm6, %v4804_v17  ;;  %13589 = vmatpush3.bf16.msra.mxu0 %v15352_v13 }
 0x60a   : > { %13622 = vmatprep.subr.bf16.mxu0 %v15354_v58 }
 0x60c   : > { %13544 = vmatmul.mubr.msk.f32.gmra.mrb[34].mxu0 %vm4834_vm6, %v4805_v43 }
 0x60d   : > { %13546 = vmatprep.mubr.msk.f32.mxu0 %vm4834_vm6, %v4806_v48 }
 0x610   : > { %13547 = vmatmul.mubr.msk.f32.gmra.mrb[36].mxu0 %vm4834_vm6, %v4807_v6 }
 0x611   : > { %13549 = vmatprep.mubr.msk.f32.mxu0 %vm4834_vm6, %v4808_v45 }
 0x614   : > { %13550 = vmatmul.mubr.msk.f32.gmra.mrb[38].mxu0 %vm4834_vm6, %v4809_v5 }
 0x615   : > { %13552 = vmatprep.mubr.msk.f32.mxu0 %vm4834_vm6, %v4810_v50 }
 0x618   : > { %13553 = vmatmul.mubr.msk.f32.gmra.mrb[40].mxu0 %vm4834_vm6, %v4811_v11 }
 0x619   : > { %13555 = vmatprep.mubr.msk.f32.mxu0 %vm4834_vm6, %v4812_v49 }
 0x61c   : > { %13556 = vmatmul.mubr.msk.f32.gmra.mrb[42].mxu0 %vm4834_vm6, %v4813_v55 }
 0x61d   : > { %13558 = vmatprep.mubr.msk.f32.mxu0 %vm4834_vm6, %v4814_v16 }
 0x620   : > { %13559 = vmatmul.mubr.msk.f32.gmra.mrb[44].mxu0 %vm4834_vm6, %v4815_v61 }
 0x621   : > { %13561 = vmatprep.mubr.msk.f32.mxu0 %vm4834_vm6, %v4816_v62 }
 0x624   : > { %13562 = vmatmul.mubr.msk.f32.gmra.mrb[46].mxu0 %vm4834_vm6, %v4817_v7 }
 0x625   : > { %13564 = vmatprep.mubr.msk.f32.mxu0 %vm4834_vm6, %v4818_v42 }
 0x628   : > { %13565 = vmatmul.mubr.msk.f32.gmra.mrb[48].mxu0 %vm4834_vm6, %v4819_v56 }
 0x629   : > { %13567 = vmatprep.mubr.msk.f32.mxu0 %vm4834_vm6, %v4820_v9 }
 0x62c   : > { %13568 = vmatmul.mubr.msk.f32.gmra.mrb[50].mxu0 %vm4834_vm6, %v4821_v63 }
 0x62d   : > { %13570 = vmatprep.mubr.msk.f32.mxu0 %vm4834_vm6, %v4822_v12 }
 0x630   : > { %13571 = vmatmul.mubr.msk.f32.gmra.mrb[52].mxu0 %vm4834_vm6, %v4823_v4 }
 0x631   : > { %13573 = vmatprep.mubr.msk.f32.mxu0 %vm4834_vm6, %v4824_v0 }
 0x634   : > { %13574 = vmatmul.mubr.msk.f32.gmra.mrb[54].mxu0 %vm4834_vm6, %v4825_v2 }
 0x635   : > { %13576 = vmatprep.mubr.msk.f32.mxu0 %vm4834_vm6, %v4826_v22 }
 0x638   : > { %13577 = vmatmul.mubr.msk.f32.gmra.mrb[56].mxu0 %vm4834_vm6, %v4827_v23 }
 0x639   : > { %13579 = vmatprep.mubr.msk.f32.mxu0 %vm4834_vm6, %v4828_v41 }
 0x63c   : > { %13580 = vmatmul.mubr.msk.f32.gmra.mrb[58].mxu0 %vm4834_vm6, %v4829_v28 }
 0x63d   : > { %13582 = vmatprep.mubr.msk.f32.mxu0 %vm4834_vm6, %v4830_v29 }
 0x640   : > { %13583 = vmatmul.mubr.msk.f32.gmra.mrb[60].mxu0 %vm4834_vm6, %v4831_v10 }
 0x641   : > { %13585 = vmatprep.mubr.msk.f32.mxu0 %vm4834_vm6, %v4832_v34 }
 0x644   : > { %13586 = vmatmul.mubr.msk.f32.gmra.mrb[62].mxu0 %vm4834_vm6, %v4833_v40 }
 0x645   : > { %13590 = vmatprep.mubr.msk.bf16.mxu0 %vm5156_vm7, %v5327_v52 }
 0x6db   : > { %v13542_v26 = vpop.f32.mrb[32].mxu0 }
 0x6dc   : > { %5214 = vst.msk [vmem:[#allocation4 + $0x21] sm:$0xff] %vm5156_vm7, %v13542_v26  ;;  %v4997_v33 = vpop.f32.mrb[33].mxu0 }
 0x6dd   : > { %5213 = vst.msk [vmem:[#allocation4 + $0x19] sm:$0xff] %vm5156_vm7, %v4997_v33 }
 0x6df   : > { %v13545_v36 = vpop.f32.mrb[34].mxu0 }
 0x6e0   : > { %5216 = vst.msk [vmem:[#allocation4 + $0x39] sm:$0xff] %vm5156_vm7, %v13545_v36  ;;  %v5007_v51 = vpop.f32.mrb[35].mxu0 }
 0x6e1   : > { %5215 = vst.msk [vmem:[#allocation4 + $0x31] sm:$0xff] %vm5156_vm7, %v5007_v51 }
 0x6e3   : > { %v13548_v54 = vpop.f32.mrb[36].mxu0  ;;  %v5298_v60 = vld [vmem:[#allocation4 + $0x21] sm:$0xff] }
 0x6e4   : > { %5218 = vst.msk [vmem:[#allocation4 + $0x51] sm:$0xff] %vm5156_vm7, %v13548_v54  ;;  %v5017_v8 = vpop.f32.mrb[37].mxu0  ;;  %v5297_v20 = vld [vmem:[#allocation4 + $0x19] sm:$0xff] }
 0x6e5   : > { %5217 = vst.msk [vmem:[#allocation4 + $0x49] sm:$0xff] %vm5156_vm7, %v5017_v8  ;;  %v5328_v21 = vpack.c.bf16 %v5298_v60, %v5297_v20 }
 0x6e7   : > { %13591 = vmatmul.mubr.msk.bf16.vlgmr.msra.gmra.mrb[64].mxu0 %vm5156_vm7, %v5328_v21  ;;  %v13551_v32 = vpop.f32.mrb[38].mxu0  ;;  %v5300_v57 = vld [vmem:[#allocation4 + $0x39] sm:$0xff] }
 0x6e8   : > { %5220 = vst.msk [vmem:[#allocation4 + $0x69] sm:$0xff] %vm5156_vm7, %v13551_v32  ;;  %v5027_v59 = vpop.f32.mrb[39].mxu0  ;;  %v5299_v14 = vld [vmem:[#allocation4 + $0x31] sm:$0xff]  ;;  %13623 = vmatpush3.bf16.msra.mxu0 %v15354_v58 }
 0x6e9   : > { %5219 = vst.msk [vmem:[#allocation4 + $0x61] sm:$0xff] %vm5156_vm7, %v5027_v59  ;;  %v17180_v19 = vpack.c.bf16 %v5300_v57, %v5299_v14  ;;  %13656 = vmatprep.subr.bf16.mxu0 %v17175_v31  ;;  %v17252_v57 = vld [vmem:[%s18720_s8 + $0x38] sm:$0xff]  }
 0x6eb   : > { %v13554_v24 = vpop.f32.mrb[40].mxu0  ;;  %13594 = vmatprep.mubr.msk.bf16.mxu0 %vm5156_vm7, %v17180_v19  ;;  %v5302_v3 = vld [vmem:[#allocation4 + $0x51] sm:$0xff] }
 0x6ec   : > { %5222 = vst.msk [vmem:[#allocation4 + $0x81] sm:$0xff] %vm5156_vm7, %v13554_v24  ;;  %v5037_v27 = vpop.f32.mrb[41].mxu0  ;;  %v5301_v30 = vld [vmem:[#allocation4 + $0x49] sm:$0xff] }
 0x6ed   : > { %5221 = vst.msk [vmem:[#allocation4 + $0x79] sm:$0xff] %vm5156_vm7, %v5037_v27  ;;  %v17187_v37 = vpack.c.bf16 %v5302_v3, %v5301_v30 }
 0x6ef   : > { %13595 = vmatmul.mubr.msk.bf16.gmra.mrb[68].mxu0 %vm5156_vm7, %v17187_v37  ;;  %v13557_v38 = vpop.f32.mrb[42].mxu0  ;;  %v5304_v39 = vld [vmem:[#allocation4 + $0x69] sm:$0xff] }
 0x6f0   : > { %5224 = vst.msk [vmem:[#allocation4 + $0x99] sm:$0xff] %vm5156_vm7, %v13557_v38  ;;  %v5047_v1 = vpop.f32.mrb[43].mxu0  ;;  %v5303_v15 = vld [vmem:[#allocation4 + $0x61] sm:$0xff] }
 0x6f1   : > { %5223 = vst.msk [vmem:[#allocation4 + $0x91] sm:$0xff] %vm5156_vm7, %v5047_v1  ;;  %v17193_v18 = vpack.c.bf16 %v5304_v39, %v5303_v15 }
 0x6f3   : > { %v13560_v44 = vpop.f32.mrb[44].mxu0  ;;  %13598 = vmatprep.mubr.msk.bf16.mxu0 %vm5156_vm7, %v17193_v18  ;;  %v5306_v17 = vld [vmem:[#allocation4 + $0x81] sm:$0xff] }
 0x6f4   : > { %5226 = vst.msk [vmem:[#allocation4 + $0xb1] sm:$0xff] %vm5156_vm7, %v13560_v44  ;;  %v5057_v43 = vpop.f32.mrb[45].mxu0  ;;  %v5305_v48 = vld [vmem:[#allocation4 + $0x79] sm:$0xff] }
 0x6f5   : > { %5225 = vst.msk [vmem:[#allocation4 + $0xa9] sm:$0xff] %vm5156_vm7, %v5057_v43  ;;  %v17199_v6 = vpack.c.bf16 %v5306_v17, %v5305_v48 }
 0x6f7   : > { %13599 = vmatmul.mubr.msk.bf16.gmra.mrb[72].mxu0 %vm5156_vm7, %v17199_v6  ;;  %v13563_v45 = vpop.f32.mrb[46].mxu0  ;;  %v5308_v5 = vld [vmem:[#allocation4 + $0x99] sm:$0xff] }
 0x6f8   : > { %5228 = vst.msk [vmem:[#allocation4 + $0xc9] sm:$0xff] %vm5156_vm7, %v13563_v45  ;;  %v5067_v50 = vpop.f32.mrb[47].mxu0  ;;  %v5307_v11 = vld [vmem:[#allocation4 + $0x91] sm:$0xff] }
 0x6f9   : > { %5227 = vst.msk [vmem:[#allocation4 + $0xc1] sm:$0xff] %vm5156_vm7, %v5067_v50  ;;  %v17205_v49 = vpack.c.bf16 %v5308_v5, %v5307_v11  ;;  %v5245_v5 = vld [vmem:[#allocation4] sm:$0xff]  ;;  %v5246_v50 = vld [vmem:[#allocation4 + $0x8] sm:$0xff] }
 0x6fb   : > { %v13566_v55 = vpop.f32.mrb[48].mxu0  ;;  %13602 = vmatprep.mubr.msk.bf16.mxu0 %vm5156_vm7, %v17205_v49  ;;  %v5310_v16 = vld [vmem:[#allocation4 + $0xb1] sm:$0xff] }
 0x6fc   : > { %5230 = vst.msk [vmem:[#allocation4 + $0xe1] sm:$0xff] %vm5156_vm7, %v13566_v55  ;;  %v5077_v61 = vpop.f32.mrb[49].mxu0  ;;  %v5309_v62 = vld [vmem:[#allocation4 + $0xa9] sm:$0xff] }
 0x6fd   : > { %5229 = vst.msk [vmem:[#allocation4 + $0xd9] sm:$0xff] %vm5156_vm7, %v5077_v61  ;;  %v17211_v7 = vpack.c.bf16 %v5310_v16, %v5309_v62  ;;  %v5277_v62 = vpack.c.bf16 %v5246_v50, %v5245_v5 }
 0x6ff   : > { %13603 = vmatmul.mubr.msk.bf16.gmra.mrb[76].mxu0 %vm5156_vm7, %v17211_v7  ;;  %v13569_v42 = vpop.f32.mrb[50].mxu0  ;;  %v5312_v56 = vld [vmem:[#allocation4 + $0xc9] sm:$0xff] }
 0x700   : > { %5232 = vst.msk [vmem:[#allocation4 + $0xf9] sm:$0xff] %vm5156_vm7, %v13569_v42  ;;  %v5087_v9 = vpop.f32.mrb[51].mxu0  ;;  %v5311_v63 = vld [vmem:[#allocation4 + $0xc1] sm:$0xff] }
 0x701   : > { %5231 = vst.msk [vmem:[#allocation4 + $0xf1] sm:$0xff] %vm5156_vm7, %v5087_v9  ;;  %v17217_v12 = vpack.c.bf16 %v5312_v56, %v5311_v63  ;;  %v6969_v63 = vld [vmem:[#allocation4 + $0x30] sm:$0xff] }
 0x703   : > { %v13572_v4 = vpop.f32.mrb[52].mxu0  ;;  %13606 = vmatprep.mubr.msk.bf16.mxu0 %vm5156_vm7, %v17217_v12  ;;  %v5314_v0 = vld [vmem:[#allocation4 + $0xe1] sm:$0xff] }
 0x704   : > { %5234 = vst.msk [vmem:[#allocation4 + $0x111] sm:$0xff] %vm5156_vm7, %v13572_v4  ;;  %v5097_v2 = vpop.f32.mrb[53].mxu0  ;;  %v5313_v22 = vld [vmem:[#allocation4 + $0xd9] sm:$0xff] }
 0x705   : > { %5233 = vst.msk [vmem:[#allocation4 + $0x109] sm:$0xff] %vm5156_vm7, %v5097_v2  ;;  %v17223_v23 = vpack.c.bf16 %v5314_v0, %v5313_v22  ;;  %v6970_v4 = vld [vmem:[#allocation4 + $0x38] sm:$0xff] }
 0x706   : > { %v17291_v22 = vpack.c.bf16 %v6970_v4, %v6969_v63 }
 0x707   : > { %v13575_v41 = vpop.f32.mrb[54].mxu0  ;;  %13607 = vmatmul.mubr.msk.bf16.gmra.mrb[80].mxu0 %vm5156_vm7, %v17223_v23  ;;  %v5316_v28 = vld [vmem:[#allocation4 + $0xf9] sm:$0xff] }
 0x708   : > { %5236 = vst.msk [vmem:[#allocation4 + $0x129] sm:$0xff] %vm5156_vm7, %v13575_v41  ;;  %v5107_v29 = vpop.f32.mrb[55].mxu0  ;;  %v5315_v10 = vld [vmem:[#allocation4 + $0xf1] sm:$0xff] }
 0x709   : > { %5235 = vst.msk [vmem:[#allocation4 + $0x121] sm:$0xff] %vm5156_vm7, %v5107_v29  ;;  %v17229_v34 = vpack.c.bf16 %v5316_v28, %v5315_v10  ;;  %v5247_v41 = vld [vmem:[#allocation4 + $0x18] sm:$0xff]  ;;  %v5248_v28 = vld [vmem:[#allocation4 + $0x20] sm:$0xff]  ;;  %v17302_v10 = vld [vmem:[%s18720_s8 + $0x18] sm:$0xff]  }
 0x70a   : > { %v17297_v29 = vpack.c.bf16 %v5248_v28, %v5247_v41 }
 0x70b   : > { %v13578_v40 = vpop.f32.mrb[56].mxu0  ;;  %13610 = vmatprep.mubr.msk.bf16.mxu0 %vm5156_vm7, %v17229_v34  ;;  %v5318_v13 = vld [vmem:[#allocation4 + $0x111] sm:$0xff] }
 0x70c   : > { %v6691_v46 = vld [vmem:[#allocation4 + $0x112] sm:$0xff]  ;;  %5238 = vst.msk [vmem:[#allocation4 + $0x141] sm:$0xff] %vm5156_vm7, %v13578_v40  ;;  %v5117_v47 = vpop.f32.mrb[57].mxu0  ;;  %v5317_v52 = vld [vmem:[#allocation4 + $0x109] sm:$0xff] }
 0x70d   : > { %v6690_v58 = vld [vmem:[#allocation4 + $0x10a] sm:$0xff]  ;;  %5237 = vst.msk [vmem:[#allocation4 + $0x139] sm:$0xff] %vm5156_vm7, %v5117_v47  ;;  %v17235_v26 = vpack.c.bf16 %v5318_v13, %v5317_v52 }
 0x70e   : > { %v17237_v33 = vpack.c.bf16 %v6691_v46, %v6690_v58  ;;  %v6971_v40 = vld [vmem:[#allocation4 + $0x48] sm:$0xff]  ;;  %v6972_v13 = vld [vmem:[#allocation4 + $0x50] sm:$0xff]  ;;  %v6973_v46 = vld [vmem:[#allocation4 + $0x60] sm:$0xff] }
 0x70f   : > { %v13581_v36 = vpop.f32.mrb[58].mxu0  ;;  %13611 = vmatmul.mubr.msk.bf16.gmra.mrb[84].mxu0 %vm5156_vm7, %v17235_v26  ;;  %v6693_v51 = vld [vmem:[#allocation4 + $0x12a] sm:$0xff]  ;;  %v17309_v52 = vpack.c.bf16 %v6972_v13, %v6971_v40 }
 0x710   : > { %13780 = vmatprep.mubr.msk.bf16.mxu1 %vm5156_vm7, %v17237_v33  ;;  %v5320_v54 = vld [vmem:[#allocation4 + $0x129] sm:$0xff]  ;;  %5240 = vst.msk [vmem:[#allocation4 + $0x159] sm:$0xff] %vm5156_vm7, %v13581_v36  ;;  %v5127_v60 = vpop.f32.mrb[59].mxu0  ;;  %v5319_v20 = vld [vmem:[#allocation4 + $0x121] sm:$0xff] }
 0x711   : > { %v6692_v8 = vld [vmem:[#allocation4 + $0x122] sm:$0xff]  ;;  %5239 = vst.msk [vmem:[#allocation4 + $0x151] sm:$0xff] %vm5156_vm7, %v5127_v60  ;;  %v17247_v32 = vpack.c.bf16 %v5320_v54, %v5319_v20  ;;  %v17314_v58 = vld [vmem:[%s18720_s8 + $0x40] sm:$0xff]   ;;  %v6978_v60 = vld [vmem:[#allocation4 + $0x98] sm:$0xff] }
 0x712   : > { %v17245_v21 = vpack.c.bf16 %v6693_v51, %v6692_v8  ;;  %v6974_v47 = vld [vmem:[#allocation4 + $0x68] sm:$0xff]  ;;  %v6976_v51 = vld [vmem:[#allocation4 + $0x80] sm:$0xff]  ;;  %v6977_v54 = vld [vmem:[#allocation4 + $0x90] sm:$0xff] }
 0x713   : > { %v13584_v59 = vpop.f32.mrb[60].mxu0  ;;  %13614 = vmatprep.mubr.msk.bf16.mxu0 %vm5156_vm7, %v17247_v32  ;;  %v5322_v14 = vld [vmem:[#allocation4 + $0x141] sm:$0xff]  ;;  %v17317_v36 = vpack.c.bf16 %v6974_v47, %v6973_v46  ;;  %v17331_v20 = vpack.c.bf16 %v6978_v60, %v6977_v54  ;;  %v6988_v5 = vld [vmem:[#allocation4 + $0x110] sm:$0xff]  ;;  %v6999_v54 = vld [vmem:[#allocation4 + $0x198] sm:$0xff] }
 0x714   : > { %13781 = vmatmul.mubr.msk.bf16.vlgmr.msra.gmra.mrb[72].mxu1 %vm5156_vm7, %v17245_v21  ;;  %v6695_v24 = vld [vmem:[#allocation4 + $0x142] sm:$0xff]  ;;  %5242 = vst.msk [vmem:[#allocation4 + $0x171] sm:$0xff] %vm5156_vm7, %v13584_v59  ;;  %v5137_v3 = vpop.f32.mrb[61].mxu0  ;;  %v5321_v27 = vld [vmem:[#allocation4 + $0x139] sm:$0xff]  ;;  %v6980_v59 = vld [vmem:[#allocation4 + $0xb0] sm:$0xff] }
 0x715   : > { %v6694_v30 = vld [vmem:[#allocation4 + $0x13a] sm:$0xff]  ;;  %13793 = vmatpush3.bf16.msra.mxu1 %v17163_v25  ;;  %5241 = vst.msk [vmem:[#allocation4 + $0x169] sm:$0xff] %vm5156_vm7, %v5137_v3  ;;  %v17261_v38 = vpack.c.bf16 %v5322_v14, %v5321_v27  ;;  %v5776_v47 = vld [vmem:[#allocation4 + $0x2] sm:$0xff] }
 0x716   : > { %v17263_v39 = vpack.c.bf16 %v6695_v24, %v6694_v30  ;;  %13826 = vmatprep.subr.bf16.mxu1 %v17252_v57  ;;  %v6981_v14 = vld [vmem:[#allocation4 + $0xc0] sm:$0xff]  ;;  %v6982_v24 = vld [vmem:[#allocation4 + $0xc8] sm:$0xff]  ;;  %v6983_v30 = vld [vmem:[#allocation4 + $0xd8] sm:$0xff] }
 0x717   : > { %v13587_v1 = vpop.f32.mrb[62].mxu0  ;;  %13615 = vmatmul.mubr.msk.bf16.gmra.mrb[88].mxu0 %vm5156_vm7, %v17261_v38  ;;  %v6697_v15 = vld [vmem:[#allocation4 + $0x15a] sm:$0xff]  ;;  %v17343_v27 = vpack.c.bf16 %v6982_v24, %v6981_v14  ;;  %v5779_v24 = vld [vmem:[#allocation4 + $0x22] sm:$0xff] }
 0x718   : > { %13784 = vmatprep.mubr.msk.bf16.mxu1 %vm5156_vm7, %v17263_v39  ;;  %v5324_v44 = vld [vmem:[#allocation4 + $0x159] sm:$0xff]  ;;  %5244 = vst.msk [vmem:[#allocation4 + $0x189] sm:$0xff] %vm5156_vm7, %v13587_v1  ;;  %v5147_v25 = vpop.f32.mrb[63].mxu0  ;;  %v5323_v43 = vld [vmem:[#allocation4 + $0x151] sm:$0xff] }
 0x719   : > { %v6696_v17 = vld [vmem:[#allocation4 + $0x152] sm:$0xff]  ;;  %5243 = vst.msk [vmem:[#allocation4 + $0x181] sm:$0xff] %vm5156_vm7, %v5147_v25  ;;  %v17274_v45 = vpack.c.bf16 %v5324_v44, %v5323_v43  ;;  %v6984_v1 = vld [vmem:[#allocation4 + $0xe0] sm:$0xff]  ;;  %v6987_v43 = vld [vmem:[#allocation4 + $0x108] sm:$0xff] }
 0x71a   : > { %v17272_v48 = vpack.c.bf16 %v6697_v15, %v6696_v17  ;;  %v6985_v15 = vld [vmem:[#allocation4 + $0xf0] sm:$0xff]  ;;  %v6986_v44 = vld [vmem:[#allocation4 + $0xf8] sm:$0xff]  ;;  %v17353_v25 = vpack.c.bf16 %v6984_v1, %v6983_v30  ;;  %v6989_v50 = vld [vmem:[#allocation4 + $0x120] sm:$0xff] }
 0x71b   : > { %13618 = vmatprep.mubr.msk.bf16.mxu0 %vm5156_vm7, %v17274_v45  ;;  %v5326_v11 = vld [vmem:[#allocation4 + $0x171] sm:$0xff]  ;;  %v17355_v17 = vpack.c.bf16 %v6986_v44, %v6985_v15  ;;  %v7000_v60 = vld [vmem:[#allocation4 + $0x1a0] sm:$0xff] }
 0x71c   : > { %13785 = vmatmul.mubr.msk.bf16.gmra.mrb[76].mxu1 %vm5156_vm7, %v17272_v48  ;;  %v6699_v55 = vld [vmem:[#allocation4 + $0x172] sm:$0xff]  ;;  %v5325_v16 = vld [vmem:[#allocation4 + $0x169] sm:$0xff]  ;;  %v5778_v14 = vld [vmem:[#allocation4 + $0x1a] sm:$0xff] }
 0x71d   : > { %v6698_v61 = vld [vmem:[#allocation4 + $0x16a] sm:$0xff]  ;;  %v17280_v42 = vpack.c.bf16 %v5326_v11, %v5325_v16  ;;  %v6994_v63 = vld [vmem:[#allocation4 + $0x158] sm:$0xff]  ;;  %v17403_v15 = vpack.c.bf16 %v5779_v24, %v5778_v14  ;;  %v6378_v14 = vld [vmem:[#allocation4 + $0x61] sm:$0xff] }
 0x71e   : > { %v17282_v56 = vpack.c.bf16 %v6699_v55, %v6698_v61  ;;  %v6990_v11 = vld [vmem:[#allocation4 + $0x128] sm:$0xff]  ;;  %v17365_v55 = vpack.c.bf16 %v6988_v5, %v6987_v43  ;;  %v6991_v61 = vld [vmem:[#allocation4 + $0x138] sm:$0xff]  ;;  %v6996_v28 = vld [vmem:[#allocation4 + $0x170] sm:$0xff] }
 0x71f   : > { %13619 = vmatmul.mubr.msk.bf16.gmra.mrb[92].mxu0 %vm5156_vm7, %v17280_v42  ;;  %v6701_v9 = vld [vmem:[#allocation4 + $0x18a] sm:$0xff]  ;;  %v17367_v16 = vpack.c.bf16 %v6990_v11, %v6989_v50  ;;  %v5780_v30 = vld [vmem:[#allocation4 + $0x32] sm:$0xff]  ;;  %v5781_v1 = vld [vmem:[#allocation4 + $0x3a] sm:$0xff] }
 0x720   : > { %13788 = vmatprep.mubr.msk.bf16.mxu1 %vm5156_vm7, %v17282_v56  ;;  %v6700_v0 = vld [vmem:[#allocation4 + $0x182] sm:$0xff]  ;;  %13624 = vmatprep.mubr.msk.bf16.mxu0 %vm5156_vm7, %v5277_v62  ;;  %v17408_v44 = vld [vmem:[%s18720_s8 + $0x20] sm:$0xff]   ;;  %v17410_v43 = vpack.c.bf16 %v5781_v1, %v5780_v30  ;;  %v17583_v30 = vld [vmem:[%s18721_s9 + $0x8] sm:$0xf] }
 0x721   : > { %v17289_v2 = vpack.c.bf16 %v6701_v9, %v6700_v0  ;;  %v6992_v62 = vld [vmem:[#allocation4 + $0x140] sm:$0xff]  ;;  %v6993_v9 = vld [vmem:[#allocation4 + $0x150] sm:$0xff]  ;;  %v6995_v41 = vld [vmem:[#allocation4 + $0x168] sm:$0xff] }
 0x722   : > { %v17377_v4 = vpack.c.bf16 %v6992_v62, %v6991_v61  ;;  %v17379_v0 = vpack.c.bf16 %v6994_v63, %v6993_v9  ;;  %v6997_v40 = vld [vmem:[#allocation4 + $0x180] sm:$0xff]  ;;  %v6998_v13 = vld [vmem:[#allocation4 + $0x188] sm:$0xff]  ;;  %v17389_v46 = vpack.c.bf16 %v6996_v28, %v6995_v41  ;;  %v5783_v5 = vld [vmem:[#allocation4 + $0x52] sm:$0xff] }
 0x723   : > { %v17421_v50 = vld [vmem:[%s18721_s9 + $0x4] sm:$0xf]  ;;  %v5784_v11 = vld [vmem:[#allocation4 + $0x62] sm:$0xff]  ;;  %v5785_v61 = vld [vmem:[#allocation4 + $0x6a] sm:$0xff] }
 0x724   : > { %13789 = vmatmul.mubr.msk.bf16.gmra.mrb[80].mxu1 %vm5156_vm7, %v17289_v2  ;;  %v17432_v62 = vpack.c.bf16 %v5785_v61, %v5784_v11  ;;  %v5787_v9 = vld [vmem:[#allocation4 + $0x82] sm:$0xff]  ;;  %v5790_v28 = vld [vmem:[#allocation4 + $0xaa] sm:$0xff]  ;;  %v6380_v1 = vld [vmem:[#allocation4 + $0x79] sm:$0xff] }
 0x725   : > { %13794 = vmatprep.mubr.msk.bf16.mxu1 %vm5156_vm7, %v17291_v22  ;;  %v6379_v24 = vld [vmem:[#allocation4 + $0x69] sm:$0xff]  ;;  %v7918_v11 = vld [vmem:[#allocation2 + $0x49] sm:$0xff] }
 0x727   : > { %13625 = vmatmul.mubr.msk.bf16.vlgmr.msra.gmra.mrb[64].mxu0 %vm5156_vm7, %v17297_v29 }
 0x728   : > { %13628 = vmatprep.mubr.msk.bf16.mxu0 %vm5156_vm7, %v17291_v22  ;;  %13657 = vmatpush3.bf16.msra.mxu0 %v17175_v31  ;;  %v6975_v31 = vld [vmem:[#allocation4 + $0x78] sm:$0xff] }
 0x729   : > { %13690 = vmatprep.subr.bf16.mxu0 %v17302_v10  ;;  %v17329_v8 = vpack.c.bf16 %v6976_v51, %v6975_v31  ;;  %v5777_v31 = vld [vmem:[#allocation4 + $0xa] sm:$0xff]  ;;  %v17391_v51 = vpack.c.bf16 %v6998_v13, %v6997_v40  ;;  %v5791_v40 = vld [vmem:[#allocation4 + $0xb2] sm:$0xff] }
 0x72a   : > { %v5793_v13 = vld [vmem:[#allocation4 + $0xca] sm:$0xff] }
 0x72c   : > { %13795 = vmatmul.mubr.msk.bf16.vlgmr.msra.gmra.mrb[84].mxu1 %vm5156_vm7, %v17309_v52 }
 0x72d   : > { %13798 = vmatprep.mubr.msk.bf16.mxu1 %vm5156_vm7, %v17317_v36  ;;  %13827 = vmatpush3.bf16.msra.mxu1 %v17252_v57  ;;  %v6979_v57 = vld [vmem:[#allocation4 + $0xa8] sm:$0xff] }
 0x72e   : > { %13860 = vmatprep.subr.bf16.mxu1 %v17314_v58  ;;  %v17341_v3 = vpack.c.bf16 %v6980_v59, %v6979_v57  ;;  %v5808_v57 = vpack.c.bf16 %v5777_v31, %v5776_v47  ;;  %v7016_v59 = vpack.c.bf16 %v7000_v60, %v6999_v54  ;;  %v5794_v31 = vld [vmem:[#allocation4 + $0xda] sm:$0xff]  ;;  %v5795_v54 = vld [vmem:[#allocation4 + $0xe2] sm:$0xff] }
 0x72f   : > { %13629 = vmatmul.mubr.msk.bf16.gmra.mrb[68].mxu0 %vm5156_vm7, %v17309_v52  ;;  %v5797_v60 = vld [vmem:[#allocation4 + $0xfa] sm:$0xff] }
 0x730   : > { %13632 = vmatprep.mubr.msk.bf16.mxu0 %vm5156_vm7, %v17317_v36 }
 0x734   : > { %13799 = vmatmul.mubr.msk.bf16.gmra.mrb[88].mxu1 %vm5156_vm7, %v17329_v8 }
 0x735   : > { %13802 = vmatprep.mubr.msk.bf16.mxu1 %vm5156_vm7, %v17331_v20 }
 0x737   : > { %13633 = vmatmul.mubr.msk.bf16.gmra.mrb[72].mxu0 %vm5156_vm7, %v17329_v8 }
 0x738   : > { %13636 = vmatprep.mubr.msk.bf16.mxu0 %vm5156_vm7, %v17331_v20 }
 0x73c   : > { %13803 = vmatmul.mubr.msk.bf16.gmra.mrb[92].mxu1 %vm5156_vm7, %v17341_v3 }
 0x73d   : > { %13806 = vmatprep.mubr.msk.bf16.mxu1 %vm5156_vm7, %v17343_v27 }
 0x73f   : > { %13637 = vmatmul.mubr.msk.bf16.gmra.mrb[76].mxu0 %vm5156_vm7, %v17341_v3 }
 0x740   : > { %13640 = vmatprep.mubr.msk.bf16.mxu0 %vm5156_vm7, %v17343_v27 }
 0x744   : > { %13807 = vmatmul.mubr.msk.bf16.gmra.mrb[96].mxu1 %vm5156_vm7, %v17353_v25 }
 0x745   : > { %13810 = vmatprep.mubr.msk.bf16.mxu1 %vm5156_vm7, %v17355_v17 }
 0x747   : > { %13641 = vmatmul.mubr.msk.bf16.gmra.mrb[80].mxu0 %vm5156_vm7, %v17353_v25 }
 0x748   : > { %13644 = vmatprep.mubr.msk.bf16.mxu0 %vm5156_vm7, %v17355_v17 }
 0x74c   : > { %13811 = vmatmul.mubr.msk.bf16.gmra.mrb[100].mxu1 %vm5156_vm7, %v17365_v55 }
 0x74d   : > { %13814 = vmatprep.mubr.msk.bf16.mxu1 %vm5156_vm7, %v17367_v16 }
 0x74f   : > { %13645 = vmatmul.mubr.msk.bf16.gmra.mrb[84].mxu0 %vm5156_vm7, %v17365_v55 }
 0x750   : > { %13648 = vmatprep.mubr.msk.bf16.mxu0 %vm5156_vm7, %v17367_v16 }
 0x754   : > { %13815 = vmatmul.mubr.msk.bf16.gmra.mrb[72].mxu1 %vm5156_vm7, %v17377_v4 }
 0x755   : > { %13818 = vmatprep.mubr.msk.bf16.mxu1 %vm5156_vm7, %v17379_v0 }
 0x757   : > { %13649 = vmatmul.mubr.msk.bf16.gmra.mrb[88].mxu0 %vm5156_vm7, %v17377_v4 }
 0x758   : > { %13652 = vmatprep.mubr.msk.bf16.mxu0 %vm5156_vm7, %v17379_v0 }
 0x75c   : > { %13819 = vmatmul.mubr.msk.bf16.gmra.mrb[76].mxu1 %vm5156_vm7, %v17389_v46 }
 0x75d   : > { %13822 = vmatprep.mubr.msk.bf16.mxu1 %vm5156_vm7, %v17391_v51 }
 0x75f   : > { %13653 = vmatmul.mubr.msk.bf16.gmra.mrb[92].mxu0 %vm5156_vm7, %v17389_v46 }
 0x760   : > { %13658 = vmatprep.mubr.msk.bf16.mxu0 %vm5156_vm7, %v5808_v57 }
 0x764   : > { %13823 = vmatmul.mubr.msk.bf16.gmra.mrb[80].mxu1 %vm5156_vm7, %v7016_v59 }
 0x765   : > { %13828 = vmatprep.mubr.msk.bf16.mxu1 %vm5156_vm7, %v17180_v19  ;;  %v5782_v19 = vld [vmem:[#allocation4 + $0x4a] sm:$0xff] }
 0x767   : > { %13659 = vmatmul.mubr.msk.bf16.vlgmr.msra.gmra.mrb[64].mxu0 %vm5156_vm7, %v17403_v15 }
 0x768   : > { %13662 = vmatprep.mubr.msk.bf16.mxu0 %vm5156_vm7, %v17410_v43  ;;  %13691 = vmatpush3.bf16.msra.mxu0 %v17302_v10  ;;  %v17428_v10 = vpack.c.bf16 %v5783_v5, %v5782_v19  ;;  %v7919_v5 = vld [vmem:[#allocation2 + $0x51] sm:$0xff] }
 0x769   : > { %13724 = vmatprep.subr.bf16.mxu0 %v17408_v44  ;;  %v17593_v61 = vpack.c.bf16 %v7919_v5, %v7918_v11  ;;  %v7937_v5 = vld [vmem:[#allocation2 + $0x129] sm:$0xff] }
 0x76c   : > { %13829 = vmatmul.mubr.msk.bf16.vlgmr.msra.gmra.mrb[84].mxu1 %vm5156_vm7, %v17187_v37  ;;  %v5786_v37 = vld [vmem:[#allocation4 + $0x7a] sm:$0xff] }
 0x76d   : > { %13832 = vmatprep.mubr.msk.bf16.mxu1 %vm5156_vm7, %v17193_v18  ;;  %13861 = vmatpush3.bf16.msra.mxu1 %v17314_v58  ;;  %v5788_v18 = vld [vmem:[#allocation4 + $0x92] sm:$0xff]  ;;  %v5789_v58 = vld [vmem:[#allocation4 + $0x9a] sm:$0xff]  ;;  %v17442_v63 = vpack.c.bf16 %v5787_v9, %v5786_v37 }
 0x76e   : > { %15299 = vmatprep.subr.msk.bf16.mxu1 %vm3915_vm5, %v17421_v50  ;;  %v17444_v41 = vpack.c.bf16 %v5789_v58, %v5788_v18  ;;  %v7920_v37 = vld [vmem:[#allocation2 + $0x61] sm:$0xff]  ;;  %v6383_v58 = vld [vmem:[#allocation4 + $0x99] sm:$0xff] }
 0x76f   : > { %13663 = vmatmul.mubr.msk.bf16.gmra.mrb[68].mxu0 %vm5156_vm7, %v17428_v10  ;;  %v6382_v18 = vld [vmem:[#allocation4 + $0x91] sm:$0xff] }
 0x770   : > { %13666 = vmatprep.mubr.msk.bf16.mxu0 %vm5156_vm7, %v17432_v62 }
 0x774   : > { %13833 = vmatmul.mubr.msk.bf16.gmra.mrb[88].mxu1 %vm5156_vm7, %v17199_v6  ;;  %v5792_v6 = vld [vmem:[#allocation4 + $0xc2] sm:$0xff] }
 0x775   : > { %13836 = vmatprep.mubr.msk.bf16.mxu1 %vm5156_vm7, %v17205_v49  ;;  %v17454_v49 = vpack.c.bf16 %v5791_v40, %v5790_v28  ;;  %v17456_v47 = vpack.c.bf16 %v5793_v13, %v5792_v6  ;;  %v6384_v28 = vld [vmem:[#allocation4 + $0xa9] sm:$0xff]  ;;  %v6385_v40 = vld [vmem:[#allocation4 + $0xb1] sm:$0xff]  ;;  %v6409_v6 = vpack.c.bf16 %v6383_v58, %v6382_v18 }
 0x776   : > { %v6410_v13 = vpack.c.bf16 %v6385_v40, %v6384_v28  ;;  %v6398_v58 = vld [vmem:[#allocation4 + $0x151] sm:$0xff]  ;;  %v6399_v28 = vld [vmem:[#allocation4 + $0x159] sm:$0xff]  ;;  %v6400_v40 = vld [vmem:[#allocation4 + $0x169] sm:$0xff] }
 0x777   : > { %13667 = vmatmul.mubr.msk.bf16.gmra.mrb[72].mxu0 %vm5156_vm7, %v17442_v63 }
 0x778   : > { %13670 = vmatprep.mubr.msk.bf16.mxu0 %vm5156_vm7, %v17444_v41 }
 0x77c   : > { %13837 = vmatmul.mubr.msk.bf16.gmra.mrb[92].mxu1 %vm5156_vm7, %v17211_v7  ;;  %v5796_v7 = vld [vmem:[#allocation4 + $0xf2] sm:$0xff] }
 0x77d   : > { %13840 = vmatprep.mubr.msk.bf16.mxu1 %vm5156_vm7, %v17217_v12  ;;  %v17466_v12 = vpack.c.bf16 %v5795_v54, %v5794_v31  ;;  %v17468_v57 = vpack.c.bf16 %v5797_v60, %v5796_v7  ;;  %v7923_v31 = vld [vmem:[#allocation2 + $0x81] sm:$0xff]  ;;  %v7925_v54 = vld [vmem:[#allocation2 + $0x99] sm:$0xff] }
 0x77e   : > { %v7922_v7 = vld [vmem:[#allocation2 + $0x79] sm:$0xff] }
 0x77f   : > { %13671 = vmatmul.mubr.msk.bf16.gmra.mrb[76].mxu0 %vm5156_vm7, %v17454_v49  ;;  %v17603_v60 = vpack.c.bf16 %v7923_v31, %v7922_v7  ;;  %v7941_v7 = vld [vmem:[#allocation2 + $0x159] sm:$0xff] }
 0x780   : > { %13674 = vmatprep.mubr.msk.bf16.mxu0 %vm5156_vm7, %v17456_v47 }
 0x784   : > { %13841 = vmatmul.mubr.msk.bf16.gmra.mrb[96].mxu1 %vm5156_vm7, %v17223_v23  ;;  %v7295_v23 = vld [vmem:[#allocation4 + $0x181] sm:$0xff] }
 0x785   : > { %13844 = vmatprep.mubr.msk.bf16.mxu1 %vm5156_vm7, %v17229_v34  ;;  %v7296_v34 = vld [vmem:[#allocation4 + $0x189] sm:$0xff] }
 0x787   : > { %13675 = vmatmul.mubr.msk.bf16.gmra.mrb[80].mxu0 %vm5156_vm7, %v17466_v12 }
 0x788   : > { %13678 = vmatprep.mubr.msk.bf16.mxu0 %vm5156_vm7, %v17468_v57 }
 0x78c   : > { %13845 = vmatmul.mubr.msk.bf16.gmra.mrb[100].mxu1 %vm5156_vm7, %v17235_v26  ;;  %v17490_v26 = vpack.c.bf16 %v7296_v34, %v7295_v23  ;;  %v7924_v23 = vld [vmem:[#allocation2 + $0x91] sm:$0xff] }
 0x78d   : > { %13848 = vmatprep.mubr.msk.bf16.mxu1 %vm5156_vm7, %v17247_v32  ;;  %v7297_v32 = vld [vmem:[#allocation4 + $0x199] sm:$0xff]  ;;  %v17605_v34 = vpack.c.bf16 %v7925_v54, %v7924_v23  ;;  %v7939_v54 = vld [vmem:[#allocation2 + $0x141] sm:$0xff]  ;;  %v7938_v23 = vld [vmem:[#allocation2 + $0x139] sm:$0xff] }
 0x78f   : > { %13679 = vmatmul.mubr.msk.bf16.gmra.mrb[84].mxu0 %vm5156_vm7, %v17237_v33 }
 0x790   : > { %13682 = vmatprep.mubr.msk.bf16.mxu0 %vm5156_vm7, %v17245_v21 }
 0x794   : > { %13849 = vmatmul.mubr.msk.bf16.gmra.mrb[72].mxu1 %vm5156_vm7, %v17261_v38  ;;  %v7298_v38 = vld [vmem:[#allocation4 + $0x1a1] sm:$0xff] }
 0x795   : > { %13852 = vmatprep.mubr.msk.bf16.mxu1 %vm5156_vm7, %v17274_v45  ;;  %v7314_v45 = vpack.c.bf16 %v7298_v38, %v7297_v32  ;;  %v6386_v32 = vld [vmem:[#allocation4 + $0xc1] sm:$0xff]  ;;  %v6387_v38 = vld [vmem:[#allocation4 + $0xc9] sm:$0xff] }
 0x797   : > { %13683 = vmatmul.mubr.msk.bf16.gmra.mrb[88].mxu0 %vm5156_vm7, %v17263_v39 }
 0x798   : > { %13686 = vmatprep.mubr.msk.bf16.mxu0 %vm5156_vm7, %v17272_v48 }
 0x79c   : > { %13853 = vmatmul.mubr.msk.bf16.gmra.mrb[76].mxu1 %vm5156_vm7, %v17280_v42  ;;  %v8011_v42 = vsel %vm3915_vm5, %v17421_v50, 0  ;;  %v7921_v50 = vld [vmem:[#allocation2 + $0x69] sm:$0xff] }
 0x79d   : > { %13856 = vmatprep.mubr.msk.bf16.mxu1 %vm5156_vm7, %v17490_v26  ;;  %v17595_v9 = vpack.c.bf16 %v7921_v50, %v7920_v37  ;;  %v7934_v50 = vld [vmem:[#allocation2 + $0x109] sm:$0xff]  ;;  %v7936_v37 = vld [vmem:[#allocation2 + $0x121] sm:$0xff] }
 0x79e   : > { %v17635_v18 = vpack.c.bf16 %v7937_v5, %v7936_v37  ;;  %v7881_v5 = vld [vmem:[#allocation2 + $0xd8] sm:$0xff] }
 0x79f   : > { %13687 = vmatmul.mubr.msk.bf16.gmra.mrb[92].mxu0 %vm5156_vm7, %v17282_v56 }
 0x7a0   : > { %13692 = vmatprep.mubr.msk.bf16.mxu0 %vm5156_vm7, %v17297_v29  ;;  %v7911_v29 = vld [vmem:[%s18721_s9] sm:$0xf] }
 0x7a4   : > { %13857 = vmatmul.mubr.msk.bf16.gmra.mrb[80].mxu1 %vm5156_vm7, %v7314_v45  ;;  %v6388_v45 = vld [vmem:[#allocation4 + $0xd9] sm:$0xff] }
 0x7a5   : > { %13862 = vmatprep.mubr.msk.bf16.mxu1 %vm5156_vm7, %v17410_v43 }
 0x7a7   : > { %13693 = vmatmul.mubr.msk.bf16.vlgmr.msra.gmra.mrb[64].mxu0 %vm5156_vm7, %v17291_v22  ;;  %v7595_v22 = vld [vmem:[#allocation4 + $0x19a] sm:$0xff] }
 0x7a8   : > { %13696 = vmatprep.mubr.msk.bf16.mxu0 %vm5156_vm7, %v17309_v52  ;;  %13725 = vmatpush3.bf16.msra.mxu0 %v17408_v44  ;;  %v7596_v52 = vld [vmem:[#allocation4 + $0x1a2] sm:$0xff] }
 0x7a9   : > { %13758 = vmatprep.subr.bf16.mxu0 %v17153_v53  ;;  %v6381_v44 = vld [vmem:[#allocation4 + $0x81] sm:$0xff] }
 0x7aa   : > { %v6408_v19 = vpack.c.bf16 %v6381_v44, %v6380_v1  ;;  %v6397_v1 = vld [vmem:[#allocation4 + $0x141] sm:$0xff] }
 0x7ac   : > { %13863 = vmatmul.mubr.msk.bf16.vlgmr.msra.gmra.mrb[84].mxu1 %vm5156_vm7, %v17428_v10 }
 0x7ad   : > { %13866 = vmatprep.mubr.msk.bf16.mxu1 %vm5156_vm7, %v17432_v62  ;;  %13895 = vmatpush3.bf16.msra.mxu1 %v8011_v42  ;;  %v6389_v42 = vld [vmem:[#allocation4 + $0xe1] sm:$0xff] }
 0x7ae   : > { %15300 = vmatprep.subr.msk.bf16.mxu1 %vm3915_vm5, %v7911_v29 }
 0x7af   : > { %13697 = vmatmul.mubr.msk.bf16.gmra.mrb[68].mxu0 %vm5156_vm7, %v17317_v36  ;;  %v7913_v36 = vld [vmem:[#allocation2 + $0x9] sm:$0xff] }
 0x7b0   : > { %13700 = vmatprep.mubr.msk.bf16.mxu0 %vm5156_vm7, %v17329_v8 }
 0x7b4   : > { %13867 = vmatmul.mubr.msk.bf16.gmra.mrb[88].mxu1 %vm5156_vm7, %v17442_v63 }
 0x7b5   : > { %13870 = vmatprep.mubr.msk.bf16.mxu1 %vm5156_vm7, %v17444_v41 }
 0x7b7   : > { %13701 = vmatmul.mubr.msk.bf16.gmra.mrb[72].mxu0 %vm5156_vm7, %v17331_v20 }
 0x7b8   : > { %13704 = vmatprep.mubr.msk.bf16.mxu0 %vm5156_vm7, %v17341_v3  ;;  %v6374_v3 = vld [vmem:[#allocation4 + $0x31] sm:$0xff] }
 0x7bc   : > { %13871 = vmatmul.mubr.msk.bf16.gmra.mrb[92].mxu1 %vm5156_vm7, %v17454_v49 }
 0x7bd   : > { %13874 = vmatprep.mubr.msk.bf16.mxu1 %vm5156_vm7, %v17456_v47 }
 0x7bf   : > { %13705 = vmatmul.mubr.msk.bf16.gmra.mrb[76].mxu0 %vm5156_vm7, %v17343_v27  ;;  %v6375_v27 = vld [vmem:[#allocation4 + $0x39] sm:$0xff] }
 0x7c0   : > { %13708 = vmatprep.mubr.msk.bf16.mxu0 %vm5156_vm7, %v17353_v25  ;;  %v6377_v25 = vld [vmem:[#allocation4 + $0x51] sm:$0xff] }
 0x7c4   : > { %13875 = vmatmul.mubr.msk.bf16.gmra.mrb[96].mxu1 %vm5156_vm7, %v17466_v12 }
 0x7c5   : > { %13878 = vmatprep.mubr.msk.bf16.mxu1 %vm5156_vm7, %v17468_v57 }
 0x7c7   : > { %13709 = vmatmul.mubr.msk.bf16.gmra.mrb[80].mxu0 %vm5156_vm7, %v17355_v17 }
 0x7c8   : > { %13712 = vmatprep.mubr.msk.bf16.mxu0 %vm5156_vm7, %v17365_v55  ;;  %v7915_v55 = vld [vmem:[#allocation2 + $0x21] sm:$0xff] }
 0x7cc   : > { %13879 = vmatmul.mubr.msk.bf16.gmra.mrb[100].mxu1 %vm5156_vm7, %v17237_v33  ;;  %v6372_v33 = vld [vmem:[#allocation4 + $0x19] sm:$0xff] }
 0x7cd   : > { %13882 = vmatprep.mubr.msk.bf16.mxu1 %vm5156_vm7, %v17245_v21  ;;  %v6373_v21 = vld [vmem:[#allocation4 + $0x21] sm:$0xff] }
 0x7ce   : > { %v6404_v8 = vpack.c.bf16 %v6373_v21, %v6372_v33  ;;  %v6412_v33 = vpack.c.bf16 %v6389_v42, %v6388_v45  ;;  %v7927_v21 = vld [vmem:[#allocation2 + $0xb1] sm:$0xff]  ;;  %v7863_v42 = vld [vmem:[#allocation2] sm:$0xff] }
 0x7cf   : > { %13713 = vmatmul.mubr.msk.bf16.gmra.mrb[84].mxu0 %vm5156_vm7, %v17367_v16  ;;  %v7917_v16 = vld [vmem:[#allocation2 + $0x39] sm:$0xff] }
 0x7d0   : > { %13716 = vmatprep.mubr.msk.bf16.mxu0 %vm5156_vm7, %v17377_v4  ;;  %v7914_v4 = vld [vmem:[#allocation2 + $0x19] sm:$0xff] }
 0x7d4   : > { %13883 = vmatmul.mubr.msk.bf16.gmra.mrb[72].mxu1 %vm5156_vm7, %v17263_v39  ;;  %v7912_v39 = vld [vmem:[#allocation2 + $0x1] sm:$0xff] }
 0x7d5   : > { %13886 = vmatprep.mubr.msk.bf16.mxu1 %vm5156_vm7, %v17272_v48  ;;  %v7612_v48 = vpack.c.bf16 %v7596_v52, %v7595_v22  ;;  %v7944_v20 = vpack.c.bf16 %v7913_v36, %v7912_v39  ;;  %v7929_v22 = vld [vmem:[#allocation2 + $0xc9] sm:$0xff]  ;;  %v7928_v36 = vld [vmem:[#allocation2 + $0xc1] sm:$0xff] }
 0x7d6   : > { %v7926_v52 = vld [vmem:[#allocation2 + $0xa9] sm:$0xff] }
 0x7d7   : > { %13717 = vmatmul.mubr.msk.bf16.gmra.mrb[88].mxu0 %vm5156_vm7, %v17379_v0  ;;  %v17575_v0 = vpack.c.bf16 %v7915_v55, %v7914_v4  ;;  %v17613_v39 = vpack.c.bf16 %v7927_v21, %v7926_v52  ;;  %v7930_v55 = vld [vmem:[#allocation2 + $0xd9] sm:$0xff]  ;;  %v7932_v4 = vld [vmem:[#allocation2 + $0xf1] sm:$0xff]  ;;  %v7942_v21 = vld [vmem:[#allocation2 + $0x169] sm:$0xff] }
 0x7d8   : > { %13720 = vmatprep.mubr.msk.bf16.mxu0 %vm5156_vm7, %v17389_v46  ;;  %v7916_v46 = vld [vmem:[#allocation2 + $0x31] sm:$0xff] }
 0x7d9   : > { %v17578_v59 = vpack.c.bf16 %v7917_v16, %v7916_v46 }
 0x7dc   : > { %13887 = vmatmul.mubr.msk.bf16.gmra.mrb[76].mxu1 %vm5156_vm7, %v17282_v56  ;;  %v6376_v56 = vld [vmem:[#allocation4 + $0x49] sm:$0xff] }
 0x7dd   : > { %13890 = vmatprep.mubr.msk.bf16.mxu1 %vm5156_vm7, %v17289_v2  ;;  %v6405_v2 = vpack.c.bf16 %v6375_v27, %v6374_v3  ;;  %v6406_v17 = vpack.c.bf16 %v6377_v25, %v6376_v56  ;;  %v6392_v3 = vld [vmem:[#allocation4 + $0x109] sm:$0xff]  ;;  %v6393_v27 = vld [vmem:[#allocation4 + $0x111] sm:$0xff] }
 0x7de   : > { %v6414_v25 = vpack.c.bf16 %v6393_v27, %v6392_v3  ;;  %v8485_v3 = vsel %vm3915_vm5, %v17583_v30, 0 }
 0x7df   : > { %13721 = vmatmul.mubr.msk.bf16.gmra.mrb[92].mxu0 %vm5156_vm7, %v17391_v51  ;;  %v8223_v51 = vsel %vm3915_vm5, %v7911_v29, 0  ;;  %v6411_v29 = vpack.c.bf16 %v6387_v38, %v6386_v32  ;;  %v17643_v32 = vpack.c.bf16 %v7939_v54, %v7938_v23  ;;  %v7940_v38 = vld [vmem:[#allocation2 + $0x151] sm:$0xff] }
 0x7e0   : > { %13726 = vmatprep.mubr.msk.bf16.mxu0 %vm5156_vm7, %v6404_v8  ;;  %v17615_v8 = vpack.c.bf16 %v7929_v22, %v7928_v36  ;;  %v17645_v45 = vpack.c.bf16 %v7941_v7, %v7940_v38  ;;  %v7866_v36 = vld [vmem:[#allocation2 + $0x20] sm:$0xff]  ;;  %v7892_v54 = vld [vmem:[#allocation2 + $0x158] sm:$0xff]  ;;  %v7891_v38 = vld [vmem:[#allocation2 + $0x150] sm:$0xff] }
 0x7e1   : > { %v7889_v7 = vld [vmem:[#allocation2 + $0x138] sm:$0xff] }
 0x7e4   : > { %13891 = vmatmul.mubr.msk.bf16.gmra.mrb[80].mxu1 %vm5156_vm7, %v7612_v48  ;;  %v6390_v48 = vld [vmem:[#allocation4 + $0xf1] sm:$0xff] }
 0x7e5   : > { %13896 = vmatprep.mubr.msk.bf16.mxu1 %vm3247_vm3, %v7944_v20  ;;  %v6391_v20 = vld [vmem:[#allocation4 + $0xf9] sm:$0xff] }
 0x7e6   : > { %v6413_v56 = vpack.c.bf16 %v6391_v20, %v6390_v48  ;;  %v7868_v48 = vld [vmem:[#allocation2 + $0x38] sm:$0xff] }
 0x7e7   : > { %13727 = vmatmul.mubr.msk.bf16.vlgmr.msra.gmra.mrb[64].mxu0 %vm5156_vm7, %v6405_v2  ;;  %v7931_v2 = vld [vmem:[#allocation2 + $0xe1] sm:$0xff] }
 0x7e8   : > { %13730 = vmatprep.mubr.msk.bf16.mxu0 %vm5156_vm7, %v6406_v17  ;;  %13759 = vmatpush3.bf16.msra.mxu0 %v17153_v53  ;;  %v6407_v53 = vpack.c.bf16 %v6379_v24, %v6378_v14  ;;  %v7933_v17 = vld [vmem:[#allocation2 + $0xf9] sm:$0xff]  ;;  %v17623_v16 = vpack.c.bf16 %v7931_v2, %v7930_v55  ;;  %v6396_v24 = vld [vmem:[#allocation4 + $0x139] sm:$0xff] }
 0x7e9   : > { %v17625_v46 = vpack.c.bf16 %v7933_v17, %v7932_v4  ;;  %v6395_v14 = vld [vmem:[#allocation4 + $0x129] sm:$0xff] }
 0x7ea   : > { %v7871_v2 = vld [vmem:[#allocation2 + $0x60] sm:$0xff] }
 0x7eb   : > { %v7874_v55 = vld [vmem:[#allocation2 + $0x80] sm:$0xff] }
 0x7ec   : > { %13897 = vmatmul.mubr.msk.bf16.vlgmr.msra.gmra.mrb[84].mxu1 %vm3247_vm3, %v17575_v0 }
 0x7ed   : > { %13900 = vmatprep.mubr.msk.bf16.mxu1 %vm3247_vm3, %v17578_v59  ;;  %13929 = vmatpush3.bf16.msra.mxu1 %v8223_v51  ;;  %v6394_v51 = vld [vmem:[#allocation4 + $0x121] sm:$0xff] }
 0x7ee   : > { %15301 = vmatprep.subr.msk.bf16.mxu1 %vm3915_vm5, %v17583_v30  ;;  %v6415_v44 = vpack.c.bf16 %v6395_v14, %v6394_v51  ;;  %v7869_v30 = vld [vmem:[#allocation2 + $0x48] sm:$0xff]  ;;  %v7875_v51 = vld [vmem:[#allocation2 + $0x90] sm:$0xff] }
 0x7ef   : > { %13731 = vmatmul.mubr.msk.bf16.gmra.mrb[68].mxu0 %vm5156_vm7, %v6407_v53  ;;  %v6416_v53 = vpack.c.bf16 %v6397_v1, %v6396_v24  ;;  %v7878_v24 = vld [vmem:[#allocation2 + $0xb0] sm:$0xff] }
 0x7f0   : > { %13734 = vmatprep.mubr.msk.bf16.mxu0 %vm5156_vm7, %v6408_v19  ;;  %v7935_v19 = vld [vmem:[#allocation2 + $0x111] sm:$0xff] }
 0x7f1   : > { %v17633_v11 = vpack.c.bf16 %v7935_v19, %v7934_v50  ;;  %v7882_v19 = vld [vmem:[#allocation2 + $0xe0] sm:$0xff] }
 0x7f2   : > { %v17719_v50 = vpack.c.bf16 %v7882_v19, %v7881_v5  ;;  %v8398_v19 = vld [vmem:[#allocation2 + $0x92] sm:$0xff] }
 0x7f4   : > { %13901 = vmatmul.mubr.msk.bf16.gmra.mrb[88].mxu1 %vm3247_vm3, %v17593_v61 }
 0x7f5   : > { %13904 = vmatprep.mubr.msk.bf16.mxu1 %vm3247_vm3, %v17595_v9 }
 0x7f7   : > { %13735 = vmatmul.mubr.msk.bf16.gmra.mrb[72].mxu0 %vm5156_vm7, %v6409_v6  ;;  %v6401_v6 = vld [vmem:[#allocation4 + $0x171] sm:$0xff] }
 0x7f8   : > { %13738 = vmatprep.mubr.msk.bf16.mxu0 %vm5156_vm7, %v6410_v13  ;;  %v6417_v13 = vpack.c.bf16 %v6399_v28, %v6398_v58  ;;  %v6418_v31 = vpack.c.bf16 %v6401_v6, %v6400_v40  ;;  %v7886_v58 = vld [vmem:[#allocation2 + $0x110] sm:$0xff]  ;;  %v7888_v28 = vld [vmem:[#allocation2 + $0x128] sm:$0xff] }
 0x7f9   : > { %v7885_v40 = vld [vmem:[#allocation2 + $0x108] sm:$0xff] }
 0x7fa   : > { %v17727_v6 = vpack.c.bf16 %v7886_v58, %v7885_v40  ;;  %v8400_v58 = vld [vmem:[#allocation2 + $0xaa] sm:$0xff]  ;;  %v8402_v40 = vld [vmem:[#allocation2 + $0xc2] sm:$0xff] }
 0x7fc   : > { %13905 = vmatmul.mubr.msk.bf16.gmra.mrb[92].mxu1 %vm3247_vm3, %v17603_v60 }
 0x7fd   : > { %13908 = vmatprep.mubr.msk.bf16.mxu1 %vm3247_vm3, %v17605_v34 }
 0x7ff   : > { %13739 = vmatmul.mubr.msk.bf16.gmra.mrb[76].mxu0 %vm5156_vm7, %v6411_v29  ;;  %v7864_v29 = vld [vmem:[#allocation2 + $0x8] sm:$0xff] }
 0x800   : > { %13742 = vmatprep.mubr.msk.bf16.mxu0 %vm5156_vm7, %v6412_v33  ;;  %v7943_v33 = vld [vmem:[#allocation2 + $0x171] sm:$0xff]  ;;  %v7895_v22 = vpack.c.bf16 %v7864_v29, %v7863_v42  ;;  %v17737_v42 = vpack.c.bf16 %v7892_v54, %v7891_v38  ;;  %v8386_v29 = vld [vmem:[#allocation2 + $0x2] sm:$0xff] }
 0x801   : > { %v17655_v52 = vpack.c.bf16 %v7943_v33, %v7942_v21  ;;  %v8387_v33 = vld [vmem:[#allocation2 + $0xa] sm:$0xff]  ;;  %v8405_v38 = vld [vmem:[#allocation2 + $0xe2] sm:$0xff] }
 0x802   : > { %v7894_v21 = vld [vmem:[#allocation2 + $0x170] sm:$0xff] }
 0x804   : > { %13909 = vmatmul.mubr.msk.bf16.gmra.mrb[96].mxu1 %vm3247_vm3, %v17613_v39 }
 0x805   : > { %13912 = vmatprep.mubr.msk.bf16.mxu1 %vm3247_vm3, %v17615_v8 }
 0x807   : > { %13743 = vmatmul.mubr.msk.bf16.gmra.mrb[80].mxu0 %vm5156_vm7, %v6413_v56  ;;  %v17673_v56 = vld [vmem:[%s18721_s9 + $0xc] sm:$0xf] }
 0x808   : > { %13746 = vmatprep.mubr.msk.bf16.mxu0 %vm5156_vm7, %v6414_v25 }
 0x80c   : > { %13913 = vmatmul.mubr.msk.bf16.gmra.mrb[100].mxu1 %vm3247_vm3, %v17623_v16 }
 0x80d   : > { %13916 = vmatprep.mubr.msk.bf16.mxu1 %vm3247_vm3, %v17625_v46 }
 0x80f   : > { %13747 = vmatmul.mubr.msk.bf16.gmra.mrb[84].mxu0 %vm5156_vm7, %v6415_v44  ;;  %v7879_v44 = vld [vmem:[#allocation2 + $0xc0] sm:$0xff] }
 0x810   : > { %13750 = vmatprep.mubr.msk.bf16.mxu0 %vm5156_vm7, %v6416_v53 }
 0x814   : > { %13917 = vmatmul.mubr.msk.bf16.gmra.mrb[72].mxu1 %vm3247_vm3, %v17633_v11 }
 0x815   : > { %13920 = vmatprep.mubr.msk.bf16.mxu1 %vm3247_vm3, %v17635_v18 }
 0x817   : > { %13751 = vmatmul.mubr.msk.bf16.gmra.mrb[88].mxu0 %vm5156_vm7, %v6417_v13  ;;  %v7887_v13 = vld [vmem:[#allocation2 + $0x120] sm:$0xff] }
 0x818   : > { %13754 = vmatprep.mubr.msk.bf16.mxu0 %vm5156_vm7, %v6418_v31  ;;  %v7890_v31 = vld [vmem:[#allocation2 + $0x140] sm:$0xff] }
 0x819   : > { %v17735_v23 = vpack.c.bf16 %v7890_v31, %v7889_v7  ;;  %v8404_v7 = vld [vmem:[#allocation2 + $0xda] sm:$0xff] }
 0x81c   : > { %13921 = vmatmul.mubr.msk.bf16.gmra.mrb[76].mxu1 %vm3247_vm3, %v17643_v32 }
 0x81d   : > { %13924 = vmatprep.mubr.msk.bf16.mxu1 %vm3247_vm3, %v17645_v45 }
 0x81f   : > { %13755 = vmatmul.mubr.msk.bf16.gmra.mrb[92].mxu0 %vm5156_vm7, %v17490_v26  ;;  %v7865_v26 = vld [vmem:[#allocation2 + $0x18] sm:$0xff] }
 0x820   : > { %13760 = vmatprep.mubr.msk.bf16.mxu0 %vm5156_vm7, %v17403_v15  ;;  %v17664_v20 = vpack.c.bf16 %v7866_v36, %v7865_v26  ;;  %v7867_v15 = vld [vmem:[#allocation2 + $0x30] sm:$0xff]  ;;  %v8418_v36 = vpack.c.bf16 %v8387_v33, %v8386_v29  ;;  %v8388_v26 = vld [vmem:[#allocation2 + $0x1a] sm:$0xff] }
 0x821   : > { %v17668_v27 = vpack.c.bf16 %v7868_v48, %v7867_v15  ;;  %v8389_v15 = vld [vmem:[#allocation2 + $0x22] sm:$0xff]  ;;  %v8406_v29 = vld [vmem:[#allocation2 + $0xf2] sm:$0xff]  ;;  %v8407_v33 = vld [vmem:[#allocation2 + $0xfa] sm:$0xff] }
 0x824   : > { %13925 = vmatmul.mubr.msk.bf16.gmra.mrb[80].mxu1 %vm3247_vm3, %v17655_v52 }
 0x825   : > { %13930 = vmatprep.mubr.msk.bf16.mxu1 %vm3247_vm3, %v7895_v22  ;;  %v7893_v22 = vld [vmem:[#allocation2 + $0x168] sm:$0xff] }
 0x826   : > { %v17743_v48 = vpack.c.bf16 %v7894_v21, %v7893_v22  ;;  %v17786_v21 = vpack.c.bf16 %v8405_v38, %v8404_v7  ;;  %v17788_v22 = vpack.c.bf16 %v8407_v33, %v8406_v29 }
 0x827   : > { %13761 = vmatmul.mubr.msk.bf16.vlgmr.msra.gmra.mrb[64].mxu0 %vm5156_vm7, %v17410_v43  ;;  %v7870_v43 = vld [vmem:[#allocation2 + $0x50] sm:$0xff] }
 0x828   : > { %13764 = vmatprep.mubr.msk.bf16.mxu0 %vm5156_vm7, %v17428_v10  ;;  %v7872_v10 = vld [vmem:[#allocation2 + $0x68] sm:$0xff]  ;;  %v17685_v25 = vpack.c.bf16 %v7870_v43, %v7869_v30  ;;  %v8391_v43 = vld [vmem:[#allocation2 + $0x3a] sm:$0xff]  ;;  %v8779_v30 = vsel %vm3915_vm5, %v17673_v56, 0 }
 0x829   : > { %v17687_v17 = vpack.c.bf16 %v7872_v10, %v7871_v2  ;;  %v17748_v10 = vpack.c.bf16 %v8389_v15, %v8388_v26  ;;  %v8409_v26 = vld [vmem:[#allocation2 + $0x112] sm:$0xff]  ;;  %v8410_v15 = vld [vmem:[#allocation2 + $0x122] sm:$0xff] }
 0x82c   : > { %13931 = vmatmul.mubr.msk.bf16.vlgmr.msra.gmra.mrb[84].mxu1 %vm3247_vm3, %v17664_v20 }
 0x82d   : > { %13934 = vmatprep.mubr.msk.bf16.mxu1 %vm3247_vm3, %v17668_v27  ;;  %13963 = vmatpush3.bf16.msra.mxu1 %v8485_v3  ;;  %v8390_v3 = vld [vmem:[#allocation2 + $0x32] sm:$0xff] }
 0x82e   : > { %15302 = vmatprep.subr.msk.bf16.mxu1 %vm3915_vm5, %v17673_v56  ;;  %v17752_v2 = vpack.c.bf16 %v8391_v43, %v8390_v3  ;;  %v8411_v3 = vld [vmem:[#allocation2 + $0x12a] sm:$0xff] }
 0x82f   : > { %13765 = vmatmul.mubr.msk.bf16.gmra.mrb[68].mxu0 %vm5156_vm7, %v17432_v62  ;;  %v7876_v62 = vld [vmem:[#allocation2 + $0x98] sm:$0xff] }
 0x830   : > { %13768 = vmatprep.mubr.msk.bf16.mxu0 %vm5156_vm7, %v17442_v63  ;;  %v7873_v63 = vld [vmem:[#allocation2 + $0x78] sm:$0xff]  ;;  %v17699_v14 = vpack.c.bf16 %v7876_v62, %v7875_v51  ;;  %v8392_v62 = vld [vmem:[#allocation2 + $0x4a] sm:$0xff]  ;;  %v8394_v51 = vld [vmem:[#allocation2 + $0x62] sm:$0xff] }
 0x831   : > { %v17697_v4 = vpack.c.bf16 %v7874_v55, %v7873_v63  ;;  %v12189_v55 = vld [vmem:[%s18721_s9 + $0x10] sm:$0xf] }
 0x832   : > { %v8393_v63 = vld [vmem:[#allocation2 + $0x52] sm:$0xff] }
 0x833   : > { %v17762_v56 = vpack.c.bf16 %v8393_v63, %v8392_v62  ;;  %v8412_v62 = vld [vmem:[#allocation2 + $0x13a] sm:$0xff]  ;;  %v8413_v63 = vld [vmem:[#allocation2 + $0x142] sm:$0xff] }
 0x834   : > { %13935 = vmatmul.mubr.msk.bf16.gmra.mrb[88].mxu1 %vm3247_vm3, %v17685_v25 }
 0x835   : > { %13938 = vmatprep.mubr.msk.bf16.mxu1 %vm3247_vm3, %v17687_v17 }
 0x837   : > { %13769 = vmatmul.mubr.msk.bf16.gmra.mrb[72].mxu0 %vm5156_vm7, %v17444_v41  ;;  %v7880_v41 = vld [vmem:[#allocation2 + $0xc8] sm:$0xff] }
 0x838   : > { %13772 = vmatprep.mubr.msk.bf16.mxu0 %vm5156_vm7, %v17454_v49  ;;  %v7877_v49 = vld [vmem:[#allocation2 + $0xa8] sm:$0xff]  ;;  %v17711_v53 = vpack.c.bf16 %v7880_v41, %v7879_v44 }
 0x839   : > { %v17709_v1 = vpack.c.bf16 %v7878_v24, %v7877_v49  ;;  %v8395_v24 = vld [vmem:[#allocation2 + $0x6a] sm:$0xff]  ;;  %v8396_v49 = vld [vmem:[#allocation2 + $0x7a] sm:$0xff]  ;;  %v8397_v44 = vld [vmem:[#allocation2 + $0x82] sm:$0xff] }
 0x83a   : > { %v17764_v41 = vpack.c.bf16 %v8395_v24, %v8394_v51  ;;  %v17770_v5 = vpack.c.bf16 %v8397_v44, %v8396_v49  ;;  %v8414_v51 = vld [vmem:[#allocation2 + $0x152] sm:$0xff]  ;;  %v8415_v24 = vld [vmem:[#allocation2 + $0x15a] sm:$0xff]  ;;  %v17802_v49 = vpack.c.bf16 %v8413_v63, %v8412_v62 }
 0x83b   : > { %v17804_v44 = vpack.c.bf16 %v8415_v24, %v8414_v51 }
 0x83c   : > { %13939 = vmatmul.mubr.msk.bf16.gmra.mrb[92].mxu1 %vm3247_vm3, %v17697_v4 }
 0x83d   : > { %13942 = vmatprep.mubr.msk.bf16.mxu1 %vm3247_vm3, %v17699_v14 }
 0x83f   : > { %13773 = vmatmul.mubr.msk.bf16.gmra.mrb[76].mxu0 %vm5156_vm7, %v17456_v47  ;;  %v7884_v47 = vld [vmem:[#allocation2 + $0xf8] sm:$0xff] }
 0x840   : > { %13776 = vmatprep.mubr.msk.bf16.mxu0 %vm5156_vm7, %v17466_v12  ;;  %v7883_v12 = vld [vmem:[#allocation2 + $0xf0] sm:$0xff] }
 0x841   : > { %v17721_v37 = vpack.c.bf16 %v7884_v47, %v7883_v12  ;;  %v8399_v47 = vld [vmem:[#allocation2 + $0x9a] sm:$0xff] }
 0x842   : > { %v17772_v12 = vpack.c.bf16 %v8399_v47, %v8398_v19  ;;  %v8416_v19 = vld [vmem:[#allocation2 + $0x16a] sm:$0xff]  ;;  %v8417_v47 = vld [vmem:[#allocation2 + $0x172] sm:$0xff] }
 0x844   : > { %13943 = vmatmul.mubr.msk.bf16.gmra.mrb[96].mxu1 %vm3247_vm3, %v17709_v1 }
 0x845   : > { %13946 = vmatprep.mubr.msk.bf16.mxu1 %vm3247_vm3, %v17711_v53 }
 0x847   : > { %13777 = vmatmul.mubr.msk.bf16.gmra.mrb[80].mxu0 %vm5156_vm7, %v17468_v57  ;;  %v17729_v57 = vpack.c.bf16 %v7888_v28, %v7887_v13  ;;  %v8401_v28 = vld [vmem:[#allocation2 + $0xb2] sm:$0xff]  ;;  %v8403_v13 = vld [vmem:[#allocation2 + $0xca] sm:$0xff] }
 0x848   : > { %v17778_v31 = vpack.c.bf16 %v8401_v28, %v8400_v58  ;;  %v17780_v54 = vpack.c.bf16 %v8403_v13, %v8402_v40  ;;  %v17810_v58 = vpack.c.bf16 %v8417_v47, %v8416_v19  ;;  %v9073_v28 = vsel %vm3915_vm5, %v12189_v55, 0  ;;  %v12206_v40 = vld [vmem:[%s18721_s9 + $0x14] sm:$0xf] }
 0x84c   : > { %13947 = vmatmul.mubr.msk.bf16.gmra.mrb[100].mxu1 %vm3247_vm3, %v17719_v50 }
 0x84d   : > { %13950 = vmatprep.mubr.msk.bf16.mxu1 %vm3247_vm3, %v17721_v37 }
 0x854   : > { %13951 = vmatmul.mubr.msk.bf16.gmra.mrb[72].mxu1 %vm3247_vm3, %v17727_v6 }
 0x855   : > { %13954 = vmatprep.mubr.msk.bf16.mxu1 %vm3247_vm3, %v17729_v57 }
 0x85c   : > { %13955 = vmatmul.mubr.msk.bf16.gmra.mrb[76].mxu1 %vm3247_vm3, %v17735_v23 }
 0x85d   : > { %13958 = vmatprep.mubr.msk.bf16.mxu1 %vm3247_vm3, %v17737_v42 }
 0x864   : > { %13959 = vmatmul.mubr.msk.bf16.gmra.mrb[80].mxu1 %vm3247_vm3, %v17743_v48 }
 0x865   : > { %13964 = vmatprep.mubr.msk.bf16.mxu1 %vm3247_vm3, %v8418_v36  ;;  %v8408_v36 = vld [vmem:[#allocation2 + $0x10a] sm:$0xff] }
 0x866   : > { %v17794_v43 = vpack.c.bf16 %v8409_v26, %v8408_v36  ;;  %v9367_v36 = vsel %vm3915_vm5, %v12206_v40, 0 }
 0x86c   : > { %13965 = vmatmul.mubr.msk.bf16.vlgmr.msra.gmra.mrb[84].mxu1 %vm3247_vm3, %v17748_v10 }
 0x86d   : > { %13968 = vmatprep.mubr.msk.bf16.mxu1 %vm3247_vm3, %v17752_v2  ;;  %13997 = vmatpush3.bf16.msra.mxu1 %v8779_v30  ;;  %v17796_v30 = vpack.c.bf16 %v8411_v3, %v8410_v15  ;;  %v12223_v15 = vld [vmem:[%s18721_s9 + $0x18] sm:$0xf] }
 0x86e   : > { %15303 = vmatprep.subr.msk.bf16.mxu1 %vm3915_vm5, %v12189_v55  ;;  %v8710_v55 = vld [vmem:[#allocation2 + $0x180] sm:$0xff] }
 0x874   : > { %13969 = vmatmul.mubr.msk.bf16.gmra.mrb[88].mxu1 %vm3247_vm3, %v17762_v56 }
 0x875   : > { %13972 = vmatprep.mubr.msk.bf16.mxu1 %vm3247_vm3, %v17764_v41 }
 0x87c   : > { %13973 = vmatmul.mubr.msk.bf16.gmra.mrb[92].mxu1 %vm3247_vm3, %v17770_v5 }
 0x87d   : > { %13976 = vmatprep.mubr.msk.bf16.mxu1 %vm3247_vm3, %v17772_v12 }
 0x884   : > { %13977 = vmatmul.mubr.msk.bf16.gmra.mrb[96].mxu1 %vm3247_vm3, %v17778_v31 }
 0x885   : > { %13980 = vmatprep.mubr.msk.bf16.mxu1 %vm3247_vm3, %v17780_v54 }
 0x88c   : > { %13981 = vmatmul.mubr.msk.bf16.gmra.mrb[100].mxu1 %vm3247_vm3, %v17786_v21 }
 0x88d   : > { %13984 = vmatprep.mubr.msk.bf16.mxu1 %vm3247_vm3, %v17788_v22 }
 0x894   : > { %13985 = vmatmul.mubr.msk.bf16.gmra.mrb[72].mxu1 %vm3247_vm3, %v17794_v43 }
 0x895   : > { %13988 = vmatprep.mubr.msk.bf16.mxu1 %vm3247_vm3, %v17796_v30 }
 0x89c   : > { %13989 = vmatmul.mubr.msk.bf16.gmra.mrb[76].mxu1 %vm3247_vm3, %v17802_v49 }
 0x89d   : > { %13992 = vmatprep.mubr.msk.bf16.mxu1 %vm3247_vm3, %v17804_v44 }
 0x8a4   : > { %13993 = vmatmul.mubr.msk.bf16.gmra.mrb[80].mxu1 %vm3247_vm3, %v17810_v58 }
 0x8a5   : > { %13998 = vmatprep.mubr.msk.bf16.mxu1 %vm3247_vm3, %v17664_v20  ;;  %v8711_v20 = vld [vmem:[#allocation2 + $0x188] sm:$0xff] }
 0x8a6   : > { %v17849_v13 = vpack.c.bf16 %v8711_v20, %v8710_v55 }
 0x8ac   : > { %13999 = vmatmul.mubr.msk.bf16.vlgmr.msra.gmra.mrb[84].mxu1 %vm3247_vm3, %v17668_v27 }
 0x8ad   : > { %14002 = vmatprep.mubr.msk.bf16.mxu1 %vm3247_vm3, %v17685_v25  ;;  %14031 = vmatpush3.bf16.msra.mxu1 %v9073_v28 }
 0x8ae   : > { %15304 = vmatprep.subr.msk.bf16.mxu1 %vm3915_vm5, %v12206_v40 }
 0x8b4   : > { %14003 = vmatmul.mubr.msk.bf16.gmra.mrb[88].mxu1 %vm3247_vm3, %v17687_v17 }
 0x8b5   : > { %14006 = vmatprep.mubr.msk.bf16.mxu1 %vm3247_vm3, %v17697_v4 }
 0x8bc   : > { %14007 = vmatmul.mubr.msk.bf16.gmra.mrb[92].mxu1 %vm3247_vm3, %v17699_v14 }
 0x8bd   : > { %14010 = vmatprep.mubr.msk.bf16.mxu1 %vm3247_vm3, %v17709_v1 }
 0x8c4   : > { %14011 = vmatmul.mubr.msk.bf16.gmra.mrb[96].mxu1 %vm3247_vm3, %v17711_v53 }
 0x8c5   : > { %14014 = vmatprep.mubr.msk.bf16.mxu1 %vm3247_vm3, %v17719_v50 }
 0x8cc   : > { %14015 = vmatmul.mubr.msk.bf16.gmra.mrb[100].mxu1 %vm3247_vm3, %v17721_v37 }
 0x8cd   : > { %14018 = vmatprep.mubr.msk.bf16.mxu1 %vm3247_vm3, %v17727_v6 }
 0x8d4   : > { %14019 = vmatmul.mubr.msk.bf16.gmra.mrb[72].mxu1 %vm3247_vm3, %v17729_v57 }
 0x8d5   : > { %14022 = vmatprep.mubr.msk.bf16.mxu1 %vm3247_vm3, %v17735_v23 }
 0x8dc   : > { %14023 = vmatmul.mubr.msk.bf16.gmra.mrb[76].mxu1 %vm3247_vm3, %v17737_v42 }
 0x8dd   : > { %14026 = vmatprep.mubr.msk.bf16.mxu1 %vm3247_vm3, %v17743_v48 }
 0x8e2   : > { %v17851_v7 = vpop.f32.mrb[84].mxu0 }
 0x8e3   : > { %v17853_v38 = vpop.f32.mrb[85].mxu0 }
 0x8e4   : > { %14027 = vmatmul.mubr.msk.bf16.gmra.mrb[80].mxu1 %vm3247_vm3, %v17849_v13  ;;  %v17857_v29 = vpop.f32.mrb[86].mxu0 }
 0x8e5   : > { %14032 = vmatprep.mubr.msk.bf16.mxu1 %vm3247_vm3, %v17575_v0  ;;  %v17861_v33 = vpop.f32.mrb[87].mxu0 }
 0x8ea   : > { %v17864_v26 = vpop.f32.mrb[88].mxu0 }
 0x8eb   : > { %v17869_v3 = vpop.f32.mrb[89].mxu0 }
 0x8ec   : > { %14033 = vmatmul.mubr.msk.bf16.vlgmr.msra.gmra.mrb[84].mxu1 %vm3247_vm3, %v17578_v59  ;;  %v17873_v62 = vpop.f32.mrb[90].mxu0 }
 0x8ed   : > { %14036 = vmatprep.mubr.msk.bf16.mxu1 %vm3247_vm3, %v17593_v61  ;;  %14065 = vmatpush3.bf16.msra.mxu1 %v9367_v36  ;;  %v17877_v0 = vpop.f32.mrb[91].mxu0 }
 0x8ee   : > { %18753 = vst [vmem:[#allocation12_spill] sm:$0xff] %v17877_v0  ;;  %15305 = vmatprep.subr.msk.bf16.mxu1 %vm3915_vm5, %v12223_v15 }
 0x8f2   : > { %v17880_v63 = vpop.f32.mrb[92].mxu0 }
 0x8f3   : > { %18754 = vst [vmem:[#allocation13_spill] sm:$0xff] %v17880_v63  ;;  %v17882_v51 = vpop.f32.mrb[93].mxu0  ;;  %v9004_v63 = vld [vmem:[#allocation2 + $0x181] sm:$0xff] }
 0x8f4   : > { %18755 = vst [vmem:[#allocation14_spill] sm:$0xff] %v17882_v51  ;;  %14037 = vmatmul.mubr.msk.bf16.gmra.mrb[88].mxu1 %vm3247_vm3, %v17595_v9  ;;  %v17886_v24 = vpop.f32.mrb[94].mxu0  ;;  %v9005_v51 = vld [vmem:[#allocation2 + $0x189] sm:$0xff] }
 0x8f5   : > { %18756 = vst [vmem:[#allocation15_spill] sm:$0xff] %v17886_v24  ;;  %14040 = vmatprep.mubr.msk.bf16.mxu1 %vm3247_vm3, %v17603_v60  ;;  %v17890_v59 = vpop.f32.mrb[95].mxu0  ;;  %v17952_v0 = vpack.c.bf16 %v9005_v51, %v9004_v63  ;;  %v12257_v51 = vld [vmem:[%s18721_s9 + $0x20] sm:$0xf] }
 0x8f6   : > { %18757 = vst [vmem:[#allocation16_spill] sm:$0xff] %v17890_v59 }
 0x8fa   : > { %v17892_v61 = vpop.f32.mrb[64].mxu0 }
 0x8fb   : > { %v17894_v19 = vpop.f32.mrb[65].mxu0 }
 0x8fc   : > { %14041 = vmatmul.mubr.msk.bf16.gmra.mrb[92].mxu1 %vm3247_vm3, %v17605_v34  ;;  %v17898_v47 = vpop.f32.mrb[66].mxu0 }
 0x8fd   : > { %14044 = vmatprep.mubr.msk.bf16.mxu1 %vm3247_vm3, %v17613_v39  ;;  %v17902_v9 = vpop.f32.mrb[67].mxu0 }
 0x902   : > { %v17904_v28 = vpop.f32.mrb[68].mxu0 }
 0x903   : > { %v17906_v40 = vpop.f32.mrb[69].mxu0 }
 0x904   : > { %14045 = vmatmul.mubr.msk.bf16.gmra.mrb[96].mxu1 %vm3247_vm3, %v17615_v8  ;;  %v17910_v60 = vpop.f32.mrb[70].mxu0 }
 0x905   : > { %14048 = vmatprep.mubr.msk.bf16.mxu1 %vm3247_vm3, %v17623_v16  ;;  %v17914_v34 = vpop.f32.mrb[71].mxu0 }
 0x90a   : > { %v17916_v20 = vpop.f32.mrb[72].mxu0 }
 0x90b   : > { %v17918_v55 = vpop.f32.mrb[73].mxu0 }
 0x90c   : > { %14049 = vmatmul.mubr.msk.bf16.gmra.mrb[100].mxu1 %vm3247_vm3, %v17625_v46  ;;  %v17922_v39 = vpop.f32.mrb[74].mxu0 }
 0x90d   : > { %14052 = vmatprep.mubr.msk.bf16.mxu1 %vm3247_vm3, %v17633_v11  ;;  %v17926_v8 = vpop.f32.mrb[75].mxu0 }
 0x912   : > { %v17928_v36 = vpop.f32.mrb[76].mxu0 }
 0x913   : > { %v17930_v35 = vpop.f32.mrb[77].mxu0 }
 0x914   : > { %14053 = vmatmul.mubr.msk.bf16.gmra.mrb[72].mxu1 %vm3247_vm3, %v17635_v18  ;;  %v17934_v16 = vpop.f32.mrb[78].mxu0 }
 0x915   : > { %14056 = vmatprep.mubr.msk.bf16.mxu1 %vm3247_vm3, %v17643_v32  ;;  %v17938_v46 = vpop.f32.mrb[79].mxu0  ;;  %v9662_v32 = vsel %vm3915_vm5, %v12223_v15, 0 }
 0x91a   : > { %v17940_v59 = vpop.f32.mrb[80].mxu0 }
 0x91b   : > { %v17942_v24 = vpop.f32.mrb[81].mxu0 }
 0x91c   : > { %14057 = vmatmul.mubr.msk.bf16.gmra.mrb[76].mxu1 %vm3247_vm3, %v17645_v45  ;;  %v17946_v11 = vpop.f32.mrb[82].mxu0  ;;  %v12240_v45 = vld [vmem:[%s18721_s9 + $0x1c] sm:$0xf] }
 0x91d   : > { %14060 = vmatprep.mubr.msk.bf16.mxu1 %vm3247_vm3, %v17655_v52  ;;  %v17950_v18 = vpop.f32.mrb[83].mxu0  ;;  %v9298_v52 = vld [vmem:[#allocation2 + $0x182] sm:$0xff]  ;;  %v9956_v63 = vsel %vm3915_vm5, %v12240_v45, 0 }
 0x924   : > { %14061 = vmatmul.mubr.msk.bf16.gmra.mrb[80].mxu1 %vm3247_vm3, %v17952_v0 }
 0x925   : > { %14066 = vmatprep.mubr.msk.bf16.mxu1 %vm3247_vm3, %v17748_v10  ;;  %v9299_v10 = vld [vmem:[#allocation2 + $0x18a] sm:$0xff] }
 0x926   : > { %v17991_v15 = vpack.c.bf16 %v9299_v10, %v9298_v52  ;;  %v9865_v52 = vld [vmem:[#allocation2 + $0x91] sm:$0xff] }
 0x92c   : > { %14067 = vmatmul.mubr.msk.bf16.vlgmr.msra.gmra.mrb[84].mxu1 %vm3247_vm3, %v17752_v2 }
 0x92d   : > { %14070 = vmatprep.mubr.msk.bf16.mxu1 %vm3247_vm3, %v17762_v56  ;;  %14099 = vmatpush3.bf16.msra.mxu1 %v9662_v32  ;;  %v9863_v32 = vld [vmem:[#allocation2 + $0x79] sm:$0xff] }
 0x92e   : > { %15306 = vmatprep.subr.msk.bf16.mxu1 %vm3915_vm5, %v12240_v45 }
 0x934   : > { %14071 = vmatmul.mubr.msk.bf16.gmra.mrb[88].mxu1 %vm3247_vm3, %v17764_v41 }
 0x935   : > { %14074 = vmatprep.mubr.msk.bf16.mxu1 %vm3247_vm3, %v17770_v5 }
 0x93c   : > { %14075 = vmatmul.mubr.msk.bf16.gmra.mrb[92].mxu1 %vm3247_vm3, %v17772_v12 }
 0x93d   : > { %14078 = vmatprep.mubr.msk.bf16.mxu1 %vm3247_vm3, %v17778_v31 }
 0x944   : > { %14079 = vmatmul.mubr.msk.bf16.gmra.mrb[96].mxu1 %vm3247_vm3, %v17780_v54 }
 0x945   : > { %14082 = vmatprep.mubr.msk.bf16.mxu1 %vm3247_vm3, %v17786_v21 }
 0x94c   : > { %14083 = vmatmul.mubr.msk.bf16.gmra.mrb[100].mxu1 %vm3247_vm3, %v17788_v22 }
 0x94d   : > { %14086 = vmatprep.mubr.msk.bf16.mxu1 %vm3247_vm3, %v17794_v43 }
 0x954   : > { %14087 = vmatmul.mubr.msk.bf16.gmra.mrb[72].mxu1 %vm3247_vm3, %v17796_v30 }
 0x955   : > { %14090 = vmatprep.mubr.msk.bf16.mxu1 %vm3247_vm3, %v17802_v49 }
 0x95c   : > { %14091 = vmatmul.mubr.msk.bf16.gmra.mrb[76].mxu1 %vm3247_vm3, %v17804_v44 }
 0x95d   : > { %14094 = vmatprep.mubr.msk.bf16.mxu1 %vm3247_vm3, %v17810_v58 }
 0x964   : > { %14095 = vmatmul.mubr.msk.bf16.gmra.mrb[80].mxu1 %vm3247_vm3, %v17991_v15 }
 0x965   : > { %14100 = vmatprep.mubr.msk.bf16.mxu1 %vm3247_vm3, %v17668_v27  ;;  %v9593_v27 = vld [vmem:[#allocation2 + $0x198] sm:$0xff] }
 0x96c   : > { %14101 = vmatmul.mubr.msk.bf16.vlgmr.msra.gmra.mrb[84].mxu1 %vm3247_vm3, %v17685_v25  ;;  %v9594_v25 = vld [vmem:[#allocation2 + $0x1a0] sm:$0xff] }
 0x96d   : > { %14104 = vmatprep.mubr.msk.bf16.mxu1 %vm3247_vm3, %v17687_v17  ;;  %14133 = vmatpush3.bf16.msra.mxu1 %v9956_v63  ;;  %v9610_v17 = vpack.c.bf16 %v9594_v25, %v9593_v27  ;;  %v9868_v63 = vld [vmem:[#allocation2 + $0xb1] sm:$0xff]  ;;  %v9870_v27 = vld [vmem:[#allocation2 + $0xc9] sm:$0xff] }
 0x96e   : > { %15307 = vmatprep.subr.msk.bf16.mxu1 %vm3915_vm5, %v12257_v51  ;;  %v9867_v25 = vld [vmem:[#allocation2 + $0xa9] sm:$0xff] }
 0x974   : > { %14105 = vmatmul.mubr.msk.bf16.gmra.mrb[88].mxu1 %vm3247_vm3, %v17697_v4  ;;  %v9858_v4 = vld [vmem:[#allocation2 + $0x39] sm:$0xff] }
 0x975   : > { %14108 = vmatprep.mubr.msk.bf16.mxu1 %vm3247_vm3, %v17699_v14  ;;  %v9857_v14 = vld [vmem:[#allocation2 + $0x31] sm:$0xff] }
 0x97c   : > { %14109 = vmatmul.mubr.msk.bf16.gmra.mrb[92].mxu1 %vm3247_vm3, %v17709_v1  ;;  %v9889_v1 = vpack.c.bf16 %v9858_v4, %v9857_v14  ;;  %v9872_v14 = vld [vmem:[#allocation2 + $0xe1] sm:$0xff] }
 0x97d   : > { %14112 = vmatprep.mubr.msk.bf16.mxu1 %vm3247_vm3, %v17711_v53  ;;  %v9860_v53 = vld [vmem:[#allocation2 + $0x51] sm:$0xff] }
 0x984   : > { %14113 = vmatmul.mubr.msk.bf16.gmra.mrb[96].mxu1 %vm3247_vm3, %v17719_v50  ;;  %v9862_v50 = vld [vmem:[#allocation2 + $0x69] sm:$0xff] }
 0x985   : > { %14116 = vmatprep.mubr.msk.bf16.mxu1 %vm3247_vm3, %v17721_v37  ;;  %v9859_v37 = vld [vmem:[#allocation2 + $0x49] sm:$0xff] }
 0x98c   : > { %14117 = vmatmul.mubr.msk.bf16.gmra.mrb[100].mxu1 %vm3247_vm3, %v17727_v6  ;;  %v9890_v6 = vpack.c.bf16 %v9860_v53, %v9859_v37  ;;  %v9871_v53 = vld [vmem:[#allocation2 + $0xd9] sm:$0xff]  ;;  %v9873_v37 = vld [vmem:[#allocation2 + $0xf1] sm:$0xff] }
 0x98d   : > { %14120 = vmatprep.mubr.msk.bf16.mxu1 %vm3247_vm3, %v17729_v57  ;;  %v9861_v57 = vld [vmem:[#allocation2 + $0x61] sm:$0xff] }
 0x994   : > { %14121 = vmatmul.mubr.msk.bf16.gmra.mrb[72].mxu1 %vm3247_vm3, %v17735_v23  ;;  %v10250_v23 = vsel %vm3915_vm5, %v12257_v51, 0  ;;  %v9894_v51 = vpack.c.bf16 %v9868_v63, %v9867_v25 }
 0x995   : > { %14124 = vmatprep.mubr.msk.bf16.mxu1 %vm3247_vm3, %v17737_v42  ;;  %v9891_v42 = vpack.c.bf16 %v9862_v50, %v9861_v57  ;;  %v9896_v50 = vpack.c.bf16 %v9872_v14, %v9871_v53  ;;  %v9876_v57 = vld [vmem:[#allocation2 + $0x111] sm:$0xff]  ;;  %v9887_v14 = vld [vmem:[#allocation2 + $0x199] sm:$0xff] }
 0x99c   : > { %14125 = vmatmul.mubr.msk.bf16.gmra.mrb[76].mxu1 %vm3247_vm3, %v17743_v48  ;;  %v9864_v48 = vld [vmem:[#allocation2 + $0x81] sm:$0xff] }
 0x99d   : > { %14128 = vmatprep.mubr.msk.bf16.mxu1 %vm3247_vm3, %v17849_v13  ;;  %v9866_v13 = vld [vmem:[#allocation2 + $0x99] sm:$0xff]  ;;  %v9892_v45 = vpack.c.bf16 %v9864_v48, %v9863_v32 }
 0x99e   : > { %v9893_v10 = vpack.c.bf16 %v9866_v13, %v9865_v52  ;;  %v9877_v13 = vld [vmem:[#allocation2 + $0x121] sm:$0xff]  ;;  %v9882_v52 = vld [vmem:[#allocation2 + $0x159] sm:$0xff] }
 0x9a4   : > { %14129 = vmatmul.mubr.msk.bf16.gmra.mrb[80].mxu1 %vm3247_vm3, %v9610_v17  ;;  %v9869_v17 = vld [vmem:[#allocation2 + $0xc1] sm:$0xff] }
 0x9a5   : > { %14134 = vmatprep.mubr.msk.bf16.mxu1 %vm3247_vm3, %v9889_v1  ;;  %v9895_v4 = vpack.c.bf16 %v9870_v27, %v9869_v17  ;;  %v9874_v1 = vld [vmem:[#allocation2 + $0xf9] sm:$0xff]  ;;  %v9881_v27 = vld [vmem:[#allocation2 + $0x151] sm:$0xff]  ;;  %v9883_v17 = vld [vmem:[#allocation2 + $0x169] sm:$0xff] }
 0x9a6   : > { %v9901_v25 = vpack.c.bf16 %v9882_v52, %v9881_v27 }
 0x9ac   : > { %14135 = vmatmul.mubr.msk.bf16.vlgmr.msra.gmra.mrb[84].mxu1 %vm3247_vm3, %v9890_v6  ;;  %v9897_v6 = vpack.c.bf16 %v9874_v1, %v9873_v37  ;;  %v9888_v1 = vld [vmem:[#allocation2 + $0x1a1] sm:$0xff] }
 0x9ad   : > { %14138 = vmatprep.mubr.msk.bf16.mxu1 %vm3247_vm3, %v9891_v42  ;;  %14167 = vmatpush3.bf16.msra.mxu1 %v10250_v23  ;;  %v9878_v23 = vld [vmem:[#allocation2 + $0x129] sm:$0xff]  ;;  %v9904_v53 = vpack.c.bf16 %v9888_v1, %v9887_v14 }
 0x9ae   : > { %v9875_v42 = vld [vmem:[#allocation2 + $0x109] sm:$0xff]  ;;  %v9899_v32 = vpack.c.bf16 %v9878_v23, %v9877_v13 }
 0x9af   : > { %v9898_v48 = vpack.c.bf16 %v9876_v57, %v9875_v42 }
 0x9b4   : > { %14139 = vmatmul.mubr.msk.bf16.gmra.mrb[88].mxu1 %vm3247_vm3, %v9892_v45  ;;  %v9880_v45 = vld [vmem:[#allocation2 + $0x141] sm:$0xff] }
 0x9b5   : > { %14142 = vmatprep.mubr.msk.bf16.mxu1 %vm3247_vm3, %v9893_v10  ;;  %v9879_v10 = vld [vmem:[#allocation2 + $0x139] sm:$0xff] }
 0x9b6   : > { %v9900_v63 = vpack.c.bf16 %v9880_v45, %v9879_v10 }
 0x9bc   : > { %14143 = vmatmul.mubr.msk.bf16.gmra.mrb[92].mxu1 %vm3247_vm3, %v9894_v51  ;;  %v9884_v51 = vld [vmem:[#allocation2 + $0x171] sm:$0xff] }
 0x9bd   : > { %14146 = vmatprep.mubr.msk.bf16.mxu1 %vm3247_vm3, %v9895_v4  ;;  %v9902_v4 = vpack.c.bf16 %v9884_v51, %v9883_v17 }
 0x9c4   : > { %14147 = vmatmul.mubr.msk.bf16.gmra.mrb[96].mxu1 %vm3247_vm3, %v9896_v50 }
 0x9c5   : > { %14150 = vmatprep.mubr.msk.bf16.mxu1 %vm3247_vm3, %v9897_v6 }
 0x9cc   : > { %14151 = vmatmul.mubr.msk.bf16.gmra.mrb[100].mxu1 %vm3247_vm3, %v9898_v48 }
 0x9cd   : > { %14154 = vmatprep.mubr.msk.bf16.mxu1 %vm3247_vm3, %v9899_v32 }
 0x9d4   : > { %14155 = vmatmul.mubr.msk.bf16.gmra.mrb[72].mxu1 %vm3247_vm3, %v9900_v63 }
 0x9d5   : > { %14158 = vmatprep.mubr.msk.bf16.mxu1 %vm3247_vm3, %v9901_v25 }
 0x9dc   : > { %14159 = vmatmul.mubr.msk.bf16.gmra.mrb[76].mxu1 %vm3247_vm3, %v9902_v4 }
 0x9dd   : > { %14162 = vmatprep.mubr.msk.bf16.mxu1 %vm3247_vm3, %v17952_v0 }
 0x9e4   : > { %14163 = vmatmul.mubr.msk.bf16.gmra.mrb[80].mxu1 %vm3247_vm3, %v9904_v53 }
 0x9e5   : > { %14168 = vmatprep.mubr.msk.bf16.mxu1 %vm3247_vm3, %v17752_v2  ;;  %v10181_v2 = vld [vmem:[#allocation2 + $0x19a] sm:$0xff] }
 0x9ec   : > { %14169 = vmatmul.mubr.msk.bf16.vlgmr.msra.gmra.mrb[84].mxu1 %vm3247_vm3, %v17762_v56  ;;  %v10182_v56 = vld [vmem:[#allocation2 + $0x1a2] sm:$0xff] }
 0x9ed   : > { %14172 = vmatprep.mubr.msk.bf16.mxu1 %vm3247_vm3, %v17764_v41  ;;  %v10198_v41 = vpack.c.bf16 %v10182_v56, %v10181_v2 }
 0x9f4   : > { %14173 = vmatmul.mubr.msk.bf16.gmra.mrb[88].mxu1 %vm3247_vm3, %v17770_v5  ;;  %v10564_v5 = vld [vmem:[%s18723_s11] sm:$0xf] }
 0x9f5   : > { %14176 = vmatprep.mubr.msk.bf16.mxu1 %vm3247_vm3, %v17772_v12  ;;  %15308 = vmatprep.subr.msk.bf16.mxu0 %vm3915_vm5, %v10564_v5  ;;  %v10621_v12 = vsel %vm3915_vm5, %v10564_v5, 0 }
 0x9f6   : > { %14201 = vmatpush3.bf16.msra.mxu0 %v10621_v12 }
 0x9fc   : > { %14177 = vmatmul.mubr.msk.bf16.gmra.mrb[92].mxu1 %vm3247_vm3, %v17778_v31 }
 0x9fd   : > { %14180 = vmatprep.mubr.msk.bf16.mxu1 %vm3247_vm3, %v17780_v54  ;;  %v18088_v54 = vld [vmem:[%s18722_s10] ss:$0 sm:$0xff] }
 0xa04   : > { %14181 = vmatmul.mubr.msk.bf16.gmra.mrb[96].mxu1 %vm3247_vm3, %v17786_v21 }
 0xa05   : > { %14184 = vmatprep.mubr.msk.bf16.mxu1 %vm3247_vm3, %v17788_v22 }
 0xa0c   : > { %14185 = vmatmul.mubr.msk.bf16.gmra.mrb[100].mxu1 %vm3247_vm3, %v17794_v43 }
 0xa0d   : > { %14188 = vmatprep.mubr.msk.bf16.mxu1 %vm3247_vm3, %v17796_v30 }
 0xa14   : > { %14189 = vmatmul.mubr.msk.bf16.gmra.mrb[72].mxu1 %vm3247_vm3, %v17802_v49 }
 0xa15   : > { %14192 = vmatprep.mubr.msk.bf16.mxu1 %vm3247_vm3, %v17804_v44 }
 0xa1c   : > { %14193 = vmatmul.mubr.msk.bf16.gmra.mrb[76].mxu1 %vm3247_vm3, %v17810_v58 }
 0xa1d   : > { %14196 = vmatprep.mubr.msk.bf16.mxu1 %vm3247_vm3, %v17991_v15 }
 0xa24   : > { %14197 = vmatmul.mubr.msk.bf16.gmra.mrb[80].mxu1 %vm3247_vm3, %v10198_v41 }
 0xabf   : > { %v14170_v31 = vpop.f32.mrb[84].mxu1 }
 0xac0   : > { %v14426_v21 = vadd.f32 %v14170_v31, %v17892_v61  ;;  %v10286_v22 = vpop.f32.mrb[85].mxu1 }
 0xac1   : > { %v14427_v43 = vadd.f32 %v10286_v22, %v17894_v19  ;;  %v14171_v30 = vpop.f32.mrb[86].mxu1 }
 0xac2   : > { %v10486_v49 = vadd.f32 %v14426_v21, %v18088_v54  ;;  %v14428_v44 = vadd.f32 %v14171_v30, %v17898_v47  ;;  %v10289_v58 = vpop.f32.mrb[87].mxu1 }
 0xac3   : > { %v10484_v0 = vadd.f32 %v14427_v43, %v18088_v54  ;;  %v14429_v15 = vadd.f32 %v10289_v58, %v17902_v9 }
 0xac4   : > { %v10487_v50 = vadd.f32 %v14428_v44, %v18088_v54  ;;  %v10518_v6 = vmax.f32 %v10486_v49, 0.0 }
 0xac5   : > { %v10485_v37 = vadd.f32 %v14429_v15, %v18088_v54  ;;  %v10516_v61 = vmax.f32 %v10484_v0, 0.0 }
 0xac6   : > { %v10519_v57 = vmax.f32 %v10487_v50, 0.0 }
 0xac7   : > { %v10517_v23 = vmax.f32 %v10485_v37, 0.0  ;;  %v14174_v42 = vpop.f32.mrb[88].mxu1 }
 0xac8   : > { %v10549_v19 = vpack.c.bf16 %v10519_v57, %v10518_v6  ;;  %v14430_v48 = vadd.f32 %v14174_v42, %v17904_v28  ;;  %v10302_v13 = vpop.f32.mrb[89].mxu1 }
 0xac9   : > { %v10548_v32 = vpack.c.bf16 %v10517_v23, %v10516_v61  ;;  %v14431_v47 = vadd.f32 %v10302_v13, %v17906_v40  ;;  %v14175_v45 = vpop.f32.mrb[90].mxu1 }
 0xaca   : > { %v10490_v52 = vadd.f32 %v14430_v48, %v18088_v54  ;;  %v14432_v9 = vadd.f32 %v14175_v45, %v17910_v60  ;;  %v10305_v10 = vpop.f32.mrb[91].mxu1 }
 0xacb   : > { %v10488_v63 = vadd.f32 %v14431_v47, %v18088_v54  ;;  %v14433_v27 = vadd.f32 %v10305_v10, %v17914_v34  ;;  %14202 = vmatprep.mubr.msk.bf16.mxu0 %vm3247_vm3, %v10548_v32 }
 0xacc   : > { %v10491_v25 = vadd.f32 %v14432_v9, %v18088_v54  ;;  %14203 = vmatmul.mubr.msk.bf16.vlgmr.msra.gmra.mrb[96].mxu0 %vm3247_vm3, %v10549_v19  ;;  %v10522_v51 = vmax.f32 %v10490_v52, 0.0 }
 0xacd   : > { %v10489_v28 = vadd.f32 %v14433_v27, %v18088_v54  ;;  %v10520_v17 = vmax.f32 %v10488_v63, 0.0 }
 0xace   : > { %v10523_v40 = vmax.f32 %v10491_v25, 0.0 }
 0xacf   : > { %v10521_v4 = vmax.f32 %v10489_v28, 0.0  ;;  %v14178_v14 = vpop.f32.mrb[92].mxu1 }
 0xad0   : > { %v10551_v1 = vpack.c.bf16 %v10523_v40, %v10522_v51  ;;  %v14434_v60 = vadd.f32 %v14178_v14, %v17916_v20  ;;  %v10318_v53 = vpop.f32.mrb[93].mxu1 }
 0xad1   : > { %v10550_v2 = vpack.c.bf16 %v10521_v4, %v10520_v17  ;;  %v14435_v34 = vadd.f32 %v10318_v53, %v17918_v55  ;;  %v14179_v56 = vpop.f32.mrb[94].mxu1 }
 0xad2   : > { %v10494_v41 = vadd.f32 %v14434_v60, %v18088_v54  ;;  %v14436_v5 = vadd.f32 %v14179_v56, %v17922_v39  ;;  %v10321_v12 = vpop.f32.mrb[95].mxu1 }
 0xad3   : > { %v10492_v31 = vadd.f32 %v14435_v34, %v18088_v54  ;;  %v14437_v21 = vadd.f32 %v10321_v12, %v17926_v8  ;;  %14206 = vmatprep.mubr.msk.bf16.mxu0 %vm3247_vm3, %v10550_v2 }
 0xad4   : > { %v10495_v22 = vadd.f32 %v14436_v5, %v18088_v54  ;;  %14207 = vmatmul.mubr.msk.bf16.gmra.mrb[100].mxu0 %vm3247_vm3, %v10551_v1  ;;  %v10526_v43 = vmax.f32 %v10494_v41, 0.0 }
 0xad5   : > { %v10493_v20 = vadd.f32 %v14437_v21, %v18088_v54  ;;  %v10524_v30 = vmax.f32 %v10492_v31, 0.0 }
 0xad6   : > { %v10527_v55 = vmax.f32 %v10495_v22, 0.0 }
 0xad7   : > { %v10525_v49 = vmax.f32 %v10493_v20, 0.0  ;;  %v14182_v44 = vpop.f32.mrb[96].mxu1 }
 0xad8   : > { %v10553_v58 = vpack.c.bf16 %v10527_v55, %v10526_v43  ;;  %v14438_v39 = vadd.f32 %v14182_v44, %v17928_v36  ;;  %v10334_v0 = vpop.f32.mrb[97].mxu1 }
 0xad9   : > { %v10552_v15 = vpack.c.bf16 %v10525_v49, %v10524_v30  ;;  %v14439_v8 = vadd.f32 %v10334_v0, %v17930_v35  ;;  %v14183_v50 = vpop.f32.mrb[98].mxu1 }
 0xada   : > { %v10498_v37 = vadd.f32 %v14438_v39, %v18088_v54  ;;  %v14440_v6 = vadd.f32 %v14183_v50, %v17934_v16  ;;  %v10337_v57 = vpop.f32.mrb[99].mxu1 }
 0xadb   : > { %v10496_v61 = vadd.f32 %v14439_v8, %v18088_v54  ;;  %v14441_v23 = vadd.f32 %v10337_v57, %v17938_v46  ;;  %14210 = vmatprep.mubr.msk.bf16.mxu0 %vm3247_vm3, %v10552_v15  ;;  %v18758_v8 = vld [vmem:[#allocation12_spill] sm:$0xff] }
 0xadc   : > { %v10499_v42 = vadd.f32 %v14440_v6, %v18088_v54  ;;  %14211 = vmatmul.mubr.msk.bf16.gmra.mrb[104].mxu0 %vm3247_vm3, %v10553_v58  ;;  %v10530_v19 = vmax.f32 %v10498_v37, 0.0 }
 0xadd   : > { %v10497_v36 = vadd.f32 %v14441_v23, %v18088_v54  ;;  %v10528_v48 = vmax.f32 %v10496_v61, 0.0 }
 0xade   : > { %v10531_v35 = vmax.f32 %v10499_v42, 0.0 }
 0xadf   : > { %v10529_v13 = vmax.f32 %v10497_v36, 0.0  ;;  %v14186_v32 = vpop.f32.mrb[100].mxu1 }
 0xae0   : > { %v10555_v47 = vpack.c.bf16 %v10531_v35, %v10530_v19  ;;  %v14442_v16 = vadd.f32 %v14186_v32, %v17940_v59  ;;  %v10350_v45 = vpop.f32.mrb[101].mxu1 }
 0xae1   : > { %v10554_v52 = vpack.c.bf16 %v10529_v13, %v10528_v48  ;;  %v14443_v46 = vadd.f32 %v10350_v45, %v17942_v24  ;;  %v14187_v9 = vpop.f32.mrb[102].mxu1  ;;  %v18760_v48 = vld [vmem:[#allocation14_spill] sm:$0xff] }
 0xae2   : > { %v10502_v10 = vadd.f32 %v14442_v16, %v18088_v54  ;;  %v14444_v63 = vadd.f32 %v14187_v9, %v17946_v11  ;;  %v10353_v27 = vpop.f32.mrb[103].mxu1  ;;  %v18761_v16 = vld [vmem:[#allocation15_spill] sm:$0xff]  ;;  %v18762_v9 = vld [vmem:[#allocation16_spill] sm:$0xff] }
 0xae3   : > { %v10500_v25 = vadd.f32 %v14443_v46, %v18088_v54  ;;  %v14445_v28 = vadd.f32 %v10353_v27, %v17950_v18  ;;  %14214 = vmatprep.mubr.msk.bf16.mxu0 %vm3247_vm3, %v10554_v52 }
 0xae4   : > { %v10503_v51 = vadd.f32 %v14444_v63, %v18088_v54  ;;  %14215 = vmatmul.mubr.msk.bf16.gmra.mrb[108].mxu0 %vm3247_vm3, %v10555_v47  ;;  %v10534_v40 = vmax.f32 %v10502_v10, 0.0 }
 0xae5   : > { %v10501_v59 = vadd.f32 %v14445_v28, %v18088_v54  ;;  %v10532_v17 = vmax.f32 %v10500_v25, 0.0 }
 0xae6   : > { %v10535_v24 = vmax.f32 %v10503_v51, 0.0 }
 0xae7   : > { %v10533_v4 = vmax.f32 %v10501_v59, 0.0  ;;  %v14190_v14 = vpop.f32.mrb[72].mxu1 }
 0xae8   : > { %v10557_v1 = vpack.c.bf16 %v10535_v24, %v10534_v40  ;;  %v14446_v11 = vadd.f32 %v14190_v14, %v17851_v7  ;;  %v10366_v60 = vpop.f32.mrb[73].mxu1 }
 0xae9   : > { %v10556_v53 = vpack.c.bf16 %v10533_v4, %v10532_v17  ;;  %v14447_v18 = vadd.f32 %v10366_v60, %v17853_v38  ;;  %v14191_v2 = vpop.f32.mrb[74].mxu1  ;;  %v18174_v17 = vld [vmem:[%s18724_s12] ss:$0 sm:$0xff] }
 0xaea   : > { %v10506_v34 = vadd.f32 %v14446_v11, %v18088_v54  ;;  %v14448_v56 = vadd.f32 %v14191_v2, %v17857_v29  ;;  %v10369_v41 = vpop.f32.mrb[75].mxu1 }
 0xaeb   : > { %v10504_v5 = vadd.f32 %v14447_v18, %v18088_v54  ;;  %v14449_v12 = vadd.f32 %v10369_v41, %v17861_v33  ;;  %14218 = vmatprep.mubr.msk.bf16.mxu0 %vm3247_vm3, %v10556_v53 }
 0xaec   : > { %v10507_v31 = vadd.f32 %v14448_v56, %v18088_v54  ;;  %14219 = vmatmul.mubr.msk.bf16.gmra.mrb[112].mxu0 %vm3247_vm3, %v10557_v1  ;;  %v10538_v21 = vmax.f32 %v10506_v34, 0.0 }
 0xaed   : > { %v10505_v7 = vadd.f32 %v14449_v12, %v18088_v54  ;;  %v10536_v22 = vmax.f32 %v10504_v5, 0.0 }
 0xaee   : > { %v10539_v38 = vmax.f32 %v10507_v31, 0.0 }
 0xaef   : > { %v10537_v20 = vmax.f32 %v10505_v7, 0.0  ;;  %v14194_v43 = vpop.f32.mrb[76].mxu1 }
 0xaf0   : > { %v10559_v55 = vpack.c.bf16 %v10539_v38, %v10538_v21  ;;  %v14450_v29 = vadd.f32 %v14194_v43, %v17864_v26  ;;  %v10382_v30 = vpop.f32.mrb[77].mxu1 }
 0xaf1   : > { %v10558_v49 = vpack.c.bf16 %v10537_v20, %v10536_v22  ;;  %v14451_v33 = vadd.f32 %v10382_v30, %v17869_v3  ;;  %v14195_v44 = vpop.f32.mrb[78].mxu1 }
 0xaf2   : > { %v10510_v58 = vadd.f32 %v14450_v29, %v18088_v54  ;;  %v14452_v39 = vadd.f32 %v14195_v44, %v17873_v62  ;;  %v10385_v0 = vpop.f32.mrb[79].mxu1  ;;  %v18759_v62 = vld [vmem:[#allocation13_spill] sm:$0xff] }
 0xaf3   : > { %v10508_v15 = vadd.f32 %v14451_v33, %v18088_v54  ;;  %v14453_v50 = vadd.f32 %v10385_v0, %v18758_v8  ;;  %14222 = vmatprep.mubr.msk.bf16.mxu0 %vm3247_vm3, %v10558_v49 }
 0xaf4   : > { %v10511_v37 = vadd.f32 %v14452_v39, %v18088_v54  ;;  %14223 = vmatmul.mubr.msk.bf16.gmra.mrb[116].mxu0 %vm3247_vm3, %v10559_v55  ;;  %v10542_v6 = vmax.f32 %v10510_v58, 0.0 }
 0xaf5   : > { %v10509_v26 = vadd.f32 %v14453_v50, %v18088_v54  ;;  %v10540_v57 = vmax.f32 %v10508_v15, 0.0 }
 0xaf6   : > { %v10543_v3 = vmax.f32 %v10511_v37, 0.0 }
 0xaf7   : > { %v10541_v61 = vmax.f32 %v10509_v26, 0.0  ;;  %v14198_v23 = vpop.f32.mrb[80].mxu1 }
 0xaf8   : > { %v10561_v42 = vpack.c.bf16 %v10543_v3, %v10542_v6  ;;  %v14454_v36 = vadd.f32 %v14198_v23, %v18759_v62  ;;  %v10398_v19 = vpop.f32.mrb[81].mxu1 }
 0xaf9   : > { %v10560_v35 = vpack.c.bf16 %v10541_v61, %v10540_v57  ;;  %v14455_v13 = vadd.f32 %v10398_v19, %v18760_v48  ;;  %v14199_v32 = vpop.f32.mrb[82].mxu1 }
 0xafa   : > { %v10514_v47 = vadd.f32 %v14454_v36, %v18088_v54  ;;  %v14456_v45 = vadd.f32 %v14199_v32, %v18761_v16  ;;  %v10401_v52 = vpop.f32.mrb[83].mxu1 }
 0xafb   : > { %v10512_v46 = vadd.f32 %v14455_v13, %v18088_v54  ;;  %v14457_v10 = vadd.f32 %v10401_v52, %v18762_v9  ;;  %14226 = vmatprep.mubr.msk.bf16.mxu0 %vm3247_vm3, %v10560_v35 }
 0xafc   : > { %v10515_v63 = vadd.f32 %v14456_v45, %v18088_v54  ;;  %14227 = vmatmul.mubr.msk.bf16.gmra.mrb[120].mxu0 %vm3247_vm3, %v10561_v42  ;;  %v10546_v25 = vmax.f32 %v10514_v47, 0.0 }
 0xafd   : > { %v10513_v27 = vadd.f32 %v14457_v10, %v18088_v54  ;;  %v10544_v51 = vmax.f32 %v10512_v46, 0.0 }
 0xafe   : > { %v10547_v28 = vmax.f32 %v10515_v63, 0.0 }
 0xaff   : > { %v10545_v59 = vmax.f32 %v10513_v27, 0.0 }
 0xb00   : > { %v10563_v40 = vpack.c.bf16 %v10547_v28, %v10546_v25 }
 0xb01   : > { %v10562_v24 = vpack.c.bf16 %v10545_v59, %v10544_v51 }
 0xb03   : > { %14230 = vmatprep.mubr.msk.bf16.mxu0 %vm3247_vm3, %v10562_v24 }
 0xb04   : > { %14231 = vmatmul.mubr.msk.bf16.gmra.mrb[124].mxu0 %vm3247_vm3, %v10563_v40 }
 0xb9f   : > { %v14204_v54 = vpop.f32.mrb[96].mxu0 }
 0xba0   : > { %v18182_v4 = vadd.f32 %v14204_v54, %v18174_v17  ;;  %v10657_v14 = vpop.f32.mrb[97].mxu0 }
 0xba1   : > { %v18185_v1 = vadd.f32 %v18174_v17, %v10657_v14  ;;  %v14205_v11 = vpop.f32.mrb[98].mxu0 }
 0xba2   : > { %10787 = vst.msk [vmem:[%s18179_s23 + $0x10] sm:$0xff] %vm10784_vm9, %v18182_v4  ;;  %v18191_v60 = vadd.f32 %v14205_v11, %v18174_v17  ;;  %v10660_v53 = vpop.f32.mrb[99].mxu0  ;;  %v10823_v18 = vsel %vm10784_vm9, %v18182_v4, -inf }
 0xba3   : > { %10785 = vst.msk [vmem:[%s18179_s23] sm:$0xff] %vm10784_vm9, %v18185_v1  ;;  %v18199_v2 = vadd.f32 %v18174_v17, %v10660_v53  ;;  %10824 = vmax.xlane.f32.xlu0 %v10823_v18  ;;  %v10817_v34 = vsel %vm10784_vm9, %v18185_v1, -inf }
 0xba4   : > { %10788 = vst.msk [vmem:[%s18179_s23 + $0x18] sm:$0xff] %vm10784_vm9, %v18191_v60  ;;  %10818 = vmax.xlane.f32.xlu1 %v10817_v34  ;;  %v10826_v41 = vsel %vm10784_vm9, %v18191_v60, -inf }
 0xba5   : > { %10786 = vst.msk [vmem:[%s18179_s23 + $0x8] sm:$0xff] %vm10784_vm9, %v18199_v2  ;;  %v10820_v43 = vsel %vm10784_vm9, %v18199_v2, -inf }
 0xba7   : > { %v14208_v56 = vpop.f32.mrb[100].mxu0 }
 0xba8   : > { %v18212_v5 = vadd.f32 %v14208_v56, %v18174_v17  ;;  %10827 = vmax.xlane.f32.xlu1 %v10826_v41  ;;  %v10673_v12 = vpop.f32.mrb[101].mxu0 }
 0xba9   : > { %v18215_v31 = vadd.f32 %v18174_v17, %v10673_v12  ;;  %v14209_v7 = vpop.f32.mrb[102].mxu0 }
 0xbaa   : > { %10791 = vst.msk [vmem:[%s18179_s23 + $0x30] sm:$0xff] %vm10784_vm9, %v18212_v5  ;;  %v18221_v21 = vadd.f32 %v14209_v7, %v18174_v17  ;;  %v10676_v38 = vpop.f32.mrb[103].mxu0  ;;  %v10835_v22 = vsel %vm10784_vm9, %v18212_v5, -inf }
 0xbab   : > { %10789 = vst.msk [vmem:[%s18179_s23 + $0x20] sm:$0xff] %vm10784_vm9, %v18215_v31  ;;  %v18229_v20 = vadd.f32 %v18174_v17, %v10676_v38  ;;  %10836 = vmax.xlane.f32.xlu0 %v10835_v22  ;;  %v10829_v55 = vsel %vm10784_vm9, %v18215_v31, -inf }
 0xbac   : > { %10792 = vst.msk [vmem:[%s18179_s23 + $0x38] sm:$0xff] %vm10784_vm9, %v18221_v21  ;;  %10821 = vmax.xlane.f32.xlu1 %v10820_v43  ;;  %v10838_v30 = vsel %vm10784_vm9, %v18221_v21, -inf }
 0xbad   : > { %10790 = vst.msk [vmem:[%s18179_s23 + $0x28] sm:$0xff] %vm10784_vm9, %v18229_v20  ;;  %v10832_v50 = vsel %vm10784_vm9, %v18229_v20, -inf }
 0xbaf   : > { %10830 = vmax.xlane.f32.xlu0 %v10829_v55  ;;  %v14212_v29 = vpop.f32.mrb[104].mxu0 }
 0xbb0   : > { %v18244_v49 = vadd.f32 %v14212_v29, %v18174_v17  ;;  %10839 = vmax.xlane.f32.xlu1 %v10838_v30  ;;  %v10689_v33 = vpop.f32.mrb[105].mxu0 }
 0xbb1   : > { %v18247_v44 = vadd.f32 %v18174_v17, %v10689_v33  ;;  %v14213_v58 = vpop.f32.mrb[106].mxu0 }
 0xbb2   : > { %10795 = vst.msk [vmem:[%s18179_s23 + $0x50] sm:$0xff] %vm10784_vm9, %v18244_v49  ;;  %v18253_v39 = vadd.f32 %v14213_v58, %v18174_v17  ;;  %v10692_v0 = vpop.f32.mrb[107].mxu0  ;;  %v10847_v15 = vsel %vm10784_vm9, %v18244_v49, -inf }
 0xbb3   : > { %10793 = vst.msk [vmem:[%s18179_s23 + $0x40] sm:$0xff] %vm10784_vm9, %v18247_v44  ;;  %v18261_v8 = vadd.f32 %v18174_v17, %v10692_v0  ;;  %10848 = vmax.xlane.f32.xlu0 %v10847_v15  ;;  %v10841_v37 = vsel %vm10784_vm9, %v18247_v44, -inf }
 0xbb4   : > { %10796 = vst.msk [vmem:[%s18179_s23 + $0x58] sm:$0xff] %vm10784_vm9, %v18253_v39  ;;  %10833 = vmax.xlane.f32.xlu1 %v10832_v50  ;;  %v10850_v6 = vsel %vm10784_vm9, %v18253_v39, -inf }
 0xbb5   : > { %10794 = vst.msk [vmem:[%s18179_s23 + $0x48] sm:$0xff] %vm10784_vm9, %v18261_v8  ;;  %v10844_v19 = vsel %vm10784_vm9, %v18261_v8, -inf }
 0xbb7   : > { %10842 = vmax.xlane.f32.xlu0 %v10841_v37  ;;  %v14216_v26 = vpop.f32.mrb[108].mxu0 }
 0xbb8   : > { %v18276_v3 = vadd.f32 %v14216_v26, %v18174_v17  ;;  %10851 = vmax.xlane.f32.xlu1 %v10850_v6  ;;  %v10705_v57 = vpop.f32.mrb[109].mxu0 }
 0xbb9   : > { %v18279_v61 = vadd.f32 %v18174_v17, %v10705_v57  ;;  %v14217_v23 = vpop.f32.mrb[110].mxu0 }
 0xbba   : > { %10799 = vst.msk [vmem:[%s18179_s23 + $0x70] sm:$0xff] %vm10784_vm9, %v18276_v3  ;;  %v18285_v42 = vadd.f32 %v14217_v23, %v18174_v17  ;;  %v10708_v62 = vpop.f32.mrb[111].mxu0 }
 0xbbb   : > { %10797 = vst.msk [vmem:[%s18179_s23 + $0x60] sm:$0xff] %vm10784_vm9, %v18279_v61  ;;  %v18291_v36 = vadd.f32 %v18174_v17, %v10708_v62  ;;  %v10853_v62 = vsel %vm10784_vm9, %v18279_v61, -inf }
 0xbbc   : > { %10800 = vst.msk [vmem:[%s18179_s23 + $0x78] sm:$0xff] %vm10784_vm9, %v18285_v42  ;;  %10845 = vmax.xlane.f32.xlu1 %v10844_v19 }
 0xbbd   : > { %10798 = vst.msk [vmem:[%s18179_s23 + $0x68] sm:$0xff] %vm10784_vm9, %v18291_v36  ;;  %v10856_v23 = vsel %vm10784_vm9, %v18291_v36, -inf }
 0xbbf   : > { %v14220_v35 = vpop.f32.mrb[112].mxu0 }
 0xbc0   : > { %v18302_v48 = vadd.f32 %v14220_v35, %v18174_v17  ;;  %v10721_v13 = vpop.f32.mrb[113].mxu0 }
 0xbc1   : > { %v18305_v32 = vadd.f32 %v18174_v17, %v10721_v13  ;;  %v14221_v47 = vpop.f32.mrb[114].mxu0 }
 0xbc2   : > { %10803 = vst.msk [vmem:[%s18179_s23 + $0x90] sm:$0xff] %vm10784_vm9, %v18302_v48  ;;  %v18311_v16 = vadd.f32 %v14221_v47, %v18174_v17  ;;  %v10724_v45 = vpop.f32.mrb[115].mxu0  ;;  %v10871_v52 = vsel %vm10784_vm9, %v18302_v48, -inf  ;;  %v10862_v47 = vsel %vm10784_vm9, %v18285_v42, -inf }
 0xbc3   : > { %10801 = vst.msk [vmem:[%s18179_s23 + $0x80] sm:$0xff] %vm10784_vm9, %v18305_v32  ;;  %v18319_v46 = vadd.f32 %v18174_v17, %v10724_v45  ;;  %10872 = vmax.xlane.f32.xlu0 %v10871_v52  ;;  %v10865_v10 = vsel %vm10784_vm9, %v18305_v32, -inf  ;;  %v10859_v45 = vsel %vm10784_vm9, %v18276_v3, -inf }
 0xbc4   : > { %10804 = vst.msk [vmem:[%s18179_s23 + $0x98] sm:$0xff] %vm10784_vm9, %v18311_v16  ;;  %v10874_v9 = vsel %vm10784_vm9, %v18311_v16, -inf }
 0xbc5   : > { %10802 = vst.msk [vmem:[%s18179_s23 + $0x88] sm:$0xff] %vm10784_vm9, %v18319_v46  ;;  %10875 = vmax.xlane.f32.xlu1 %v10874_v9  ;;  %v10868_v24 = vsel %vm10784_vm9, %v18319_v46, -inf }
 0xbc7   : > { %10866 = vmax.xlane.f32.xlu0 %v10865_v10  ;;  %v14224_v63 = vpop.f32.mrb[116].mxu0 }
 0xbc8   : > { %v18332_v27 = vadd.f32 %v14224_v63, %v18174_v17  ;;  %v10737_v25 = vpop.f32.mrb[117].mxu0 }
 0xbc9   : > { %v18335_v28 = vadd.f32 %v18174_v17, %v10737_v25  ;;  %v14225_v51 = vpop.f32.mrb[118].mxu0 }
 0xbca   : > { %10807 = vst.msk [vmem:[%s18179_s23 + $0xb0] sm:$0xff] %vm10784_vm9, %v18332_v27  ;;  %v18341_v59 = vadd.f32 %v14225_v51, %v18174_v17  ;;  %v10740_v40 = vpop.f32.mrb[119].mxu0  ;;  %v10883_v11 = vsel %vm10784_vm9, %v18332_v27, -inf }
 0xbcb   : > { %10805 = vst.msk [vmem:[%s18179_s23 + $0xa0] sm:$0xff] %vm10784_vm9, %v18335_v28  ;;  %v18349_v54 = vadd.f32 %v18174_v17, %v10740_v40  ;;  %10869 = vmax.xlane.f32.xlu0 %v10868_v24  ;;  %v10877_v22 = vsel %vm10784_vm9, %v18335_v28, -inf }
 0xbcc   : > { %10808 = vst.msk [vmem:[%s18179_s23 + $0xb8] sm:$0xff] %vm10784_vm9, %v18341_v59  ;;  %v10886_v14 = vsel %vm10784_vm9, %v18341_v59, -inf }
 0xbcd   : > { %10806 = vst.msk [vmem:[%s18179_s23 + $0xa8] sm:$0xff] %vm10784_vm9, %v18349_v54  ;;  %10887 = vmax.xlane.f32.xlu1 %v10886_v14  ;;  %v10880_v56 = vsel %vm10784_vm9, %v18349_v54, -inf }
 0xbcf   : > { %10884 = vmax.xlane.f32.xlu0 %v10883_v11  ;;  %v14228_v53 = vpop.f32.mrb[120].mxu0 }
 0xbd0   : > { %v18362_v18 = vadd.f32 %v14228_v53, %v18174_v17  ;;  %v10753_v34 = vpop.f32.mrb[121].mxu0 }
 0xbd1   : > { %v18367_v41 = vadd.f32 %v18174_v17, %v10753_v34  ;;  %10881 = vmax.xlane.f32.xlu1 %v10880_v56  ;;  %v14229_v12 = vpop.f32.mrb[122].mxu0 }
 0xbd2   : > { %10811 = vst.msk [vmem:[%s18179_s23 + $0xd0] sm:$0xff] %vm10784_vm9, %v18362_v18  ;;  %v18373_v7 = vadd.f32 %v14229_v12, %v18174_v17  ;;  %v10756_v38 = vpop.f32.mrb[123].mxu0  ;;  %v10895_v29 = vsel %vm10784_vm9, %v18362_v18, -inf }
 0xbd3   : > { %10809 = vst.msk [vmem:[%s18179_s23 + $0xc0] sm:$0xff] %vm10784_vm9, %v18367_v41  ;;  %v18381_v43 = vadd.f32 %v18174_v17, %v10756_v38  ;;  %10878 = vmax.xlane.f32.xlu0 %v10877_v22  ;;  %v10889_v6 = vsel %vm10784_vm9, %v18367_v41, -inf }
 0xbd4   : > { %10812 = vst.msk [vmem:[%s18179_s23 + $0xd8] sm:$0xff] %vm10784_vm9, %v18373_v7  ;;  %v10898_v55 = vsel %vm10784_vm9, %v18373_v7, -inf }
 0xbd5   : > { %10810 = vst.msk [vmem:[%s18179_s23 + $0xc8] sm:$0xff] %vm10784_vm9, %v18381_v43  ;;  %10899 = vmax.xlane.f32.xlu1 %v10898_v55  ;;  %v10892_v0 = vsel %vm10784_vm9, %v18381_v43, -inf }
 0xbd7   : > { %10896 = vmax.xlane.f32.xlu0 %v10895_v29  ;;  %v14232_v30 = vpop.f32.mrb[124].mxu0 }
 0xbd8   : > { %v18394_v33 = vadd.f32 %v14232_v30, %v18174_v17  ;;  %v10769_v58 = vpop.f32.mrb[125].mxu0 }
 0xbd9   : > { %v18399_v15 = vadd.f32 %v18174_v17, %v10769_v58  ;;  %10893 = vmax.xlane.f32.xlu1 %v10892_v0  ;;  %v14233_v50 = vpop.f32.mrb[126].mxu0 }
 0xbda   : > { %10815 = vst.msk [vmem:[%s18179_s23 + $0xf0] sm:$0xff] %vm10784_vm9, %v18394_v33  ;;  %v18405_v37 = vadd.f32 %v14233_v50, %v18174_v17  ;;  %v10772_v26 = vpop.f32.mrb[127].mxu0  ;;  %v10907_v13 = vsel %vm10784_vm9, %v18394_v33, -inf }
 0xbdb   : > { %10813 = vst.msk [vmem:[%s18179_s23 + $0xe0] sm:$0xff] %vm10784_vm9, %v18399_v15  ;;  %v18413_v57 = vadd.f32 %v18174_v17, %v10772_v26  ;;  %10890 = vmax.xlane.f32.xlu0 %v10889_v6  ;;  %v10901_v17 = vsel %vm10784_vm9, %v18399_v15, -inf }
 0xbdc   : > { %10816 = vst.msk [vmem:[%s18179_s23 + $0xf8] sm:$0xff] %vm10784_vm9, %v18405_v37  ;;  %v10910_v35 = vsel %vm10784_vm9, %v18405_v37, -inf }
 0xbdd   : > { %10814 = vst.msk [vmem:[%s18179_s23 + $0xe8] sm:$0xff] %vm10784_vm9, %v18413_v57  ;;  %10857 = vmax.xlane.f32.xlu1 %v10856_v23  ;;  %v10904_v19 = vsel %vm10784_vm9, %v18413_v57, -inf  ;;  %s15492_s23 = scalar_lea.vmem %s18672_s5, 64 }
 0xbde   : > { %p15493_p11 = scmp.ne.s32.totalorder %s18672_s5, %s15492_s23 }
 0xbdf   : > { %10854 = vmax.xlane.f32.xlu0 %v10853_v62 }
 0xbe0   : > { %p15494_p12 = pnand %p15493_p11, %p15693_p5 }
 0xbe1   : > { %10905 = vmax.xlane.f32.xlu1 %v10904_v19 }
 0xbe2   : > { %p15495_p13 = pneg %p15494_p12 }
 0xbe3   : > { %10902 = vmax.xlane.f32.xlu0 %v10901_v17 }
 0xbe5   : > { %10911 = vmax.xlane.f32.xlu1 %v10910_v35 }
 0xbe7   : > { %10908 = vmax.xlane.f32.xlu0 %v10907_v13 }
 0xbe9   : > { %10863 = vmax.xlane.f32.xlu1 %v10862_v47 }
 0xbeb   : > { %10860 = vmax.xlane.f32.xlu0 %v10859_v45 }
 0xc30   : > { %v10825_v52 = vpop.xlane.xlu0 %10824 }
 0xc31   : > { %v10915_v9 = vsub.f32 %v18182_v4, %v10825_v52  ;;  %v10819_v10 = vpop.xlane.xlu1 %10818 }
 0xc32   : > { %v10913_v63 = vsub.f32 %v18185_v1, %v10819_v10 }
 0xc33   : > { %v10949_v25 = vmul.f32 1.442695, %v10915_v9 }
 0xc34   : > { %v10945_v51 = vmul.f32 1.442695, %v10913_v63 }
 0xc35   : > { %15364 = vpow2.f32 %v10949_v25  ;;  %v10828_v40 = vpop.xlane.xlu1 %10827 }
 0xc36   : > { %v10916_v24 = vsub.f32 %v18191_v60, %v10828_v40  ;;  %15366 = vpow2.f32 %v10945_v51 }
 0xc38   : > { %v10951_v14 = vmul.f32 1.442695, %v10916_v24  ;;  %v10837_v11 = vpop.xlane.xlu0 %10836 }
 0xc39   : > { %v10919_v53 = vsub.f32 %v18212_v5, %v10837_v11  ;;  %v10822_v34 = vpop.xlane.xlu1 %10821 }
 0xc3a   : > { %15368 = vpow2.f32 %v10951_v14  ;;  %v10914_v56 = vsub.f32 %v18199_v2, %v10822_v34 }
 0xc3b   : > { %v10957_v12 = vmul.f32 1.442695, %v10919_v53 }
 0xc3c   : > { %v10947_v4 = vmul.f32 1.442695, %v10914_v56  ;;  %v10831_v38 = vpop.xlane.xlu0 %10830 }
 0xc3d   : > { %15370 = vpow2.f32 %v10957_v12  ;;  %v10917_v1 = vsub.f32 %v18215_v31, %v10831_v38  ;;  %v10840_v22 = vpop.xlane.xlu1 %10839 }
 0xc3e   : > { %15372 = vpow2.f32 %v10947_v4  ;;  %v10920_v55 = vsub.f32 %v18221_v21, %v10840_v22 }
 0xc3f   : > { %v18444_v60 = vpop.eup %15364  ;;  %v10953_v29 = vmul.f32 1.442695, %v10917_v1 }
 0xc40   : > { %v10959_v30 = vmul.f32 1.442695, %v10920_v55  ;;  %v10849_v58 = vpop.xlane.xlu0 %10848  ;;  %v11015_v5 = vsel %vm10784_vm9, %v18444_v60, 0.0  ;;  %v18448_v0 = vpop.eup %15366 }
 0xc41   : > { %15374 = vpow2.f32 %v10953_v29  ;;  %v10923_v2 = vsub.f32 %v18244_v49, %v10849_v58  ;;  %v10834_v50 = vpop.xlane.xlu1 %10833  ;;  %11016 = vadd.xlane.f32.xlu0 %v11015_v5  ;;  %v11009_v62 = vsel %vm10784_vm9, %v18448_v0, 0.0 }
 0xc42   : > { %15376 = vpow2.f32 %v10959_v30  ;;  %v10918_v31 = vsub.f32 %v18229_v20, %v10834_v50 }
 0xc43   : > { %v10965_v26 = vmul.f32 1.442695, %v10923_v2 }
 0xc44   : > { %v18452_v21 = vpop.eup %15368  ;;  %v10955_v6 = vmul.f32 1.442695, %v10918_v31  ;;  %v10843_v23 = vpop.xlane.xlu0 %10842 }
 0xc45   : > { %15378 = vpow2.f32 %v10965_v26  ;;  %v10921_v19 = vsub.f32 %v18247_v44, %v10843_v23  ;;  %v10852_v17 = vpop.xlane.xlu1 %10851  ;;  %11010 = vadd.xlane.f32.xlu0 %v11009_v62  ;;  %v11018_v49 = vsel %vm10784_vm9, %v18452_v21, 0.0 }
 0xc46   : > { %15380 = vpow2.f32 %v10955_v6  ;;  %v10924_v35 = vsub.f32 %v18253_v39, %v10852_v17  ;;  %11019 = vadd.xlane.f32.xlu1 %v11018_v49 }
 0xc47   : > { %v18460_v20 = vpop.eup %15370  ;;  %v10961_v13 = vmul.f32 1.442695, %v10921_v19 }
 0xc48   : > { %v18462_v47 = vpop.eup %15372  ;;  %v10967_v45 = vmul.f32 1.442695, %v10924_v35  ;;  %v11027_v52 = vsel %vm10784_vm9, %v18460_v20, 0.0 }
 0xc49   : > { %15382 = vpow2.f32 %v10961_v13  ;;  %v10846_v44 = vpop.xlane.xlu1 %10845  ;;  %11028 = vadd.xlane.f32.xlu0 %v11027_v52  ;;  %v11012_v9 = vsel %vm10784_vm9, %v18462_v47, 0.0 }
 0xc4a   : > { %15384 = vpow2.f32 %v10967_v45  ;;  %v10922_v10 = vsub.f32 %v18261_v8, %v10846_v44  ;;  %11013 = vadd.xlane.f32.xlu1 %v11012_v9 }
 0xc4b   : > { %v18469_v39 = vpop.eup %15374 }
 0xc4c   : > { %v18471_v63 = vpop.eup %15376  ;;  %v10963_v25 = vmul.f32 1.442695, %v10922_v10  ;;  %v11021_v51 = vsel %vm10784_vm9, %v18469_v39, 0.0 }
 0xc4d   : > { %11022 = vadd.xlane.f32.xlu0 %v11021_v51  ;;  %v11030_v40 = vsel %vm10784_vm9, %v18471_v63, 0.0 }
 0xc4e   : > { %15386 = vpow2.f32 %v10963_v25  ;;  %11031 = vadd.xlane.f32.xlu1 %v11030_v40 }
 0xc4f   : > { %v18477_v24 = vpop.eup %15378 }
 0xc50   : > { %v18479_v14 = vpop.eup %15380  ;;  %v10873_v8 = vpop.xlane.xlu0 %10872  ;;  %v11039_v11 = vsel %vm10784_vm9, %v18477_v24, 0.0 }
 0xc51   : > { %v10931_v53 = vsub.f32 %v18302_v48, %v10873_v8  ;;  %11040 = vadd.xlane.f32.xlu0 %v11039_v11  ;;  %v11024_v34 = vsel %vm10784_vm9, %v18479_v14, 0.0 }
 0xc52   : > { %v10876_v56 = vpop.xlane.xlu1 %10875  ;;  %11025 = vadd.xlane.f32.xlu1 %v11024_v34 }
 0xc53   : > { %v18486_v12 = vpop.eup %15382  ;;  %v10981_v4 = vmul.f32 1.442695, %v10931_v53  ;;  %v10932_v38 = vsub.f32 %v18311_v16, %v10876_v56 }
 0xc54   : > { %v18489_v1 = vpop.eup %15384  ;;  %v10867_v22 = vpop.xlane.xlu0 %10866  ;;  %v11033_v55 = vsel %vm10784_vm9, %v18486_v12, 0.0 }
 0xc55   : > { %15388 = vpow2.f32 %v10981_v4  ;;  %v10983_v29 = vmul.f32 1.442695, %v10932_v38  ;;  %v10929_v48 = vsub.f32 %v18305_v32, %v10867_v22  ;;  %11034 = vadd.xlane.f32.xlu0 %v11033_v55  ;;  %v11042_v30 = vsel %vm10784_vm9, %v18489_v1, 0.0 }
 0xc56   : > { %11043 = vadd.xlane.f32.xlu1 %v11042_v30 }
 0xc57   : > { %15390 = vpow2.f32 %v10983_v29  ;;  %v10977_v58 = vmul.f32 1.442695, %v10929_v48 }
 0xc58   : > { %v18496_v5 = vpop.eup %15386  ;;  %v10870_v16 = vpop.xlane.xlu0 %10869 }
 0xc59   : > { %15392 = vpow2.f32 %v10977_v58  ;;  %v10930_v2 = vsub.f32 %v18319_v46, %v10870_v16  ;;  %v11036_v50 = vsel %vm10784_vm9, %v18496_v5, 0.0 }
 0xc5a   : > { %v10888_v31 = vpop.xlane.xlu1 %10887  ;;  %11037 = vadd.xlane.f32.xlu1 %v11036_v50 }
 0xc5b   : > { %v10979_v26 = vmul.f32 1.442695, %v10930_v2  ;;  %v10936_v32 = vsub.f32 %v18341_v59, %v10888_v31 }
 0xc5c   : > { %v10885_v6 = vpop.xlane.xlu0 %10884 }
 0xc5d   : > { %15394 = vpow2.f32 %v10979_v26  ;;  %v10991_v23 = vmul.f32 1.442695, %v10936_v32  ;;  %v10935_v62 = vsub.f32 %v18332_v27, %v10885_v6 }
 0xc5e   : > { %v10882_v19 = vpop.xlane.xlu1 %10881 }
 0xc5f   : > { %v18503_v17 = vpop.eup %15388  ;;  %15396 = vpow2.f32 %v10991_v23  ;;  %v10989_v49 = vmul.f32 1.442695, %v10935_v62  ;;  %v10934_v46 = vsub.f32 %v18349_v54, %v10882_v19 }
 0xc60   : > { %v10879_v35 = vpop.xlane.xlu0 %10878  ;;  %v11063_v13 = vsel %vm10784_vm9, %v18503_v17, 0.0 }
 0xc61   : > { %v18508_v45 = vpop.eup %15390  ;;  %15398 = vpow2.f32 %v10989_v49  ;;  %v10987_v59 = vmul.f32 1.442695, %v10934_v46  ;;  %v10933_v52 = vsub.f32 %v18335_v28, %v10879_v35  ;;  %11064 = vadd.xlane.f32.xlu0 %v11063_v13 }
 0xc62   : > { %v10900_v44 = vpop.xlane.xlu1 %10899  ;;  %v11066_v27 = vsel %vm10784_vm9, %v18508_v45, 0.0 }
 0xc63   : > { %v18513_v9 = vpop.eup %15392  ;;  %15400 = vpow2.f32 %v10987_v59  ;;  %v10985_v10 = vmul.f32 1.442695, %v10933_v52  ;;  %v10940_v54 = vsub.f32 %v18373_v7, %v10900_v44  ;;  %11067 = vadd.xlane.f32.xlu1 %v11066_v27 }
 0xc64   : > { %v10897_v25 = vpop.xlane.xlu0 %10896  ;;  %v11057_v51 = vsel %vm10784_vm9, %v18513_v9, 0.0 }
 0xc65   : > { %15402 = vpow2.f32 %v10985_v10  ;;  %v10999_v40 = vmul.f32 1.442695, %v10940_v54  ;;  %v10939_v28 = vsub.f32 %v18362_v18, %v10897_v25  ;;  %11058 = vadd.xlane.f32.xlu0 %v11057_v51 }
 0xc66   : > { %v10894_v8 = vpop.xlane.xlu1 %10893 }
 0xc67   : > { %v18519_v11 = vpop.eup %15394  ;;  %15404 = vpow2.f32 %v10999_v40  ;;  %v10997_v53 = vmul.f32 1.442695, %v10939_v28  ;;  %v10938_v34 = vsub.f32 %v18381_v43, %v10894_v8 }
 0xc68   : > { %v10891_v56 = vpop.xlane.xlu0 %10890  ;;  %v11060_v7 = vsel %vm10784_vm9, %v18519_v11, 0.0 }
 0xc69   : > { %v18524_v4 = vpop.eup %15396  ;;  %15406 = vpow2.f32 %v10997_v53  ;;  %v10995_v38 = vmul.f32 1.442695, %v10938_v34  ;;  %v10937_v22 = vsub.f32 %v18367_v41, %v10891_v56  ;;  %11061 = vadd.xlane.f32.xlu1 %v11060_v7 }
 0xc6a   : > { %v10858_v18 = vpop.xlane.xlu1 %10857  ;;  %v11078_v43 = vsel %vm10784_vm9, %v18524_v4, 0.0 }
 0xc6b   : > { %v18527_v55 = vpop.eup %15398  ;;  %15408 = vpow2.f32 %v10995_v38  ;;  %v10993_v29 = vmul.f32 1.442695, %v10937_v22  ;;  %v10926_v48 = vsub.f32 %v18291_v36, %v10858_v18 }
 0xc6c   : > { %v10855_v30 = vpop.xlane.xlu0 %10854  ;;  %v11075_v58 = vsel %vm10784_vm9, %v18527_v55, 0.0 }
 0xc6d   : > { %v18534_v16 = vpop.eup %15400  ;;  %15410 = vpow2.f32 %v10993_v29  ;;  %v10971_v2 = vmul.f32 1.442695, %v10926_v48  ;;  %v10925_v41 = vsub.f32 %v18279_v61, %v10855_v30  ;;  %11079 = vadd.xlane.f32.xlu1 %v11078_v43  ;;  %11076 = vadd.xlane.f32.xlu0 %v11075_v58 }
 0xc6e   : > { %v10906_v50 = vpop.xlane.xlu1 %10905  ;;  %v11072_v6 = vsel %vm10784_vm9, %v18534_v16, 0.0 }
 0xc6f   : > { %v18537_v31 = vpop.eup %15402  ;;  %15412 = vpow2.f32 %v10971_v2  ;;  %v10969_v36 = vmul.f32 1.442695, %v10925_v41  ;;  %v10942_v26 = vsub.f32 %v18413_v57, %v10906_v50 }
 0xc70   : > { %v10903_v32 = vpop.xlane.xlu0 %10902  ;;  %v11069_v23 = vsel %vm10784_vm9, %v18537_v31, 0.0 }
 0xc71   : > { %v18544_v62 = vpop.eup %15404  ;;  %15414 = vpow2.f32 %v10969_v36  ;;  %v11003_v61 = vmul.f32 1.442695, %v10942_v26  ;;  %v10941_v19 = vsub.f32 %v18399_v15, %v10903_v32  ;;  %11073 = vadd.xlane.f32.xlu1 %v11072_v6  ;;  %11070 = vadd.xlane.f32.xlu0 %v11069_v23  ;;  %v18600_v36 = vld [vmem:[%s18763_s19] sm:$0xff]  ;;  %s15496_s19 = sshll.u32 %s15559_s26, 4  ;;  %s15497_s19 = int_to_ptr.vmem [resolvable:$false] %s15496_s19 }
 0xc72   : > { %v10912_v49 = vpop.xlane.xlu1 %10911  ;;  %v11090_v59 = vsel %vm10784_vm9, %v18544_v62, 0.0  ;;  %v11171_v26 = vcombine.high %v18600_v36, %v18600_v36  ;;  %s15498_s29 = scalar_lea.vmem %s15497_s19, 128  ;;  %p15499_p0 = scmp.lt.s32.totalorder %s18672_s5, %s15497_s19 }
 0xc73   : > { %v18547_v46 = vpop.eup %15406  ;;  %15416 = vpow2.f32 %v11003_v61  ;;  %v11001_v57 = vmul.f32 1.442695, %v10941_v19  ;;  %v10944_v35 = vsub.f32 %v18405_v37, %v10912_v49  ;;  %p15500_p1 = scmp.lt.s32.totalorder %s15498_s29, %s15492_s23 }
 0xc74   : > { %v10909_v13 = vpop.xlane.xlu0 %10908  ;;  %v11087_v52 = vsel %vm10784_vm9, %v18547_v46, 0.0  ;;  %11237 = vmatprep.mubr.f32.mxu0 %v11171_v26 }
 0xc75   : > { %v18554_v44 = vpop.eup %15408  ;;  %15418 = vpow2.f32 %v11001_v57  ;;  %v11007_v15 = vmul.f32 1.442695, %v10944_v35  ;;  %v10943_v27 = vsub.f32 %v18394_v33, %v10909_v13  ;;  %11091 = vadd.xlane.f32.xlu1 %v11090_v59  ;;  %11088 = vadd.xlane.f32.xlu0 %v11087_v52  ;;  %p15501_p2 = por %p15500_p1, %p15499_p0 }
 0xc76   : > { %v10864_v10 = vpop.xlane.xlu1 %10863  ;;  %v11084_v40 = vsel %vm10784_vm9, %v18554_v44, 0.0 }
 0xc77   : > { %v18557_v54 = vpop.eup %15410  ;;  %15420 = vpow2.f32 %v11007_v15  ;;  %v11005_v37 = vmul.f32 1.442695, %v10943_v27  ;;  %v10928_v25 = vsub.f32 %v18285_v42, %v10864_v10  ;;  %p15502_p3 = pnand %p15501_p2, %p15495_p13 }
 0xc78   : > { %v10861_v51 = vpop.xlane.xlu0 %10860  ;;  %v11081_v28 = vsel %vm10784_vm9, %v18557_v54, 0.0 }
 0xc79   : > { %v18564_v8 = vpop.eup %15412  ;;  %15422 = vpow2.f32 %v11005_v37  ;;  %v10975_v33 = vmul.f32 1.442695, %v10928_v25  ;;  %v10927_v53 = vsub.f32 %v18276_v3, %v10861_v51  ;;  %11085 = vadd.xlane.f32.xlu1 %v11084_v40  ;;  %11082 = vadd.xlane.f32.xlu0 %v11081_v28 }
 0xc7a   : > { %v11048_v42 = vsel %vm10784_vm9, %v18564_v8, 0.0 }
 0xc7b   : > { %v18567_v34 = vpop.eup %15414  ;;  %15424 = vpow2.f32 %v10975_v33  ;;  %v10973_v56 = vmul.f32 1.442695, %v10927_v53 }
 0xc7c   : > { %v11045_v7 = vsel %vm10784_vm9, %v18567_v34, 0.0 }
 0xc7d   : > { %v18573_v38 = vpop.eup %15416  ;;  %15426 = vpow2.f32 %v10973_v56  ;;  %11049 = vadd.xlane.f32.xlu1 %v11048_v42  ;;  %11046 = vadd.xlane.f32.xlu0 %v11045_v7 }
 0xc7e   : > { %v11096_v3 = vsel %vm10784_vm9, %v18573_v38, 0.0 }
 0xc7f   : > { %v18575_v22 = vpop.eup %15418 }
 0xc80   : > { %v11093_v18 = vsel %vm10784_vm9, %v18575_v22, 0.0 }
 0xc81   : > { %v18581_v29 = vpop.eup %15420  ;;  %11097 = vadd.xlane.f32.xlu1 %v11096_v3  ;;  %11094 = vadd.xlane.f32.xlu0 %v11093_v18 }
 0xc82   : > { %v11102_v30 = vsel %vm10784_vm9, %v18581_v29, 0.0 }
 0xc83   : > { %v18583_v48 = vpop.eup %15422 }
 0xc84   : > { %v11099_v43 = vsel %vm10784_vm9, %v18583_v48, 0.0 }
 0xc85   : > { %v18589_v58 = vpop.eup %15424  ;;  %11103 = vadd.xlane.f32.xlu1 %v11102_v30  ;;  %11100 = vadd.xlane.f32.xlu0 %v11099_v43 }
 0xc86   : > { %v11054_v41 = vsel %vm10784_vm9, %v18589_v58, 0.0 }
 0xc87   : > { %v18591_v2 = vpop.eup %15426 }
 0xc88   : > { %v11051_v50 = vsel %vm10784_vm9, %v18591_v2, 0.0 }
 0xc89   : > { %11055 = vadd.xlane.f32.xlu1 %v11054_v41  ;;  %11052 = vadd.xlane.f32.xlu0 %v11051_v50 }
 0xcce   : > { %v11017_v32 = vpop.xlane.xlu0 %11016 }
 0xcd2   : > { %v11011_v6 = vpop.xlane.xlu0 %11010 }
 0xcd3   : > { %v11020_v23 = vpop.xlane.xlu1 %11019  ;;  %15428 = vrcp.f32 %v11011_v6 }
 0xcd6   : > { %v11029_v19 = vpop.xlane.xlu0 %11028 }
 0xcd7   : > { %v11014_v61 = vpop.xlane.xlu1 %11013 }
 0xcd8   : > { %15430 = vrcp.f32 %v11014_v61 }
 0xcda   : > { %v11023_v57 = vpop.xlane.xlu0 %11022 }
 0xcdb   : > { %v11032_v49 = vpop.xlane.xlu1 %11031 }
 0xcdd   : > { %v15429_v28 = vpop.eup %15428 }
 0xcde   : > { %v18604_v13 = vpop.xlane.xlu0 %11040 }
 0xcdf   : > { %v11026_v35 = vpop.xlane.xlu1 %11025 }
 0xce2   : > { %v11035_v52 = vpop.xlane.xlu0 %11034  ;;  %v15431_v33 = vpop.eup %15430 }
 0xce3   : > { %v18606_v59 = vpop.xlane.xlu1 %11043  ;;  %v11108_v30 = vmul.f32 %v15431_v33, %v18462_v47 }
 0xce7   : > { %v11038_v15 = vpop.xlane.xlu1 %11037 }
 0xcee   : > { %v11065_v27 = vpop.xlane.xlu0 %11064 }
 0xcf0   : > { %v11068_v10 = vpop.xlane.xlu1 %11067 }
 0xcf1   : > { %15432 = vrcp.f32 %v11068_v10 }
 0xcf2   : > { %v11059_v37 = vpop.xlane.xlu0 %11058 }
 0xcf3   : > { %15434 = vrcp.f32 %v11059_v37 }
 0xcf4   : > { %15436 = vrcp.f32 %v11065_v27 }
 0xcf6   : > { %v11062_v25 = vpop.xlane.xlu1 %11061 }
 0xcf7   : > { %15438 = vrcp.f32 %v11062_v25 }
 0xcf8   : > { %15440 = vrcp.f32 %v11020_v23  ;;  %v11106_v23 = vmul.f32 %v15429_v28, %v18448_v0 }
 0xcf9   : > { %15442 = vrcp.f32 %v11017_v32 }
 0xcfa   : > { %v11080_v51 = vpop.xlane.xlu1 %11079  ;;  %v11077_v40 = vpop.xlane.xlu0 %11076  ;;  %15444 = vrcp.f32 %v11023_v57  ;;  %v14394_v47 = vpack.c.bf16 %v11108_v30, %v11106_v23 }
 0xcfb   : > { %15446 = vrcp.f32 %v11026_v35  ;;  %v15433_v53 = vpop.eup %15432 }
 0xcfc   : > { %15448 = vrcp.f32 %v11080_v51  ;;  %v11144_v6 = vmul.f32 %v15433_v53, %v18508_v45 }
 0xcfd   : > { %15450 = vrcp.f32 %v11077_v40  ;;  %v15435_v7 = vpop.eup %15434 }
 0xcfe   : > { %v11074_v56 = vpop.xlane.xlu1 %11073  ;;  %v11071_v42 = vpop.xlane.xlu0 %11070  ;;  %v11138_v26 = vmul.f32 %v15435_v7, %v18513_v9 }
 0xcff   : > { %15452 = vrcp.f32 %v11074_v56  ;;  %v15437_v3 = vpop.eup %15436 }
 0xd00   : > { %15454 = vrcp.f32 %v11071_v42 }
 0xd01   : > { %v15439_v18 = vpop.eup %15438  ;;  %15456 = vrcp.f32 %v11032_v49  ;;  %v11142_v49 = vmul.f32 %v15437_v3, %v18503_v17 }
 0xd02   : > { %v15441_v43 = vpop.eup %15440  ;;  %15458 = vrcp.f32 %v11029_v19  ;;  %v11092_v41 = vpop.xlane.xlu1 %11091  ;;  %v11140_v32 = vmul.f32 %v15439_v18, %v18519_v11 }
 0xd03   : > { %v11089_v50 = vpop.xlane.xlu0 %11088  ;;  %15460 = vrcp.f32 %v11035_v52  ;;  %v15443_v61 = vpop.eup %15442  ;;  %v11112_v19 = vmul.f32 %v15441_v43, %v18452_v21  ;;  %v14396_v10 = vpack.c.bf16 %v11144_v6, %v11142_v49 }
 0xd04   : > { %15462 = vrcp.f32 %v11038_v15  ;;  %v14392_v57 = vpack.c.bf16 %v11140_v32, %v11138_v26  ;;  %v15445_v35 = vpop.eup %15444  ;;  %v11110_v0 = vmul.f32 %v15443_v61, %v18444_v60 }
 0xd05   : > { %15464 = vrcp.f32 %v11092_v41  ;;  %v15447_v27 = vpop.eup %15446 }
 0xd06   : > { %15466 = vrcp.f32 %v11089_v50  ;;  %v11086_v9 = vpop.xlane.xlu1 %11085  ;;  %14393 = vmatprep.subr.bf16.mxu0 %v14392_v57  ;;  %v15449_v45 = vpop.eup %15448  ;;  %v14398_v15 = vpack.c.bf16 %v11112_v19, %v11110_v0  ;;  %v11116_v40 = vmul.f32 %v15447_v27, %v18479_v14 }
 0xd07   : > { %v11083_v11 = vpop.xlane.xlu0 %11082  ;;  %15468 = vrcp.f32 %v11086_v9  ;;  %14395 = vmatpush3.bf16.msra.mxu0 %v14394_v47  ;;  %v15451_v52 = vpop.eup %15450  ;;  %v11152_v53 = vmul.f32 %v15449_v45, %v18524_v4 }
 0xd08   : > { %15470 = vrcp.f32 %v11083_v11  ;;  %14397 = vmatprep.subr.bf16.mxu0 %v14396_v10  ;;  %v11150_v33 = vmul.f32 %v15451_v52, %v18527_v55 }
 0xd09   : > { %v15453_v17 = vpop.eup %15452  ;;  %15472 = vrcp.f32 %v18606_v59  ;;  %v11114_v59 = vmul.f32 %v15445_v35, %v18469_v39 }
 0xd0a   : > { %v15455_v37 = vpop.eup %15454  ;;  %v11050_v21 = vpop.xlane.xlu1 %11049  ;;  %v11148_v51 = vmul.f32 %v15453_v17, %v18534_v16  ;;  %15474 = vrcp.f32 %v18604_v13 }
 0xd0b   : > { %v11047_v25 = vpop.xlane.xlu0 %11046  ;;  %v15457_v28 = vpop.eup %15456  ;;  %14399 = vmatpush3.bf16.msra.mxu0 %v14398_v15  ;;  %v11146_v60 = vmul.f32 %v15455_v37, %v18537_v31  ;;  %15476 = vrcp.f32 %v11050_v21  ;;  %v14402_v18 = vpack.c.bf16 %v11116_v40, %v11114_v59  ;;  %v14404_v31 = vpack.c.bf16 %v11152_v53, %v11150_v33  ;;  %v15363_v33 = vld [vmem:[%s18727_s15 + $0x8] sm:$0xff]   ;;  %v12292_v53 = vld [vmem:[%s18726_s14] ss:$0 sm:$0xff] }
 0xd0c   : > { %v15459_v56 = vpop.eup %15458  ;;  %15478 = vrcp.f32 %v11047_v25  ;;  %v11120_v13 = vmul.f32 %v15457_v28, %v18471_v63  ;;  %v18764_v40 = vmov 0.0  }
 0xd0d   : > { %v15461_v42 = vpop.eup %15460  ;;  %v14400_v7 = vpack.c.bf16 %v11148_v51, %v11146_v60  ;;  %v11118_v4 = vmul.f32 %v15459_v56, %v18460_v20 }
 0xd0e   : > { %v15463_v16 = vpop.eup %15462  ;;  %v11098_v3 = vpop.xlane.xlu1 %11097  ;;  %v11122_v20 = vmul.f32 %v15461_v42, %v18486_v12 }
 0xd0f   : > { %v11095_v14 = vpop.xlane.xlu0 %11094  ;;  %v15465_v30 = vpop.eup %15464  ;;  %15480 = vrcp.f32 %v11098_v3  ;;  %14401 = vmatprep.subr.bf16.mxu0 %v14400_v7  ;;  %v14406_v26 = vpack.c.bf16 %v11120_v13, %v11118_v4  ;;  %v11124_v6 = vmul.f32 %v15463_v16, %v18496_v5 }
 0xd10   : > { %v15467_v55 = vpop.eup %15466  ;;  %15482 = vrcp.f32 %v11095_v14  ;;  %14403 = vmatpush3.bf16.msra.mxu0 %v14402_v18  ;;  %v11160_v57 = vmul.f32 %v15465_v30, %v18544_v62  ;;  %v12294_v18 = vld [vmem:[%s18728_s16] ss:$0 sm:$0xff] }
 0xd11   : > { %v15469_v43 = vpop.eup %15468  ;;  %14405 = vmatprep.subr.bf16.mxu0 %v14404_v31  ;;  %v11158_v61 = vmul.f32 %v15467_v55, %v18547_v46 }
 0xd12   : > { %v15471_v39 = vpop.eup %15470  ;;  %v11104_v41 = vpop.xlane.xlu1 %11103  ;;  %v11156_v32 = vmul.f32 %v15469_v43, %v18554_v44  ;;  %v14410_v44 = vpack.c.bf16 %v11124_v6, %v11122_v20 }
 0xd13   : > { %v11101_v50 = vpop.xlane.xlu0 %11100  ;;  %v15473_v63 = vpop.eup %15472  ;;  %15484 = vrcp.f32 %v11104_v41  ;;  %v11154_v23 = vmul.f32 %v15471_v39, %v18557_v54  ;;  %v14412_v54 = vpack.c.bf16 %v11160_v57, %v11158_v61 }
 0xd14   : > { %15486 = vrcp.f32 %v11101_v50  ;;  %14407 = vmatpush3.bf16.msra.mxu0 %v14406_v26  ;;  %v15475_v49 = vpop.eup %15474  ;;  %v11128_v5 = vmul.f32 %v15473_v63, %v18489_v1 }
 0xd15   : > { %v14408_v35 = vpack.c.bf16 %v11156_v32, %v11154_v23  ;;  %v15477_v47 = vpop.eup %15476  ;;  %v11126_v62 = vmul.f32 %v15475_v49, %v18477_v24 }
 0xd16   : > { %v11056_v19 = vpop.xlane.xlu1 %11055  ;;  %v15479_v9 = vpop.eup %15478  ;;  %v11132_v0 = vmul.f32 %v15477_v47, %v18564_v8 }
 0xd17   : > { %v11053_v27 = vpop.xlane.xlu0 %11052  ;;  %15488 = vrcp.f32 %v11056_v19  ;;  %14409 = vmatprep.subr.bf16.mxu0 %v14408_v35  ;;  %v14414_v12 = vpack.c.bf16 %v11128_v5, %v11126_v62  ;;  %v11130_v45 = vmul.f32 %v15479_v9, %v18567_v34 }
 0xd18   : > { %15490 = vrcp.f32 %v11053_v27  ;;  %14411 = vmatpush3.bf16.msra.mxu0 %v14410_v44 }
 0xd19   : > { %v15481_v46 = vpop.eup %15480  ;;  %14413 = vmatprep.subr.bf16.mxu0 %v14412_v54  ;;  %v14418_v37 = vpack.c.bf16 %v11132_v0, %v11130_v45 }
 0xd1a   : > { %v15483_v11 = vpop.eup %15482  ;;  %v11164_v10 = vmul.f32 %v15481_v46, %v18573_v38 }
 0xd1b   : > { %v11162_v1 = vmul.f32 %v15483_v11, %v18575_v22 }
 0xd1c   : > { %14415 = vmatpush3.bf16.msra.mxu0 %v14414_v12 }
 0xd1d   : > { %v15485_v52 = vpop.eup %15484  ;;  %v14416_v17 = vpack.c.bf16 %v11164_v10, %v11162_v1 }
 0xd1e   : > { %v15487_v15 = vpop.eup %15486  ;;  %v11168_v21 = vmul.f32 %v15485_v52, %v18581_v29  ;;  %v11244_v29 = vld [vmem:[%s18725_s13] sm:$0x3] }
 0xd1f   : > { %14417 = vmatprep.subr.bf16.mxu0 %v14416_v17  ;;  %v11166_v24 = vmul.f32 %v15487_v15, %v18583_v48  ;;  %v11256_v48 = vsel %vm737_vm1, %v11244_v29, 0 }
 0xd20   : > { %14419 = vmatpush3.bf16.msra.mxu0 %v14418_v37 }
 0xd21   : > { %v15489_v25 = vpop.eup %15488  ;;  %v14420_v51 = vpack.c.bf16 %v11168_v21, %v11166_v24 }
 0xd22   : > { %v15491_v38 = vpop.eup %15490  ;;  %v11136_v34 = vmul.f32 %v15489_v25, %v18589_v58 }
 0xd23   : > { %14421 = vmatprep.subr.bf16.mxu0 %v14420_v51  ;;  %v11134_v8 = vmul.f32 %v15491_v38, %v18591_v2 }
 0xd25   : > { %v14422_v22 = vpack.c.bf16 %v11136_v34, %v11134_v8 }
 0xd27   : > { %14423 = vmatpush3.bf16.msra.mxu0 %v14422_v22 }
 0xd28   : > { %14234 = vmatprep.subr.bf16.mxu0 %v18764_v40 }
 0xd2a   : > { %11238 = vmatmul.mubr.f32.vlgmr.msra.gmra.mrb[128].mxu0 %v18600_v36  ;;  %v15362_v36 = vld [vmem:[%s18727_s15] sm:$0xff]  }
 0xd2b   : > { %14236 = vmatprep.mubr.msk.bf16.mxu0 %vm15558_vm10, %v18764_v40  ;;  %14235 = vmatpush3.bf16.msra.mxu0 %v11256_v48 }
 0xd2c   : > { %14240 = vmatprep.subr.bf16.mxu0 %v18764_v40 }
 0xdfd   : > { %v13120_v58 = vpop.f32.mrb[128].mxu0 }
 0xdfe   : > { %v13121_v2 = vpop.f32.mrb[129].mxu0 }
 0xdff   : > { %v13122_v28 = vadd.f32 %v13121_v2, %v13120_v58 }
 0xe01   : > { %v11243_v60 = vpack.c.bf16 %v13122_v28, %v13122_v28 }
 0xe03   : > { %14237 = vmatmul.mubr.msk.bf16.vlgmr.msra.gmra.mrb[132].mxu0 %vm10784_vm9, %v11243_v60 }
 0xe04   : > { %14244 = vmatprep.mubr.msk.bf16.mxu0 %vm15558_vm10, %v18764_v40  ;;  %14241 = vmatpush3.bf16.msra.mxu0 %v15362_v36 }
 0xe05   : > { %14242 = vmatprep.subr.bf16.mxu0 %v18764_v40 }
 0xe08   : > { %14243 = vmatpush3.bf16.msra.mxu0 %v15363_v33 }
 0xed6   : > { %v11292_v56 = vpop.f32.mrb[132].mxu0 }
 0xed7   : > { %v11293_v59 = vadd.f32 %v12292_v53, %v11292_v56  ;;  %v14238_v42 = vpop.f32.mrb[133].mxu0 }
 0xed8   : > { %v11295_v7 = vpop.f32.mrb[134].mxu0 }
 0xed9   : > { %v11298_v16 = vmax.f32 %v11293_v59, 0.0  ;;  %v14239_v3 = vpop.f32.mrb[135].mxu0 }
 0xedb   : > { %v11299_v14 = vpack.c.bf16 %v11298_v16, %v11298_v16 }
 0xedd   : > { %14245 = vmatmul.mubr.msk.bf16.vlgmr.msra.gmra.mrb[136].mxu0 %vm11323_vm11, %v11299_v14 }
 0xfb0   : > { %v11361_v13 = vpop.f32.mrb[136].mxu0 }
 0xfb1   : > { %v11362_v30 = vadd.f32 %v12294_v18, %v11361_v13  ;;  %v14246_v31 = vpop.f32.mrb[137].mxu0 }
 0xfb2   : > { %v11364_v55 = vpop.f32.mrb[138].mxu0 }
 0xfb3   : > { %v14247_v4 = vpop.f32.mrb[139].mxu0  ;;  %11368 = vst.msk [vmem:[%s569_s4] sm:$0xf] %vm11367_vm12, %v11362_v30 }
 0xfb4   : > { %15505 = shalt.err (!%p15502_p3)
}
 0xfb5   : > { %s15506_s20 = scalar_lea.hbm %s18670_s1, 64  ;;  %s15510_s24 = scalar_lea.hbm %s18729_s17, 128 }
 0xfb6   : > { %p15507_p4 = scmp.ne.s32.totalorder %s18670_s1, %s15506_s20  ;;  %p15511_p9 = scmp.lt.u32.totalorder %s18670_s1, %s18729_s17 }
 0xfb7   : > { %p15512_p10 = scmp.lt.u32.totalorder %s15510_s24, %s15506_s20  ;;  %p15514_p12 = scmp.lt.u32.totalorder %s15506_s20, %s18670_s1 }
 0xfb8   : > { %p15508_p7 = pnand %p15507_p4, %p15693_p5 }
 0xfb9   : > { %p15513_p11 = por %p15512_p10, %p15511_p9 }
 0xfba   : > { %p15509_p8 = pneg %p15508_p7 }
 0xfbb   : > { %p15515_p13 = por %p15514_p12, %p15513_p11 }
 0xfbd   : > { %p15516_p0 = pnand %p15515_p13, %p15509_p8 }
 0xfbf   : > { %15519 = shalt.err (!%p15516_p0)
}
 0xfc0   : > { %15310 = dma.vmem_to_hbm [thread:$0]  (%p15693_p5), %s18672_s5, 64, %s18670_s1, %s11370_s0  }
 0xfc1 PF: > { %p15316_p1 = scmp.ge.s32.totalorder %s15554_s30, 2  ;;  %s11403_s19 = sand.u32 1, %s15542_s27  }
 0xfc2   : > { %s11404_s29 = scalar_lea.sflag [#allocation6], %s11403_s19 }
 0xfc3   : > { %p15313_p2 = pnand %p15316_p1, %p15697_p6 }
 0xfc5   : > { %15537 = dma.done.wait (!%p15313_p2), %s11404_s29, 64  }
 0xfc6   : > { %15539 = vsyncadd (!%p15313_p2), %s11404_s29, 4294967232  ;;  %s18766_s30 = sld [smem:[#allocation9_spill]]  ;;  %s18767_s20 = sld [smem:[#allocation8_spill]] }
 0xfc7   : > { %s18768_s29 = sld [smem:[#allocation10_spill]]  ;;  %s18769_s27 = smov %s15546_s28 }
 0xfcc   : > { %p29_p3 = scmp.ge.s32.totalorder %s18766_s30, 4   ;;  %s18770_s28 = smov %s18767_s20 }
 0xfce   :  { %31 = sbr.rel (!%p29_p3) target bundleno = 9 (0x9), region = 178 }
 0xfd5   :  { %11417 = vsyncpa [#allocation6], 1 }
 0xfd6   :  { %11419 = vsyncpa [#allocation6 + $0x1], 1 }

</bundles_post_ra>
